<compile_context>
chip_gen: v7x
topology: tpu7x:2x2x1
jax: 0.10.0
libtpu: 0.0.40
codegen_flags: <defaults>
</compile_context>

<pallas_src>
import jax
import jax.numpy as jnp
from jax import lax
from jax.experimental import pallas as pl
from jax.experimental.pallas import tpu as pltpu

LANE = 128
SUBLANE = 8


def _round_up(x, m):
    return ((x + m - 1) // m) * m


def _pick_chunk(T, cap):
    """Largest divisor of T that is <= cap (always >= 1)."""
    cap = max(1, min(int(cap), T))
    if T <= cap:
        return T
    for tc in range(cap, 0, -1):
        if T % tc == 0:
            return tc
    return T


def _device_flags():
    try:
        kind = jax.devices()[0].device_kind.lower()
    except Exception:
        kind = ""
    is_v7 = "7" in kind
    is_v6 = ("v6" in kind) or ("6e" in kind)
    big_vmem = any(v in kind for v in ("v3", "v4", "v5", "v6"))  # 128 MiB VMEM
    return is_v6, is_v7, big_vmem


# ---------------------------------------------------------------------------
# Pallas kernel
# ---------------------------------------------------------------------------
def _make_kernel(num_layers, T, Tc, B_tile, I_pad, Hg, Wg, compute_dtype):
    n_chunks = T // Tc
    cd = compute_dtype
    # Unroll audit: keep unroll modest so h/c + gate temporaries do not spill
    # onto the vld/vst slots already carrying gin reads and seq stores.
    if Tc <= 8:
        unroll = True
    elif Tc % 4 == 0:
        unroll = 4
    elif Tc % 2 == 0:
        unroll = 2
    else:
        unroll = 1

    def kernel(*args):
        # args = [x, (w_ih, w_hh, b) * L, fc_w, fc_b, out, gin_scratch, seq_scratch]
        x_ref = args[0]
        layer_refs = args[1:1 + 3 * num_layers]
        fc_w_ref = args[1 + 3 * num_layers]
        fc_b_ref = args[2 + 3 * num_layers]
        out_ref = args[3 + 3 * num_layers]
        gin_ref = args[4 + 3 * num_layers]   # f32 ((1|2)*Tc, B_tile, Wg)
        seq_ref = args[5 + 3 * num_layers]   # cd  (T or 1,   B_tile, Hg)

        h_final = None
        for l in range(num_layers):
            w_ih_ref = layer_refs[3 * l]
            w_hh_ref = layer_refs[3 * l + 1]
            b_ref = layer_refs[3 * l + 2]
            is_last = (l == num_layers - 1)
            in_w = I_pad if l == 0 else Hg

            def project(chunk, slot, _l=l, _in_w=in_w,
                        _w_ih_ref=w_ih_ref, _b_ref=b_ref):
                # x-side gates for one time chunk: a single MXU matmul with
                # the bias folded in (hoisted out of the recurrence).
                src = x_ref if _l == 0 else seq_ref
                xin = src[pl.ds(chunk * Tc, Tc)].reshape(Tc * B_tile, _in_w)
                gin = (jnp.dot(xin.astype(cd), _w_ih_ref[...],
                               preferred_element_type=jnp.float32)
                       + _b_ref[...])                       # (Tc*B_tile, Wg) f32
                gin_ref[pl.ds(slot * Tc, Tc)] = gin.reshape(Tc, B_tile, Wg)

            def run_steps(gin_base, seq_base, h, c,
                          _w_hh_ref=w_hh_ref, _is_last=is_last):
                def step(t, carry):
                    h2, c2 = carry
                    # only the small h-side matmul remains on the serial path.
                    gates = gin_ref[gin_base + t] + jnp.dot(
                        h2.astype(cd), _w_hh_ref[...],
                        preferred_element_type=jnp.float32)   # (B_tile, Wg)
                    i_g = jax.nn.sigmoid(gates[:, 0 * Hg:1 * Hg])
                    f_g = jax.nn.sigmoid(gates[:, 1 * Hg:2 * Hg])
                    g_g = jnp.tanh(gates[:, 2 * Hg:3 * Hg])
                    o_g = jax.nn.sigmoid(gates[:, 3 * Hg:4 * Hg])
                    c_new = f_g * c2 + i_g * g_g
                    h_new = o_g * jnp.tanh(c_new)
                    if not _is_last:            # last layer only needs h[T-1]
                        seq_ref[seq_base + t] = h_new.astype(seq_ref.dtype)
                    return (h_new, c_new)
                return lax.fori_loop(0, Tc, step, (h, c), unroll=unroll)

            def chunk_body(k, carry, _project=project, _run=run_steps):
                h, c = carry
                slot = k % 2
                # double buffer: project chunk k+1 into the spare slot while
                # chunk k's recurrence runs on this slot.
                @pl.when(k + 1 < n_chunks)
                def _():
                    _project(k + 1, 1 - slot)
                return _run(slot * Tc, k * Tc, h, c)

            h0 = jnp.zeros((B_tile, Hg), jnp.float32)
            c0 = jnp.zeros((B_tile, Hg), jnp.float32)
            project(0, 0)                     # prologue fills slot 0
            if n_chunks == 1:
                h_final, _ = run_steps(0, 0, h0, c0)
            else:
                h_final, _ = lax.fori_loop(0, n_chunks, chunk_body, (h0, c0))

        # FC head on the last hidden state of the last layer.
        out = (jnp.dot(h_final.astype(cd), fc_w_ref[...],
                       preferred_element_type=jnp.float32)
               + fc_b_ref[...])                               # (B_tile, O_pad)
        out_ref[...] = out.astype(out_ref.dtype)

    return kernel


# ---------------------------------------------------------------------------
# Wrapper: padding / layout plumbing + pallas_call
# ---------------------------------------------------------------------------
def trades_generator_forward(x, params, *, compute_dtype=jnp.bfloat16):
    """x: (B, T, input_size) float32.

    compute_dtype is used only for MXU operands (weights, x, inter-layer seq);
    the recurrence state and all gate math stay f32, so bf16 (default) is safe
    on v5e/v6e/v7x.
    """
    B, T, I = x.shape
    H = params["hidden_size"]
    O = params["output_size"]
    L = params["num_layers"]
    if O < 3:
        raise ValueError("TradesGenerator requires output_size >= 3 "
                         "(it writes out[:, 2] = relu(out[:, 1])).")

    is_v6, is_v7, big_vmem = _device_flags()

    # ---- gate / lane geometry --------------------------------------------
    if 4 * H <= LANE:
        Hg, Wg = H, LANE          # small-H: pack [i|f|g|o] into one lane block
    else:
        Hg = _round_up(H, LANE)   # each gate gets its own 128-lane block(s)
        Wg = 4 * Hg
    I_pad = _round_up(max(I, LANE), LANE)
    O_pad = _round_up(max(O, LANE), LANE)

    # ---- batch tiling ------------------------------------------------------
    B8 = _round_up(max(B, SUBLANE), SUBLANE)
    b_tile_cap = 256 if is_v6 else 128          # v6e 256-wide MXU; 128 elsewhere
    B_tile = min(B8, b_tile_cap)
    if is_v7 and B8 <= b_tile_cap and B8 >= 2 * SUBLANE:
        # v7x has 2 TensorCores: make sure the "parallel" batch grid has >= 2
        # steps.  TODO(synk): use pltpu.CORE_PARALLEL / core_map to guarantee
        # the cross-core split.
        B_tile = _round_up((B8 + 1) // 2, SUBLANE)
    B_pad = _round_up(B8, B_tile)
    n_btiles = B_pad // B_tile

    # ---- time chunking: caps gin scratch at O(2*Tc) regardless of T -------
    gin_budget = (12 if is_v7 else 24) * 1024 * 1024
    tc_cap = max(SUBLANE, gin_budget // (2 * B_tile * Wg * 4))
    Tc = _pick_chunk(T, min(tc_cap, 64))
    n_chunks = T // Tc
    gin_rows = (2 if n_chunks > 1 else 1) * Tc
    seq_rows = T if L > 1 else 1

    # ---- operands (padded; MXU operands in compute_dtype) ------------------
    # time-major, batch- and feature-padded input, stored in compute_dtype so
    # the HBM->VMEM DMA is halved in the bf16 path.
    x_tbi = jnp.transpose(x, (1, 0, 2)).astype(compute_dtype)       # (T, B, I)
    x_tbi = jnp.pad(x_tbi, ((0, 0), (0, B_pad - B), (0, I_pad - I)))

    def gate_pad(w_t, in_dim, in_pad):
        # w_t: (in_dim, 4H), gate-major columns [i|f|g|o] -> (in_pad, Wg).
        w4 = w_t.reshape(in_dim, 4, H)
        w4 = jnp.pad(w4, ((0, in_pad - in_dim), (0, 0), (0, Hg - H)))
        w = w4.reshape(in_pad, 4 * Hg)
        if Wg > 4 * Hg:
            w = jnp.pad(w, ((0, 0), (0, Wg - 4 * Hg)))
        return w.astype(compute_dtype)

    def bias_pad(b):
        b4 = b.reshape(4, H)
        b4 = jnp.pad(b4, ((0, 0), (0, Hg - H))).reshape(1, 4 * Hg)
        if Wg > 4 * Hg:
            b4 = jnp.pad(b4, ((0, 0), (0, Wg - 4 * Hg)))
        return b4.astype(jnp.float32)

    flat_weights = []
    for l in range(L):
        in_dim = I if l == 0 else H
        in_pad = I_pad if l == 0 else Hg
        flat_weights += [
            gate_pad(jnp.transpose(params[f"w_ih_{l}"]), in_dim, in_pad),
            gate_pad(jnp.transpose(params[f"w_hh_{l}"]), H, Hg),
            bias_pad(params[f"b_ih_{l}"] + params[f"b_hh_{l}"]),
        ]

    fc_w = jnp.pad(jnp.transpose(params["fc_w"]),
                   ((0, Hg - H), (0, O_pad - O))).astype(compute_dtype)
    fc_b = jnp.pad(params["fc_b"], ((0, O_pad - O),)).reshape(1, O_pad)
    fc_b = fc_b.astype(jnp.float32)

    # NOTE: zero-padded weight/bias columns + zero initial (h, c) keep padded
    # hidden lanes exactly 0 through the recurrence.  If nonzero initial
    # states are ever supported, the padded lanes must be masked explicitly.

    kernel = _make_kernel(L, T, Tc, B_tile, I_pad, Hg, Wg, compute_dtype)
    vmem_cap = (100 if big_vmem else 56) * 1024 * 1024   # 56 MiB on v7x-class

    def build(single_buffer_weights):
        # Weight/bias blocks never change across the batch grid; request a
        # single VMEM buffer for them when supported.
        wkw = ({"pipeline_mode": pl.Buffered(buffer_count=1)}
               if single_buffer_weights else {})
        in_specs = [pl.BlockSpec((T, B_tile, I_pad), lambda b: (0, b, 0))]
        for l in range(L):
            in_pad = I_pad if l == 0 else Hg
            in_specs += [
                pl.BlockSpec((in_pad, Wg), lambda b: (0, 0), **wkw),
                pl.BlockSpec((Hg, Wg), lambda b: (0, 0), **wkw),
                pl.BlockSpec((1, Wg), lambda b: (0, 0), **wkw),
            ]
        in_specs += [
            pl.BlockSpec((Hg, O_pad), lambda b: (0, 0), **wkw),
            pl.BlockSpec((1, O_pad), lambda b: (0, 0), **wkw),
        ]
        return pl.pallas_call(
            kernel,
            out_shape=jax.ShapeDtypeStruct((B_pad, O_pad), jnp.float32),
            grid=(n_btiles,),
            in_specs=in_specs,
            out_specs=pl.BlockSpec((B_tile, O_pad), lambda b: (b, 0)),
            scratch_shapes=[
                pltpu.VMEM((gin_rows, B_tile, Wg), jnp.float32),   # x-side gates
                pltpu.VMEM((seq_rows, B_tile, Hg), compute_dtype),  # inter-layer seq
            ],
            compiler_params=pltpu.CompilerParams(
                dimension_semantics=("parallel",),   # batch tiles across cores
                vmem_limit_bytes=vmem_cap,
            ),
        )

    inputs = (x_tbi, *flat_weights, fc_w, fc_b)
    try:
        out_pad = build(True)(*inputs)
    except Exception:
        # pl.Buffered(1) not accepted on this JAX version: fall back to the
        # default (double-buffered) weight blocks.
        out_pad = build(False)(*inputs)

    # slice off padding, then out[:, 2] = relu(out[:, 1]) on the tiny (B, O).
    out = out_pad[:B, :O]
    out = out.at[:, 2].set(jnp.maximum(out[:, 1], 0.0))
    return out


# ---------------------------------------------------------------------------
# Deterministic parameter init (PyTorch-style uniform(-1/sqrt(H), 1/sqrt(H)))
# ---------------------------------------------------------------------------
def init_params(key, input_size, hidden_size, output_size, num_layers):
    bound = 1.0 / jnp.sqrt(hidden_size)
    params = {
        "hidden_size": hidden_size,
        "output_size": output_size,
        "num_layers": num_layers,
    }
    for l in range(num_layers):
        in_dim = input_size if l == 0 else hidden_size
        key, k1, k2, k3, k4 = jax.random.split(key, 5)
        params[f"w_ih_{l}"] = jax.random.uniform(
            k1, (4 * hidden_size, in_dim), jnp.float32, -bound, bound)
        params[f"w_hh_{l}"] = jax.random.uniform(
            k2, (4 * hidden_size, hidden_size), jnp.float32, -bound, bound)
        params[f"b_ih_{l}"] = jax.random.uniform(
            k3, (4 * hidden_size,), jnp.float32, -bound, bound)
        params[f"b_hh_{l}"] = jax.random.uniform(
            k4, (4 * hidden_size,), jnp.float32, -bound, bound)
    key, k1, k2 = jax.random.split(key, 3)
    params["fc_w"] = jax.random.uniform(
        k1, (output_size, hidden_size), jnp.float32, -bound, bound)
    params["fc_b"] = jax.random.uniform(
        k2, (output_size,), jnp.float32, -bound, bound)
    return params


# ---------------------------------------------------------------------------
# Pure-JAX reference (same math, sanity check)
# ---------------------------------------------------------------------------
def reference_forward(x, params):
    B, T, I = x.shape
    H = params["hidden_size"]
    num_layers = params["num_layers"]
    seq = x.astype(jnp.float32)
    for l in range(num_layers):
        w_ih = params[f"w_ih_{l}"]
        w_hh = params[f"w_hh_{l}"]
        b = params[f"b_ih_{l}"] + params[f"b_hh_{l}"]

        def step(carry, x_t):
            h, c = carry
            gates = x_t @ w_ih.T + h @ w_hh.T + b
            i_g = jax.nn.sigmoid(gates[:, 0:H])
            f_g = jax.nn.sigmoid(gates[:, H:2 * H])
            g_g = jnp.tanh(gates[:, 2 * H:3 * H])
            o_g = jax.nn.sigmoid(gates[:, 3 * H:4 * H])
            c_new = f_g * c + i_g * g_g
            h_new = o_g * jnp.tanh(c_new)
            return (h_new, c_new), h_new

        h0 = jnp.zeros((B, H), jnp.float32)
        c0 = jnp.zeros((B, H), jnp.float32)
        (_, _), hs = lax.scan(step, (h0, c0), jnp.transpose(seq, (1, 0, 2)))
        seq = jnp.transpose(hs, (1, 0, 2))
    out = seq[:, -1, :] @ params["fc_w"].T + params["fc_b"]
    out = out.at[:, 2].set(jnp.maximum(out[:, 1], 0.0))
    return out


# ---------------------------------------------------------------------------
if __name__ == "__main__":
    B, T = 2, 8
    input_size, hidden_size, output_size, num_layers = 3, 32, 3, 2

    key = jax.random.PRNGKey(0)
    key, kx = jax.random.split(key)
    x = jax.random.normal(kx, (B, T, input_size), jnp.float32)

    params = init_params(key, input_size, hidden_size, output_size, num_layers)
    ref = reference_forward(x, params)

    # f32 path (accuracy check vs f32 reference)
    out_f32 = jax.block_until_ready(
        trades_generator_forward(x, params, compute_dtype=jnp.float32))
    assert out_f32.shape == (B, output_size)
    assert float(jnp.max(jnp.abs(out_f32 - ref))) < 1e-3, \
        "f32 kernel mismatch vs reference"

    # default path: bf16 MXU operands, f32 recurrence / accumulation
    out = jax.block_until_ready(trades_generator_forward(x, params))
    assert out.shape == (B, output_size)
    assert float(jnp.max(jnp.abs(out - ref))) < 1e-1, \
        "bf16 kernel drifted too far from reference"

    print("KERNEL_OK")
</pallas_src>

<mosaic_0001>
module attributes {stable_mosaic.version = 11 : i64} {
  func.func @kernel(%arg0: i32, %arg1: memref<8x8x128xf32, #tpu.memory_space<vmem>>, %arg2: memref<128x128xf32, #tpu.memory_space<vmem>>, %arg3: memref<32x128xf32, #tpu.memory_space<vmem>>, %arg4: memref<1x128xf32, #tpu.memory_space<vmem>>, %arg5: memref<32x128xf32, #tpu.memory_space<vmem>>, %arg6: memref<32x128xf32, #tpu.memory_space<vmem>>, %arg7: memref<1x128xf32, #tpu.memory_space<vmem>>, %arg8: memref<32x128xf32, #tpu.memory_space<vmem>>, %arg9: memref<1x128xf32, #tpu.memory_space<vmem>>, %arg10: memref<8x128xf32, #tpu.memory_space<vmem>>, %arg11: memref<8x8x128xf32, #tpu.memory_space<vmem>>, %arg12: memref<8x8x32xf32, #tpu.memory_space<vmem>>) attributes {dimension_semantics = [#tpu.dimension_semantics<parallel>], iteration_bounds = array<i64: 1>, scalar_prefetch = 0 : i64, scratch_operands = 2 : i64, tpu.core_type = #tpu.core_type<tc>, window_params = [{transform_indices = @transform_0, window_bounds = array<i64: 8, 8, 128>}, {pipeline_mode = #tpu.pipeline_mode<synchronous>, transform_indices = @transform_1, window_bounds = array<i64: 128, 128>}, {pipeline_mode = #tpu.pipeline_mode<synchronous>, transform_indices = @transform_2, window_bounds = array<i64: 32, 128>}, {pipeline_mode = #tpu.pipeline_mode<synchronous>, transform_indices = @transform_3, window_bounds = array<i64: 1, 128>}, {pipeline_mode = #tpu.pipeline_mode<synchronous>, transform_indices = @transform_4, window_bounds = array<i64: 32, 128>}, {pipeline_mode = #tpu.pipeline_mode<synchronous>, transform_indices = @transform_5, window_bounds = array<i64: 32, 128>}, {pipeline_mode = #tpu.pipeline_mode<synchronous>, transform_indices = @transform_6, window_bounds = array<i64: 1, 128>}, {pipeline_mode = #tpu.pipeline_mode<synchronous>, transform_indices = @transform_7, window_bounds = array<i64: 32, 128>}, {pipeline_mode = #tpu.pipeline_mode<synchronous>, transform_indices = @transform_8, window_bounds = array<i64: 1, 128>}, {transform_indices = @transform_9, window_bounds = array<i64: 8, 128>}]} {
    %cst = arith.constant 0.000000e+00 : f32
    %0 = vector.broadcast %cst : f32 to vector<8x32xf32>
    %cst_0 = arith.constant 0.000000e+00 : f32
    %1 = vector.broadcast %cst_0 : f32 to vector<8x32xf32>
    %c0 = arith.constant 0 : index
    %c0_1 = arith.constant 0 : index
    %c0_2 = arith.constant 0 : index
    %2 = vector.load %arg1[%c0, %c0_1, %c0_2] : memref<8x8x128xf32, #tpu.memory_space<vmem>>, vector<8x8x128xf32>
    %3 = vector.shape_cast %2 : vector<8x8x128xf32> to vector<64x128xf32>
    %c0_3 = arith.constant 0 : index
    %c0_4 = arith.constant 0 : index
    %4 = vector.load %arg2[%c0_3, %c0_4] : memref<128x128xf32, #tpu.memory_space<vmem>>, vector<128x128xf32>
    %cst_5 = arith.constant dense<0.000000e+00> : vector<64x128xf32>
    %5 = tpu.matmul %3, %4, %cst_5 {dimension_numbers = #tpu.dot_dimension_numbers<[1], [0], [0], [1], [0, 0, 1, 1], [], []>} : vector<64x128xf32>, vector<128x128xf32>, vector<64x128xf32> -> vector<64x128xf32>
    %c0_6 = arith.constant 0 : index
    %c0_7 = arith.constant 0 : index
    %6 = vector.load %arg4[%c0_6, %c0_7] : memref<1x128xf32, #tpu.memory_space<vmem>>, vector<1x128xf32>
    %7 = vector.broadcast %6 : vector<1x128xf32> to vector<64x128xf32>
    %8 = arith.addf %5, %7 : vector<64x128xf32>
    %9 = vector.shape_cast %8 : vector<64x128xf32> to vector<8x8x128xf32>
    %c0_8 = arith.constant 0 : index
    %c0_9 = arith.constant 0 : index
    %c0_10 = arith.constant 0 : index
    %10 = vector.load %arg11[%c0_8, %c0_9, %c0_10] : memref<8x8x128xf32, #tpu.memory_space<vmem>>, vector<8x8x128xf32>
    tpu.vector_store %arg11[%c0_8, %c0_9, %c0_10], %9 {strides = array<i32>} : memref<8x8x128xf32, #tpu.memory_space<vmem>>, vector<8x8x128xf32>,
    %c0_i32 = arith.constant 0 : i32
    %c0_i32_11 = arith.constant 0 : i32
    %11 = arith.addi %c0_i32_11, %c0_i32 : i32
    %12 = arith.index_cast %11 : i32 to index
    %c0_12 = arith.constant 0 : index
    %c0_13 = arith.constant 0 : index
    %13 = vector.load %arg11[%12, %c0_12, %c0_13] : memref<8x8x128xf32, #tpu.memory_space<vmem>>, vector<1x8x128xf32>
    %14 = vector.shape_cast %13 : vector<1x8x128xf32> to vector<8x128xf32>
    %c0_14 = arith.constant 0 : index
    %c0_15 = arith.constant 0 : index
    %15 = vector.load %arg3[%c0_14, %c0_15] : memref<32x128xf32, #tpu.memory_space<vmem>>, vector<32x128xf32>
    %cst_16 = arith.constant dense<0.000000e+00> : vector<8x128xf32>
    %16 = tpu.matmul %0, %15, %cst_16 {dimension_numbers = #tpu.dot_dimension_numbers<[1], [0], [0], [1], [0, 0, 1, 1], [], []>} : vector<8x32xf32>, vector<32x128xf32>, vector<8x128xf32> -> vector<8x128xf32>
    %17 = arith.addf %14, %16 : vector<8x128xf32>
    %18 = vector.extract_strided_slice %17 {offsets = [0, 0], sizes = [8, 32], strides = [1, 1]} : vector<8x128xf32> to vector<8x32xf32>
    %19 = arith.negf %18 : vector<8x32xf32>
    %20 = math.exp %19 : vector<8x32xf32>
    %cst_17 = arith.constant 1.000000e+00 : f32
    %21 = vector.broadcast %cst_17 : f32 to vector<8x32xf32>
    %22 = arith.addf %21, %20 : vector<8x32xf32>
    %23 = arith.divf %21, %22 : vector<8x32xf32>
    %24 = vector.extract_strided_slice %17 {offsets = [0, 32], sizes = [8, 32], strides = [1, 1]} : vector<8x128xf32> to vector<8x32xf32>
    %25 = arith.negf %24 : vector<8x32xf32>
    %26 = math.exp %25 : vector<8x32xf32>
    %cst_18 = arith.constant 1.000000e+00 : f32
    %27 = vector.broadcast %cst_18 : f32 to vector<8x32xf32>
    %28 = arith.addf %27, %26 : vector<8x32xf32>
    %29 = arith.divf %27, %28 : vector<8x32xf32>
    %30 = vector.extract_strided_slice %17 {offsets = [0, 64], sizes = [8, 32], strides = [1, 1]} : vector<8x128xf32> to vector<8x32xf32>
    %31 = math.tanh %30 : vector<8x32xf32>
    %32 = vector.extract_strided_slice %17 {offsets = [0, 96], sizes = [8, 32], strides = [1, 1]} : vector<8x128xf32> to vector<8x32xf32>
    %33 = arith.negf %32 : vector<8x32xf32>
    %34 = math.exp %33 : vector<8x32xf32>
    %cst_19 = arith.constant 1.000000e+00 : f32
    %35 = vector.broadcast %cst_19 : f32 to vector<8x32xf32>
    %36 = arith.addf %35, %34 : vector<8x32xf32>
    %37 = arith.divf %35, %36 : vector<8x32xf32>
    %38 = arith.mulf %29, %1 : vector<8x32xf32>
    %39 = arith.mulf %23, %31 : vector<8x32xf32>
    %40 = arith.addf %38, %39 : vector<8x32xf32>
    %41 = math.tanh %40 : vector<8x32xf32>
    %42 = arith.mulf %37, %41 : vector<8x32xf32>
    %c0_i32_20 = arith.constant 0 : i32
    %43 = arith.addi %c0_i32_20, %c0_i32 : i32
    %44 = arith.index_cast %43 : i32 to index
    %c0_21 = arith.constant 0 : index
    %c0_22 = arith.constant 0 : index
    %45 = vector.load %arg12[%44, %c0_21, %c0_22] : memref<8x8x32xf32, #tpu.memory_space<vmem>>, vector<1x8x32xf32>
    %46 = vector.shape_cast %45 : vector<1x8x32xf32> to vector<8x32xf32>
    %47 = vector.shape_cast %42 : vector<8x32xf32> to vector<1x8x32xf32>
    tpu.vector_store %arg12[%44, %c0_21, %c0_22], %47 {strides = array<i32>} : memref<8x8x32xf32, #tpu.memory_space<vmem>>, vector<1x8x32xf32>,
    %c1_i32 = arith.constant 1 : i32
    %c0_i32_23 = arith.constant 0 : i32
    %48 = arith.addi %c0_i32_23, %c1_i32 : i32
    %49 = arith.index_cast %48 : i32 to index
    %c0_24 = arith.constant 0 : index
    %c0_25 = arith.constant 0 : index
    %50 = vector.load %arg11[%49, %c0_24, %c0_25] : memref<8x8x128xf32, #tpu.memory_space<vmem>>, vector<1x8x128xf32>
    %51 = vector.shape_cast %50 : vector<1x8x128xf32> to vector<8x128xf32>
    %c0_26 = arith.constant 0 : index
    %c0_27 = arith.constant 0 : index
    %52 = vector.load %arg3[%c0_26, %c0_27] : memref<32x128xf32, #tpu.memory_space<vmem>>, vector<32x128xf32>
    %cst_28 = arith.constant dense<0.000000e+00> : vector<8x128xf32>
    %53 = tpu.matmul %42, %52, %cst_28 {dimension_numbers = #tpu.dot_dimension_numbers<[1], [0], [0], [1], [0, 0, 1, 1], [], []>} : vector<8x32xf32>, vector<32x128xf32>, vector<8x128xf32> -> vector<8x128xf32>
    %54 = arith.addf %51, %53 : vector<8x128xf32>
    %55 = vector.extract_strided_slice %54 {offsets = [0, 0], sizes = [8, 32], strides = [1, 1]} : vector<8x128xf32> to vector<8x32xf32>
    %56 = arith.negf %55 : vector<8x32xf32>
    %57 = math.exp %56 : vector<8x32xf32>
    %cst_29 = arith.constant 1.000000e+00 : f32
    %58 = vector.broadcast %cst_29 : f32 to vector<8x32xf32>
    %59 = arith.addf %58, %57 : vector<8x32xf32>
    %60 = arith.divf %58, %59 : vector<8x32xf32>
    %61 = vector.extract_strided_slice %54 {offsets = [0, 32], sizes = [8, 32], strides = [1, 1]} : vector<8x128xf32> to vector<8x32xf32>
    %62 = arith.negf %61 : vector<8x32xf32>
    %63 = math.exp %62 : vector<8x32xf32>
    %cst_30 = arith.constant 1.000000e+00 : f32
    %64 = vector.broadcast %cst_30 : f32 to vector<8x32xf32>
    %65 = arith.addf %64, %63 : vector<8x32xf32>
    %66 = arith.divf %64, %65 : vector<8x32xf32>
    %67 = vector.extract_strided_slice %54 {offsets = [0, 64], sizes = [8, 32], strides = [1, 1]} : vector<8x128xf32> to vector<8x32xf32>
    %68 = math.tanh %67 : vector<8x32xf32>
    %69 = vector.extract_strided_slice %54 {offsets = [0, 96], sizes = [8, 32], strides = [1, 1]} : vector<8x128xf32> to vector<8x32xf32>
    %70 = arith.negf %69 : vector<8x32xf32>
    %71 = math.exp %70 : vector<8x32xf32>
    %cst_31 = arith.constant 1.000000e+00 : f32
    %72 = vector.broadcast %cst_31 : f32 to vector<8x32xf32>
    %73 = arith.addf %72, %71 : vector<8x32xf32>
    %74 = arith.divf %72, %73 : vector<8x32xf32>
    %75 = arith.mulf %66, %40 : vector<8x32xf32>
    %76 = arith.mulf %60, %68 : vector<8x32xf32>
    %77 = arith.addf %75, %76 : vector<8x32xf32>
    %78 = math.tanh %77 : vector<8x32xf32>
    %79 = arith.mulf %74, %78 : vector<8x32xf32>
    %c0_i32_32 = arith.constant 0 : i32
    %80 = arith.addi %c0_i32_32, %c1_i32 : i32
    %81 = arith.index_cast %80 : i32 to index
    %c0_33 = arith.constant 0 : index
    %c0_34 = arith.constant 0 : index
    %82 = vector.load %arg12[%81, %c0_33, %c0_34] : memref<8x8x32xf32, #tpu.memory_space<vmem>>, vector<1x8x32xf32>
    %83 = vector.shape_cast %82 : vector<1x8x32xf32> to vector<8x32xf32>
    %84 = vector.shape_cast %79 : vector<8x32xf32> to vector<1x8x32xf32>
    tpu.vector_store %arg12[%81, %c0_33, %c0_34], %84 {strides = array<i32>} : memref<8x8x32xf32, #tpu.memory_space<vmem>>, vector<1x8x32xf32>,
    %c2_i32 = arith.constant 2 : i32
    %c0_i32_35 = arith.constant 0 : i32
    %85 = arith.addi %c0_i32_35, %c2_i32 : i32
    %86 = arith.index_cast %85 : i32 to index
    %c0_36 = arith.constant 0 : index
    %c0_37 = arith.constant 0 : index
    %87 = vector.load %arg11[%86, %c0_36, %c0_37] : memref<8x8x128xf32, #tpu.memory_space<vmem>>, vector<1x8x128xf32>
    %88 = vector.shape_cast %87 : vector<1x8x128xf32> to vector<8x128xf32>
    %c0_38 = arith.constant 0 : index
    %c0_39 = arith.constant 0 : index
    %89 = vector.load %arg3[%c0_38, %c0_39] : memref<32x128xf32, #tpu.memory_space<vmem>>, vector<32x128xf32>
    %cst_40 = arith.constant dense<0.000000e+00> : vector<8x128xf32>
    %90 = tpu.matmul %79, %89, %cst_40 {dimension_numbers = #tpu.dot_dimension_numbers<[1], [0], [0], [1], [0, 0, 1, 1], [], []>} : vector<8x32xf32>, vector<32x128xf32>, vector<8x128xf32> -> vector<8x128xf32>
    %91 = arith.addf %88, %90 : vector<8x128xf32>
    %92 = vector.extract_strided_slice %91 {offsets = [0, 0], sizes = [8, 32], strides = [1, 1]} : vector<8x128xf32> to vector<8x32xf32>
    %93 = arith.negf %92 : vector<8x32xf32>
    %94 = math.exp %93 : vector<8x32xf32>
    %cst_41 = arith.constant 1.000000e+00 : f32
    %95 = vector.broadcast %cst_41 : f32 to vector<8x32xf32>
    %96 = arith.addf %95, %94 : vector<8x32xf32>
    %97 = arith.divf %95, %96 : vector<8x32xf32>
    %98 = vector.extract_strided_slice %91 {offsets = [0, 32], sizes = [8, 32], strides = [1, 1]} : vector<8x128xf32> to vector<8x32xf32>
    %99 = arith.negf %98 : vector<8x32xf32>
    %100 = math.exp %99 : vector<8x32xf32>
    %cst_42 = arith.constant 1.000000e+00 : f32
    %101 = vector.broadcast %cst_42 : f32 to vector<8x32xf32>
    %102 = arith.addf %101, %100 : vector<8x32xf32>
    %103 = arith.divf %101, %102 : vector<8x32xf32>
    %104 = vector.extract_strided_slice %91 {offsets = [0, 64], sizes = [8, 32], strides = [1, 1]} : vector<8x128xf32> to vector<8x32xf32>
    %105 = math.tanh %104 : vector<8x32xf32>
    %106 = vector.extract_strided_slice %91 {offsets = [0, 96], sizes = [8, 32], strides = [1, 1]} : vector<8x128xf32> to vector<8x32xf32>
    %107 = arith.negf %106 : vector<8x32xf32>
    %108 = math.exp %107 : vector<8x32xf32>
    %cst_43 = arith.constant 1.000000e+00 : f32
    %109 = vector.broadcast %cst_43 : f32 to vector<8x32xf32>
    %110 = arith.addf %109, %108 : vector<8x32xf32>
    %111 = arith.divf %109, %110 : vector<8x32xf32>
    %112 = arith.mulf %103, %77 : vector<8x32xf32>
    %113 = arith.mulf %97, %105 : vector<8x32xf32>
    %114 = arith.addf %112, %113 : vector<8x32xf32>
    %115 = math.tanh %114 : vector<8x32xf32>
    %116 = arith.mulf %111, %115 : vector<8x32xf32>
    %c0_i32_44 = arith.constant 0 : i32
    %117 = arith.addi %c0_i32_44, %c2_i32 : i32
    %118 = arith.index_cast %117 : i32 to index
    %c0_45 = arith.constant 0 : index
    %c0_46 = arith.constant 0 : index
    %119 = vector.load %arg12[%118, %c0_45, %c0_46] : memref<8x8x32xf32, #tpu.memory_space<vmem>>, vector<1x8x32xf32>
    %120 = vector.shape_cast %119 : vector<1x8x32xf32> to vector<8x32xf32>
    %121 = vector.shape_cast %116 : vector<8x32xf32> to vector<1x8x32xf32>
    tpu.vector_store %arg12[%118, %c0_45, %c0_46], %121 {strides = array<i32>} : memref<8x8x32xf32, #tpu.memory_space<vmem>>, vector<1x8x32xf32>,
    %c3_i32 = arith.constant 3 : i32
    %c0_i32_47 = arith.constant 0 : i32
    %122 = arith.addi %c0_i32_47, %c3_i32 : i32
    %123 = arith.index_cast %122 : i32 to index
    %c0_48 = arith.constant 0 : index
    %c0_49 = arith.constant 0 : index
    %124 = vector.load %arg11[%123, %c0_48, %c0_49] : memref<8x8x128xf32, #tpu.memory_space<vmem>>, vector<1x8x128xf32>
    %125 = vector.shape_cast %124 : vector<1x8x128xf32> to vector<8x128xf32>
    %c0_50 = arith.constant 0 : index
    %c0_51 = arith.constant 0 : index
    %126 = vector.load %arg3[%c0_50, %c0_51] : memref<32x128xf32, #tpu.memory_space<vmem>>, vector<32x128xf32>
    %cst_52 = arith.constant dense<0.000000e+00> : vector<8x128xf32>
    %127 = tpu.matmul %116, %126, %cst_52 {dimension_numbers = #tpu.dot_dimension_numbers<[1], [0], [0], [1], [0, 0, 1, 1], [], []>} : vector<8x32xf32>, vector<32x128xf32>, vector<8x128xf32> -> vector<8x128xf32>
    %128 = arith.addf %125, %127 : vector<8x128xf32>
    %129 = vector.extract_strided_slice %128 {offsets = [0, 0], sizes = [8, 32], strides = [1, 1]} : vector<8x128xf32> to vector<8x32xf32>
    %130 = arith.negf %129 : vector<8x32xf32>
    %131 = math.exp %130 : vector<8x32xf32>
    %cst_53 = arith.constant 1.000000e+00 : f32
    %132 = vector.broadcast %cst_53 : f32 to vector<8x32xf32>
    %133 = arith.addf %132, %131 : vector<8x32xf32>
    %134 = arith.divf %132, %133 : vector<8x32xf32>
    %135 = vector.extract_strided_slice %128 {offsets = [0, 32], sizes = [8, 32], strides = [1, 1]} : vector<8x128xf32> to vector<8x32xf32>
    %136 = arith.negf %135 : vector<8x32xf32>
    %137 = math.exp %136 : vector<8x32xf32>
    %cst_54 = arith.constant 1.000000e+00 : f32
    %138 = vector.broadcast %cst_54 : f32 to vector<8x32xf32>
    %139 = arith.addf %138, %137 : vector<8x32xf32>
    %140 = arith.divf %138, %139 : vector<8x32xf32>
    %141 = vector.extract_strided_slice %128 {offsets = [0, 64], sizes = [8, 32], strides = [1, 1]} : vector<8x128xf32> to vector<8x32xf32>
    %142 = math.tanh %141 : vector<8x32xf32>
    %143 = vector.extract_strided_slice %128 {offsets = [0, 96], sizes = [8, 32], strides = [1, 1]} : vector<8x128xf32> to vector<8x32xf32>
    %144 = arith.negf %143 : vector<8x32xf32>
    %145 = math.exp %144 : vector<8x32xf32>
    %cst_55 = arith.constant 1.000000e+00 : f32
    %146 = vector.broadcast %cst_55 : f32 to vector<8x32xf32>
    %147 = arith.addf %146, %145 : vector<8x32xf32>
    %148 = arith.divf %146, %147 : vector<8x32xf32>
    %149 = arith.mulf %140, %114 : vector<8x32xf32>
    %150 = arith.mulf %134, %142 : vector<8x32xf32>
    %151 = arith.addf %149, %150 : vector<8x32xf32>
    %152 = math.tanh %151 : vector<8x32xf32>
    %153 = arith.mulf %148, %152 : vector<8x32xf32>
    %c0_i32_56 = arith.constant 0 : i32
    %154 = arith.addi %c0_i32_56, %c3_i32 : i32
    %155 = arith.index_cast %154 : i32 to index
    %c0_57 = arith.constant 0 : index
    %c0_58 = arith.constant 0 : index
    %156 = vector.load %arg12[%155, %c0_57, %c0_58] : memref<8x8x32xf32, #tpu.memory_space<vmem>>, vector<1x8x32xf32>
    %157 = vector.shape_cast %156 : vector<1x8x32xf32> to vector<8x32xf32>
    %158 = vector.shape_cast %153 : vector<8x32xf32> to vector<1x8x32xf32>
    tpu.vector_store %arg12[%155, %c0_57, %c0_58], %158 {strides = array<i32>} : memref<8x8x32xf32, #tpu.memory_space<vmem>>, vector<1x8x32xf32>,
    %c4_i32 = arith.constant 4 : i32
    %c0_i32_59 = arith.constant 0 : i32
    %159 = arith.addi %c0_i32_59, %c4_i32 : i32
    %160 = arith.index_cast %159 : i32 to index
    %c0_60 = arith.constant 0 : index
    %c0_61 = arith.constant 0 : index
    %161 = vector.load %arg11[%160, %c0_60, %c0_61] : memref<8x8x128xf32, #tpu.memory_space<vmem>>, vector<1x8x128xf32>
    %162 = vector.shape_cast %161 : vector<1x8x128xf32> to vector<8x128xf32>
    %c0_62 = arith.constant 0 : index
    %c0_63 = arith.constant 0 : index
    %163 = vector.load %arg3[%c0_62, %c0_63] : memref<32x128xf32, #tpu.memory_space<vmem>>, vector<32x128xf32>
    %cst_64 = arith.constant dense<0.000000e+00> : vector<8x128xf32>
    %164 = tpu.matmul %153, %163, %cst_64 {dimension_numbers = #tpu.dot_dimension_numbers<[1], [0], [0], [1], [0, 0, 1, 1], [], []>} : vector<8x32xf32>, vector<32x128xf32>, vector<8x128xf32> -> vector<8x128xf32>
    %165 = arith.addf %162, %164 : vector<8x128xf32>
    %166 = vector.extract_strided_slice %165 {offsets = [0, 0], sizes = [8, 32], strides = [1, 1]} : vector<8x128xf32> to vector<8x32xf32>
    %167 = arith.negf %166 : vector<8x32xf32>
    %168 = math.exp %167 : vector<8x32xf32>
    %cst_65 = arith.constant 1.000000e+00 : f32
    %169 = vector.broadcast %cst_65 : f32 to vector<8x32xf32>
    %170 = arith.addf %169, %168 : vector<8x32xf32>
    %171 = arith.divf %169, %170 : vector<8x32xf32>
    %172 = vector.extract_strided_slice %165 {offsets = [0, 32], sizes = [8, 32], strides = [1, 1]} : vector<8x128xf32> to vector<8x32xf32>
    %173 = arith.negf %172 : vector<8x32xf32>
    %174 = math.exp %173 : vector<8x32xf32>
    %cst_66 = arith.constant 1.000000e+00 : f32
    %175 = vector.broadcast %cst_66 : f32 to vector<8x32xf32>
    %176 = arith.addf %175, %174 : vector<8x32xf32>
    %177 = arith.divf %175, %176 : vector<8x32xf32>
    %178 = vector.extract_strided_slice %165 {offsets = [0, 64], sizes = [8, 32], strides = [1, 1]} : vector<8x128xf32> to vector<8x32xf32>
    %179 = math.tanh %178 : vector<8x32xf32>
    %180 = vector.extract_strided_slice %165 {offsets = [0, 96], sizes = [8, 32], strides = [1, 1]} : vector<8x128xf32> to vector<8x32xf32>
    %181 = arith.negf %180 : vector<8x32xf32>
    %182 = math.exp %181 : vector<8x32xf32>
    %cst_67 = arith.constant 1.000000e+00 : f32
    %183 = vector.broadcast %cst_67 : f32 to vector<8x32xf32>
    %184 = arith.addf %183, %182 : vector<8x32xf32>
    %185 = arith.divf %183, %184 : vector<8x32xf32>
    %186 = arith.mulf %177, %151 : vector<8x32xf32>
    %187 = arith.mulf %171, %179 : vector<8x32xf32>
    %188 = arith.addf %186, %187 : vector<8x32xf32>
    %189 = math.tanh %188 : vector<8x32xf32>
    %190 = arith.mulf %185, %189 : vector<8x32xf32>
    %c0_i32_68 = arith.constant 0 : i32
    %191 = arith.addi %c0_i32_68, %c4_i32 : i32
    %192 = arith.index_cast %191 : i32 to index
    %c0_69 = arith.constant 0 : index
    %c0_70 = arith.constant 0 : index
    %193 = vector.load %arg12[%192, %c0_69, %c0_70] : memref<8x8x32xf32, #tpu.memory_space<vmem>>, vector<1x8x32xf32>
    %194 = vector.shape_cast %193 : vector<1x8x32xf32> to vector<8x32xf32>
    %195 = vector.shape_cast %190 : vector<8x32xf32> to vector<1x8x32xf32>
    tpu.vector_store %arg12[%192, %c0_69, %c0_70], %195 {strides = array<i32>} : memref<8x8x32xf32, #tpu.memory_space<vmem>>, vector<1x8x32xf32>,
    %c5_i32 = arith.constant 5 : i32
    %c0_i32_71 = arith.constant 0 : i32
    %196 = arith.addi %c0_i32_71, %c5_i32 : i32
    %197 = arith.index_cast %196 : i32 to index
    %c0_72 = arith.constant 0 : index
    %c0_73 = arith.constant 0 : index
    %198 = vector.load %arg11[%197, %c0_72, %c0_73] : memref<8x8x128xf32, #tpu.memory_space<vmem>>, vector<1x8x128xf32>
    %199 = vector.shape_cast %198 : vector<1x8x128xf32> to vector<8x128xf32>
    %c0_74 = arith.constant 0 : index
    %c0_75 = arith.constant 0 : index
    %200 = vector.load %arg3[%c0_74, %c0_75] : memref<32x128xf32, #tpu.memory_space<vmem>>, vector<32x128xf32>
    %cst_76 = arith.constant dense<0.000000e+00> : vector<8x128xf32>
    %201 = tpu.matmul %190, %200, %cst_76 {dimension_numbers = #tpu.dot_dimension_numbers<[1], [0], [0], [1], [0, 0, 1, 1], [], []>} : vector<8x32xf32>, vector<32x128xf32>, vector<8x128xf32> -> vector<8x128xf32>
    %202 = arith.addf %199, %201 : vector<8x128xf32>
    %203 = vector.extract_strided_slice %202 {offsets = [0, 0], sizes = [8, 32], strides = [1, 1]} : vector<8x128xf32> to vector<8x32xf32>
    %204 = arith.negf %203 : vector<8x32xf32>
    %205 = math.exp %204 : vector<8x32xf32>
    %cst_77 = arith.constant 1.000000e+00 : f32
    %206 = vector.broadcast %cst_77 : f32 to vector<8x32xf32>
    %207 = arith.addf %206, %205 : vector<8x32xf32>
    %208 = arith.divf %206, %207 : vector<8x32xf32>
    %209 = vector.extract_strided_slice %202 {offsets = [0, 32], sizes = [8, 32], strides = [1, 1]} : vector<8x128xf32> to vector<8x32xf32>
    %210 = arith.negf %209 : vector<8x32xf32>
    %211 = math.exp %210 : vector<8x32xf32>
    %cst_78 = arith.constant 1.000000e+00 : f32
    %212 = vector.broadcast %cst_78 : f32 to vector<8x32xf32>
    %213 = arith.addf %212, %211 : vector<8x32xf32>
    %214 = arith.divf %212, %213 : vector<8x32xf32>
    %215 = vector.extract_strided_slice %202 {offsets = [0, 64], sizes = [8, 32], strides = [1, 1]} : vector<8x128xf32> to vector<8x32xf32>
    %216 = math.tanh %215 : vector<8x32xf32>
    %217 = vector.extract_strided_slice %202 {offsets = [0, 96], sizes = [8, 32], strides = [1, 1]} : vector<8x128xf32> to vector<8x32xf32>
    %218 = arith.negf %217 : vector<8x32xf32>
    %219 = math.exp %218 : vector<8x32xf32>
    %cst_79 = arith.constant 1.000000e+00 : f32
    %220 = vector.broadcast %cst_79 : f32 to vector<8x32xf32>
    %221 = arith.addf %220, %219 : vector<8x32xf32>
    %222 = arith.divf %220, %221 : vector<8x32xf32>
    %223 = arith.mulf %214, %188 : vector<8x32xf32>
    %224 = arith.mulf %208, %216 : vector<8x32xf32>
    %225 = arith.addf %223, %224 : vector<8x32xf32>
    %226 = math.tanh %225 : vector<8x32xf32>
    %227 = arith.mulf %222, %226 : vector<8x32xf32>
    %c0_i32_80 = arith.constant 0 : i32
    %228 = arith.addi %c0_i32_80, %c5_i32 : i32
    %229 = arith.index_cast %228 : i32 to index
    %c0_81 = arith.constant 0 : index
    %c0_82 = arith.constant 0 : index
    %230 = vector.load %arg12[%229, %c0_81, %c0_82] : memref<8x8x32xf32, #tpu.memory_space<vmem>>, vector<1x8x32xf32>
    %231 = vector.shape_cast %230 : vector<1x8x32xf32> to vector<8x32xf32>
    %232 = vector.shape_cast %227 : vector<8x32xf32> to vector<1x8x32xf32>
    tpu.vector_store %arg12[%229, %c0_81, %c0_82], %232 {strides = array<i32>} : memref<8x8x32xf32, #tpu.memory_space<vmem>>, vector<1x8x32xf32>,
    %c6_i32 = arith.constant 6 : i32
    %c0_i32_83 = arith.constant 0 : i32
    %233 = arith.addi %c0_i32_83, %c6_i32 : i32
    %234 = arith.index_cast %233 : i32 to index
    %c0_84 = arith.constant 0 : index
    %c0_85 = arith.constant 0 : index
    %235 = vector.load %arg11[%234, %c0_84, %c0_85] : memref<8x8x128xf32, #tpu.memory_space<vmem>>, vector<1x8x128xf32>
    %236 = vector.shape_cast %235 : vector<1x8x128xf32> to vector<8x128xf32>
    %c0_86 = arith.constant 0 : index
    %c0_87 = arith.constant 0 : index
    %237 = vector.load %arg3[%c0_86, %c0_87] : memref<32x128xf32, #tpu.memory_space<vmem>>, vector<32x128xf32>
    %cst_88 = arith.constant dense<0.000000e+00> : vector<8x128xf32>
    %238 = tpu.matmul %227, %237, %cst_88 {dimension_numbers = #tpu.dot_dimension_numbers<[1], [0], [0], [1], [0, 0, 1, 1], [], []>} : vector<8x32xf32>, vector<32x128xf32>, vector<8x128xf32> -> vector<8x128xf32>
    %239 = arith.addf %236, %238 : vector<8x128xf32>
    %240 = vector.extract_strided_slice %239 {offsets = [0, 0], sizes = [8, 32], strides = [1, 1]} : vector<8x128xf32> to vector<8x32xf32>
    %241 = arith.negf %240 : vector<8x32xf32>
    %242 = math.exp %241 : vector<8x32xf32>
    %cst_89 = arith.constant 1.000000e+00 : f32
    %243 = vector.broadcast %cst_89 : f32 to vector<8x32xf32>
    %244 = arith.addf %243, %242 : vector<8x32xf32>
    %245 = arith.divf %243, %244 : vector<8x32xf32>
    %246 = vector.extract_strided_slice %239 {offsets = [0, 32], sizes = [8, 32], strides = [1, 1]} : vector<8x128xf32> to vector<8x32xf32>
    %247 = arith.negf %246 : vector<8x32xf32>
    %248 = math.exp %247 : vector<8x32xf32>
    %cst_90 = arith.constant 1.000000e+00 : f32
    %249 = vector.broadcast %cst_90 : f32 to vector<8x32xf32>
    %250 = arith.addf %249, %248 : vector<8x32xf32>
    %251 = arith.divf %249, %250 : vector<8x32xf32>
    %252 = vector.extract_strided_slice %239 {offsets = [0, 64], sizes = [8, 32], strides = [1, 1]} : vector<8x128xf32> to vector<8x32xf32>
    %253 = math.tanh %252 : vector<8x32xf32>
    %254 = vector.extract_strided_slice %239 {offsets = [0, 96], sizes = [8, 32], strides = [1, 1]} : vector<8x128xf32> to vector<8x32xf32>
    %255 = arith.negf %254 : vector<8x32xf32>
    %256 = math.exp %255 : vector<8x32xf32>
    %cst_91 = arith.constant 1.000000e+00 : f32
    %257 = vector.broadcast %cst_91 : f32 to vector<8x32xf32>
    %258 = arith.addf %257, %256 : vector<8x32xf32>
    %259 = arith.divf %257, %258 : vector<8x32xf32>
    %260 = arith.mulf %251, %225 : vector<8x32xf32>
    %261 = arith.mulf %245, %253 : vector<8x32xf32>
    %262 = arith.addf %260, %261 : vector<8x32xf32>
    %263 = math.tanh %262 : vector<8x32xf32>
    %264 = arith.mulf %259, %263 : vector<8x32xf32>
    %c0_i32_92 = arith.constant 0 : i32
    %265 = arith.addi %c0_i32_92, %c6_i32 : i32
    %266 = arith.index_cast %265 : i32 to index
    %c0_93 = arith.constant 0 : index
    %c0_94 = arith.constant 0 : index
    %267 = vector.load %arg12[%266, %c0_93, %c0_94] : memref<8x8x32xf32, #tpu.memory_space<vmem>>, vector<1x8x32xf32>
    %268 = vector.shape_cast %267 : vector<1x8x32xf32> to vector<8x32xf32>
    %269 = vector.shape_cast %264 : vector<8x32xf32> to vector<1x8x32xf32>
    tpu.vector_store %arg12[%266, %c0_93, %c0_94], %269 {strides = array<i32>} : memref<8x8x32xf32, #tpu.memory_space<vmem>>, vector<1x8x32xf32>,
    %c7_i32 = arith.constant 7 : i32
    %c0_i32_95 = arith.constant 0 : i32
    %270 = arith.addi %c0_i32_95, %c7_i32 : i32
    %271 = arith.index_cast %270 : i32 to index
    %c0_96 = arith.constant 0 : index
    %c0_97 = arith.constant 0 : index
    %272 = vector.load %arg11[%271, %c0_96, %c0_97] : memref<8x8x128xf32, #tpu.memory_space<vmem>>, vector<1x8x128xf32>
    %273 = vector.shape_cast %272 : vector<1x8x128xf32> to vector<8x128xf32>
    %c0_98 = arith.constant 0 : index
    %c0_99 = arith.constant 0 : index
    %274 = vector.load %arg3[%c0_98, %c0_99] : memref<32x128xf32, #tpu.memory_space<vmem>>, vector<32x128xf32>
    %cst_100 = arith.constant dense<0.000000e+00> : vector<8x128xf32>
    %275 = tpu.matmul %264, %274, %cst_100 {dimension_numbers = #tpu.dot_dimension_numbers<[1], [0], [0], [1], [0, 0, 1, 1], [], []>} : vector<8x32xf32>, vector<32x128xf32>, vector<8x128xf32> -> vector<8x128xf32>
    %276 = arith.addf %273, %275 : vector<8x128xf32>
    %277 = vector.extract_strided_slice %276 {offsets = [0, 0], sizes = [8, 32], strides = [1, 1]} : vector<8x128xf32> to vector<8x32xf32>
    %278 = arith.negf %277 : vector<8x32xf32>
    %279 = math.exp %278 : vector<8x32xf32>
    %cst_101 = arith.constant 1.000000e+00 : f32
    %280 = vector.broadcast %cst_101 : f32 to vector<8x32xf32>
    %281 = arith.addf %280, %279 : vector<8x32xf32>
    %282 = arith.divf %280, %281 : vector<8x32xf32>
    %283 = vector.extract_strided_slice %276 {offsets = [0, 32], sizes = [8, 32], strides = [1, 1]} : vector<8x128xf32> to vector<8x32xf32>
    %284 = arith.negf %283 : vector<8x32xf32>
    %285 = math.exp %284 : vector<8x32xf32>
    %cst_102 = arith.constant 1.000000e+00 : f32
    %286 = vector.broadcast %cst_102 : f32 to vector<8x32xf32>
    %287 = arith.addf %286, %285 : vector<8x32xf32>
    %288 = arith.divf %286, %287 : vector<8x32xf32>
    %289 = vector.extract_strided_slice %276 {offsets = [0, 64], sizes = [8, 32], strides = [1, 1]} : vector<8x128xf32> to vector<8x32xf32>
    %290 = math.tanh %289 : vector<8x32xf32>
    %291 = vector.extract_strided_slice %276 {offsets = [0, 96], sizes = [8, 32], strides = [1, 1]} : vector<8x128xf32> to vector<8x32xf32>
    %292 = arith.negf %291 : vector<8x32xf32>
    %293 = math.exp %292 : vector<8x32xf32>
    %cst_103 = arith.constant 1.000000e+00 : f32
    %294 = vector.broadcast %cst_103 : f32 to vector<8x32xf32>
    %295 = arith.addf %294, %293 : vector<8x32xf32>
    %296 = arith.divf %294, %295 : vector<8x32xf32>
    %297 = arith.mulf %288, %262 : vector<8x32xf32>
    %298 = arith.mulf %282, %290 : vector<8x32xf32>
    %299 = arith.addf %297, %298 : vector<8x32xf32>
    %300 = math.tanh %299 : vector<8x32xf32>
    %301 = arith.mulf %296, %300 : vector<8x32xf32>
    %c0_i32_104 = arith.constant 0 : i32
    %302 = arith.addi %c0_i32_104, %c7_i32 : i32
    %303 = arith.index_cast %302 : i32 to index
    %c0_105 = arith.constant 0 : index
    %c0_106 = arith.constant 0 : index
    %304 = vector.load %arg12[%303, %c0_105, %c0_106] : memref<8x8x32xf32, #tpu.memory_space<vmem>>, vector<1x8x32xf32>
    %305 = vector.shape_cast %304 : vector<1x8x32xf32> to vector<8x32xf32>
    %306 = vector.shape_cast %301 : vector<8x32xf32> to vector<1x8x32xf32>
    tpu.vector_store %arg12[%303, %c0_105, %c0_106], %306 {strides = array<i32>} : memref<8x8x32xf32, #tpu.memory_space<vmem>>, vector<1x8x32xf32>,
    %c8_i32 = arith.constant 8 : i32
    %cst_107 = arith.constant 0.000000e+00 : f32
    %307 = vector.broadcast %cst_107 : f32 to vector<8x32xf32>
    %cst_108 = arith.constant 0.000000e+00 : f32
    %308 = vector.broadcast %cst_108 : f32 to vector<8x32xf32>
    %c0_109 = arith.constant 0 : index
    %c0_110 = arith.constant 0 : index
    %c0_111 = arith.constant 0 : index
    %309 = vector.load %arg12[%c0_109, %c0_110, %c0_111] : memref<8x8x32xf32, #tpu.memory_space<vmem>>, vector<8x8x32xf32>
    %310 = vector.shape_cast %309 : vector<8x8x32xf32> to vector<64x32xf32>
    %c0_112 = arith.constant 0 : index
    %c0_113 = arith.constant 0 : index
    %311 = vector.load %arg5[%c0_112, %c0_113] : memref<32x128xf32, #tpu.memory_space<vmem>>, vector<32x128xf32>
    %cst_114 = arith.constant dense<0.000000e+00> : vector<64x128xf32>
    %312 = tpu.matmul %310, %311, %cst_114 {dimension_numbers = #tpu.dot_dimension_numbers<[1], [0], [0], [1], [0, 0, 1, 1], [], []>} : vector<64x32xf32>, vector<32x128xf32>, vector<64x128xf32> -> vector<64x128xf32>
    %c0_115 = arith.constant 0 : index
    %c0_116 = arith.constant 0 : index
    %313 = vector.load %arg7[%c0_115, %c0_116] : memref<1x128xf32, #tpu.memory_space<vmem>>, vector<1x128xf32>
    %314 = vector.broadcast %313 : vector<1x128xf32> to vector<64x128xf32>
    %315 = arith.addf %312, %314 : vector<64x128xf32>
    %316 = vector.shape_cast %315 : vector<64x128xf32> to vector<8x8x128xf32>
    %c0_117 = arith.constant 0 : index
    %c0_118 = arith.constant 0 : index
    %c0_119 = arith.constant 0 : index
    %317 = vector.load %arg11[%c0_117, %c0_118, %c0_119] : memref<8x8x128xf32, #tpu.memory_space<vmem>>, vector<8x8x128xf32>
    tpu.vector_store %arg11[%c0_117, %c0_118, %c0_119], %316 {strides = array<i32>} : memref<8x8x128xf32, #tpu.memory_space<vmem>>, vector<8x8x128xf32>,
    %c0_i32_120 = arith.constant 0 : i32
    %c0_i32_121 = arith.constant 0 : i32
    %318 = arith.addi %c0_i32_121, %c0_i32_120 : i32
    %319 = arith.index_cast %318 : i32 to index
    %c0_122 = arith.constant 0 : index
    %c0_123 = arith.constant 0 : index
    %320 = vector.load %arg11[%319, %c0_122, %c0_123] : memref<8x8x128xf32, #tpu.memory_space<vmem>>, vector<1x8x128xf32>
    %321 = vector.shape_cast %320 : vector<1x8x128xf32> to vector<8x128xf32>
    %c0_124 = arith.constant 0 : index
    %c0_125 = arith.constant 0 : index
    %322 = vector.load %arg6[%c0_124, %c0_125] : memref<32x128xf32, #tpu.memory_space<vmem>>, vector<32x128xf32>
    %cst_126 = arith.constant dense<0.000000e+00> : vector<8x128xf32>
    %323 = tpu.matmul %307, %322, %cst_126 {dimension_numbers = #tpu.dot_dimension_numbers<[1], [0], [0], [1], [0, 0, 1, 1], [], []>} : vector<8x32xf32>, vector<32x128xf32>, vector<8x128xf32> -> vector<8x128xf32>
    %324 = arith.addf %321, %323 : vector<8x128xf32>
    %325 = vector.extract_strided_slice %324 {offsets = [0, 0], sizes = [8, 32], strides = [1, 1]} : vector<8x128xf32> to vector<8x32xf32>
    %326 = arith.negf %325 : vector<8x32xf32>
    %327 = math.exp %326 : vector<8x32xf32>
    %cst_127 = arith.constant 1.000000e+00 : f32
    %328 = vector.broadcast %cst_127 : f32 to vector<8x32xf32>
    %329 = arith.addf %328, %327 : vector<8x32xf32>
    %330 = arith.divf %328, %329 : vector<8x32xf32>
    %331 = vector.extract_strided_slice %324 {offsets = [0, 32], sizes = [8, 32], strides = [1, 1]} : vector<8x128xf32> to vector<8x32xf32>
    %332 = arith.negf %331 : vector<8x32xf32>
    %333 = math.exp %332 : vector<8x32xf32>
    %cst_128 = arith.constant 1.000000e+00 : f32
    %334 = vector.broadcast %cst_128 : f32 to vector<8x32xf32>
    %335 = arith.addf %334, %333 : vector<8x32xf32>
    %336 = arith.divf %334, %335 : vector<8x32xf32>
    %337 = vector.extract_strided_slice %324 {offsets = [0, 64], sizes = [8, 32], strides = [1, 1]} : vector<8x128xf32> to vector<8x32xf32>
    %338 = math.tanh %337 : vector<8x32xf32>
    %339 = vector.extract_strided_slice %324 {offsets = [0, 96], sizes = [8, 32], strides = [1, 1]} : vector<8x128xf32> to vector<8x32xf32>
    %340 = arith.negf %339 : vector<8x32xf32>
    %341 = math.exp %340 : vector<8x32xf32>
    %cst_129 = arith.constant 1.000000e+00 : f32
    %342 = vector.broadcast %cst_129 : f32 to vector<8x32xf32>
    %343 = arith.addf %342, %341 : vector<8x32xf32>
    %344 = arith.divf %342, %343 : vector<8x32xf32>
    %345 = arith.mulf %336, %308 : vector<8x32xf32>
    %346 = arith.mulf %330, %338 : vector<8x32xf32>
    %347 = arith.addf %345, %346 : vector<8x32xf32>
    %348 = math.tanh %347 : vector<8x32xf32>
    %349 = arith.mulf %344, %348 : vector<8x32xf32>
    %c1_i32_130 = arith.constant 1 : i32
    %c0_i32_131 = arith.constant 0 : i32
    %350 = arith.addi %c0_i32_131, %c1_i32_130 : i32
    %351 = arith.index_cast %350 : i32 to index
    %c0_132 = arith.constant 0 : index
    %c0_133 = arith.constant 0 : index
    %352 = vector.load %arg11[%351, %c0_132, %c0_133] : memref<8x8x128xf32, #tpu.memory_space<vmem>>, vector<1x8x128xf32>
    %353 = vector.shape_cast %352 : vector<1x8x128xf32> to vector<8x128xf32>
    %c0_134 = arith.constant 0 : index
    %c0_135 = arith.constant 0 : index
    %354 = vector.load %arg6[%c0_134, %c0_135] : memref<32x128xf32, #tpu.memory_space<vmem>>, vector<32x128xf32>
    %cst_136 = arith.constant dense<0.000000e+00> : vector<8x128xf32>
    %355 = tpu.matmul %349, %354, %cst_136 {dimension_numbers = #tpu.dot_dimension_numbers<[1], [0], [0], [1], [0, 0, 1, 1], [], []>} : vector<8x32xf32>, vector<32x128xf32>, vector<8x128xf32> -> vector<8x128xf32>
    %356 = arith.addf %353, %355 : vector<8x128xf32>
    %357 = vector.extract_strided_slice %356 {offsets = [0, 0], sizes = [8, 32], strides = [1, 1]} : vector<8x128xf32> to vector<8x32xf32>
    %358 = arith.negf %357 : vector<8x32xf32>
    %359 = math.exp %358 : vector<8x32xf32>
    %cst_137 = arith.constant 1.000000e+00 : f32
    %360 = vector.broadcast %cst_137 : f32 to vector<8x32xf32>
    %361 = arith.addf %360, %359 : vector<8x32xf32>
    %362 = arith.divf %360, %361 : vector<8x32xf32>
    %363 = vector.extract_strided_slice %356 {offsets = [0, 32], sizes = [8, 32], strides = [1, 1]} : vector<8x128xf32> to vector<8x32xf32>
    %364 = arith.negf %363 : vector<8x32xf32>
    %365 = math.exp %364 : vector<8x32xf32>
    %cst_138 = arith.constant 1.000000e+00 : f32
    %366 = vector.broadcast %cst_138 : f32 to vector<8x32xf32>
    %367 = arith.addf %366, %365 : vector<8x32xf32>
    %368 = arith.divf %366, %367 : vector<8x32xf32>
    %369 = vector.extract_strided_slice %356 {offsets = [0, 64], sizes = [8, 32], strides = [1, 1]} : vector<8x128xf32> to vector<8x32xf32>
    %370 = math.tanh %369 : vector<8x32xf32>
    %371 = vector.extract_strided_slice %356 {offsets = [0, 96], sizes = [8, 32], strides = [1, 1]} : vector<8x128xf32> to vector<8x32xf32>
    %372 = arith.negf %371 : vector<8x32xf32>
    %373 = math.exp %372 : vector<8x32xf32>
    %cst_139 = arith.constant 1.000000e+00 : f32
    %374 = vector.broadcast %cst_139 : f32 to vector<8x32xf32>
    %375 = arith.addf %374, %373 : vector<8x32xf32>
    %376 = arith.divf %374, %375 : vector<8x32xf32>
    %377 = arith.mulf %368, %347 : vector<8x32xf32>
    %378 = arith.mulf %362, %370 : vector<8x32xf32>
    %379 = arith.addf %377, %378 : vector<8x32xf32>
    %380 = math.tanh %379 : vector<8x32xf32>
    %381 = arith.mulf %376, %380 : vector<8x32xf32>
    %c2_i32_140 = arith.constant 2 : i32
    %c0_i32_141 = arith.constant 0 : i32
    %382 = arith.addi %c0_i32_141, %c2_i32_140 : i32
    %383 = arith.index_cast %382 : i32 to index
    %c0_142 = arith.constant 0 : index
    %c0_143 = arith.constant 0 : index
    %384 = vector.load %arg11[%383, %c0_142, %c0_143] : memref<8x8x128xf32, #tpu.memory_space<vmem>>, vector<1x8x128xf32>
    %385 = vector.shape_cast %384 : vector<1x8x128xf32> to vector<8x128xf32>
    %c0_144 = arith.constant 0 : index
    %c0_145 = arith.constant 0 : index
    %386 = vector.load %arg6[%c0_144, %c0_145] : memref<32x128xf32, #tpu.memory_space<vmem>>, vector<32x128xf32>
    %cst_146 = arith.constant dense<0.000000e+00> : vector<8x128xf32>
    %387 = tpu.matmul %381, %386, %cst_146 {dimension_numbers = #tpu.dot_dimension_numbers<[1], [0], [0], [1], [0, 0, 1, 1], [], []>} : vector<8x32xf32>, vector<32x128xf32>, vector<8x128xf32> -> vector<8x128xf32>
    %388 = arith.addf %385, %387 : vector<8x128xf32>
    %389 = vector.extract_strided_slice %388 {offsets = [0, 0], sizes = [8, 32], strides = [1, 1]} : vector<8x128xf32> to vector<8x32xf32>
    %390 = arith.negf %389 : vector<8x32xf32>
    %391 = math.exp %390 : vector<8x32xf32>
    %cst_147 = arith.constant 1.000000e+00 : f32
    %392 = vector.broadcast %cst_147 : f32 to vector<8x32xf32>
    %393 = arith.addf %392, %391 : vector<8x32xf32>
    %394 = arith.divf %392, %393 : vector<8x32xf32>
    %395 = vector.extract_strided_slice %388 {offsets = [0, 32], sizes = [8, 32], strides = [1, 1]} : vector<8x128xf32> to vector<8x32xf32>
    %396 = arith.negf %395 : vector<8x32xf32>
    %397 = math.exp %396 : vector<8x32xf32>
    %cst_148 = arith.constant 1.000000e+00 : f32
    %398 = vector.broadcast %cst_148 : f32 to vector<8x32xf32>
    %399 = arith.addf %398, %397 : vector<8x32xf32>
    %400 = arith.divf %398, %399 : vector<8x32xf32>
    %401 = vector.extract_strided_slice %388 {offsets = [0, 64], sizes = [8, 32], strides = [1, 1]} : vector<8x128xf32> to vector<8x32xf32>
    %402 = math.tanh %401 : vector<8x32xf32>
    %403 = vector.extract_strided_slice %388 {offsets = [0, 96], sizes = [8, 32], strides = [1, 1]} : vector<8x128xf32> to vector<8x32xf32>
    %404 = arith.negf %403 : vector<8x32xf32>
    %405 = math.exp %404 : vector<8x32xf32>
    %cst_149 = arith.constant 1.000000e+00 : f32
    %406 = vector.broadcast %cst_149 : f32 to vector<8x32xf32>
    %407 = arith.addf %406, %405 : vector<8x32xf32>
    %408 = arith.divf %406, %407 : vector<8x32xf32>
    %409 = arith.mulf %400, %379 : vector<8x32xf32>
    %410 = arith.mulf %394, %402 : vector<8x32xf32>
    %411 = arith.addf %409, %410 : vector<8x32xf32>
    %412 = math.tanh %411 : vector<8x32xf32>
    %413 = arith.mulf %408, %412 : vector<8x32xf32>
    %c3_i32_150 = arith.constant 3 : i32
    %c0_i32_151 = arith.constant 0 : i32
    %414 = arith.addi %c0_i32_151, %c3_i32_150 : i32
    %415 = arith.index_cast %414 : i32 to index
    %c0_152 = arith.constant 0 : index
    %c0_153 = arith.constant 0 : index
    %416 = vector.load %arg11[%415, %c0_152, %c0_153] : memref<8x8x128xf32, #tpu.memory_space<vmem>>, vector<1x8x128xf32>
    %417 = vector.shape_cast %416 : vector<1x8x128xf32> to vector<8x128xf32>
    %c0_154 = arith.constant 0 : index
    %c0_155 = arith.constant 0 : index
    %418 = vector.load %arg6[%c0_154, %c0_155] : memref<32x128xf32, #tpu.memory_space<vmem>>, vector<32x128xf32>
    %cst_156 = arith.constant dense<0.000000e+00> : vector<8x128xf32>
    %419 = tpu.matmul %413, %418, %cst_156 {dimension_numbers = #tpu.dot_dimension_numbers<[1], [0], [0], [1], [0, 0, 1, 1], [], []>} : vector<8x32xf32>, vector<32x128xf32>, vector<8x128xf32> -> vector<8x128xf32>
    %420 = arith.addf %417, %419 : vector<8x128xf32>
    %421 = vector.extract_strided_slice %420 {offsets = [0, 0], sizes = [8, 32], strides = [1, 1]} : vector<8x128xf32> to vector<8x32xf32>
    %422 = arith.negf %421 : vector<8x32xf32>
    %423 = math.exp %422 : vector<8x32xf32>
    %cst_157 = arith.constant 1.000000e+00 : f32
    %424 = vector.broadcast %cst_157 : f32 to vector<8x32xf32>
    %425 = arith.addf %424, %423 : vector<8x32xf32>
    %426 = arith.divf %424, %425 : vector<8x32xf32>
    %427 = vector.extract_strided_slice %420 {offsets = [0, 32], sizes = [8, 32], strides = [1, 1]} : vector<8x128xf32> to vector<8x32xf32>
    %428 = arith.negf %427 : vector<8x32xf32>
    %429 = math.exp %428 : vector<8x32xf32>
    %cst_158 = arith.constant 1.000000e+00 : f32
    %430 = vector.broadcast %cst_158 : f32 to vector<8x32xf32>
    %431 = arith.addf %430, %429 : vector<8x32xf32>
    %432 = arith.divf %430, %431 : vector<8x32xf32>
    %433 = vector.extract_strided_slice %420 {offsets = [0, 64], sizes = [8, 32], strides = [1, 1]} : vector<8x128xf32> to vector<8x32xf32>
    %434 = math.tanh %433 : vector<8x32xf32>
    %435 = vector.extract_strided_slice %420 {offsets = [0, 96], sizes = [8, 32], strides = [1, 1]} : vector<8x128xf32> to vector<8x32xf32>
    %436 = arith.negf %435 : vector<8x32xf32>
    %437 = math.exp %436 : vector<8x32xf32>
    %cst_159 = arith.constant 1.000000e+00 : f32
    %438 = vector.broadcast %cst_159 : f32 to vector<8x32xf32>
    %439 = arith.addf %438, %437 : vector<8x32xf32>
    %440 = arith.divf %438, %439 : vector<8x32xf32>
    %441 = arith.mulf %432, %411 : vector<8x32xf32>
    %442 = arith.mulf %426, %434 : vector<8x32xf32>
    %443 = arith.addf %441, %442 : vector<8x32xf32>
    %444 = math.tanh %443 : vector<8x32xf32>
    %445 = arith.mulf %440, %444 : vector<8x32xf32>
    %c4_i32_160 = arith.constant 4 : i32
    %c0_i32_161 = arith.constant 0 : i32
    %446 = arith.addi %c0_i32_161, %c4_i32_160 : i32
    %447 = arith.index_cast %446 : i32 to index
    %c0_162 = arith.constant 0 : index
    %c0_163 = arith.constant 0 : index
    %448 = vector.load %arg11[%447, %c0_162, %c0_163] : memref<8x8x128xf32, #tpu.memory_space<vmem>>, vector<1x8x128xf32>
    %449 = vector.shape_cast %448 : vector<1x8x128xf32> to vector<8x128xf32>
    %c0_164 = arith.constant 0 : index
    %c0_165 = arith.constant 0 : index
    %450 = vector.load %arg6[%c0_164, %c0_165] : memref<32x128xf32, #tpu.memory_space<vmem>>, vector<32x128xf32>
    %cst_166 = arith.constant dense<0.000000e+00> : vector<8x128xf32>
    %451 = tpu.matmul %445, %450, %cst_166 {dimension_numbers = #tpu.dot_dimension_numbers<[1], [0], [0], [1], [0, 0, 1, 1], [], []>} : vector<8x32xf32>, vector<32x128xf32>, vector<8x128xf32> -> vector<8x128xf32>
    %452 = arith.addf %449, %451 : vector<8x128xf32>
    %453 = vector.extract_strided_slice %452 {offsets = [0, 0], sizes = [8, 32], strides = [1, 1]} : vector<8x128xf32> to vector<8x32xf32>
    %454 = arith.negf %453 : vector<8x32xf32>
    %455 = math.exp %454 : vector<8x32xf32>
    %cst_167 = arith.constant 1.000000e+00 : f32
    %456 = vector.broadcast %cst_167 : f32 to vector<8x32xf32>
    %457 = arith.addf %456, %455 : vector<8x32xf32>
    %458 = arith.divf %456, %457 : vector<8x32xf32>
    %459 = vector.extract_strided_slice %452 {offsets = [0, 32], sizes = [8, 32], strides = [1, 1]} : vector<8x128xf32> to vector<8x32xf32>
    %460 = arith.negf %459 : vector<8x32xf32>
    %461 = math.exp %460 : vector<8x32xf32>
    %cst_168 = arith.constant 1.000000e+00 : f32
    %462 = vector.broadcast %cst_168 : f32 to vector<8x32xf32>
    %463 = arith.addf %462, %461 : vector<8x32xf32>
    %464 = arith.divf %462, %463 : vector<8x32xf32>
    %465 = vector.extract_strided_slice %452 {offsets = [0, 64], sizes = [8, 32], strides = [1, 1]} : vector<8x128xf32> to vector<8x32xf32>
    %466 = math.tanh %465 : vector<8x32xf32>
    %467 = vector.extract_strided_slice %452 {offsets = [0, 96], sizes = [8, 32], strides = [1, 1]} : vector<8x128xf32> to vector<8x32xf32>
    %468 = arith.negf %467 : vector<8x32xf32>
    %469 = math.exp %468 : vector<8x32xf32>
    %cst_169 = arith.constant 1.000000e+00 : f32
    %470 = vector.broadcast %cst_169 : f32 to vector<8x32xf32>
    %471 = arith.addf %470, %469 : vector<8x32xf32>
    %472 = arith.divf %470, %471 : vector<8x32xf32>
    %473 = arith.mulf %464, %443 : vector<8x32xf32>
    %474 = arith.mulf %458, %466 : vector<8x32xf32>
    %475 = arith.addf %473, %474 : vector<8x32xf32>
    %476 = math.tanh %475 : vector<8x32xf32>
    %477 = arith.mulf %472, %476 : vector<8x32xf32>
    %c5_i32_170 = arith.constant 5 : i32
    %c0_i32_171 = arith.constant 0 : i32
    %478 = arith.addi %c0_i32_171, %c5_i32_170 : i32
    %479 = arith.index_cast %478 : i32 to index
    %c0_172 = arith.constant 0 : index
    %c0_173 = arith.constant 0 : index
    %480 = vector.load %arg11[%479, %c0_172, %c0_173] : memref<8x8x128xf32, #tpu.memory_space<vmem>>, vector<1x8x128xf32>
    %481 = vector.shape_cast %480 : vector<1x8x128xf32> to vector<8x128xf32>
    %c0_174 = arith.constant 0 : index
    %c0_175 = arith.constant 0 : index
    %482 = vector.load %arg6[%c0_174, %c0_175] : memref<32x128xf32, #tpu.memory_space<vmem>>, vector<32x128xf32>
    %cst_176 = arith.constant dense<0.000000e+00> : vector<8x128xf32>
    %483 = tpu.matmul %477, %482, %cst_176 {dimension_numbers = #tpu.dot_dimension_numbers<[1], [0], [0], [1], [0, 0, 1, 1], [], []>} : vector<8x32xf32>, vector<32x128xf32>, vector<8x128xf32> -> vector<8x128xf32>
    %484 = arith.addf %481, %483 : vector<8x128xf32>
    %485 = vector.extract_strided_slice %484 {offsets = [0, 0], sizes = [8, 32], strides = [1, 1]} : vector<8x128xf32> to vector<8x32xf32>
    %486 = arith.negf %485 : vector<8x32xf32>
    %487 = math.exp %486 : vector<8x32xf32>
    %cst_177 = arith.constant 1.000000e+00 : f32
    %488 = vector.broadcast %cst_177 : f32 to vector<8x32xf32>
    %489 = arith.addf %488, %487 : vector<8x32xf32>
    %490 = arith.divf %488, %489 : vector<8x32xf32>
    %491 = vector.extract_strided_slice %484 {offsets = [0, 32], sizes = [8, 32], strides = [1, 1]} : vector<8x128xf32> to vector<8x32xf32>
    %492 = arith.negf %491 : vector<8x32xf32>
    %493 = math.exp %492 : vector<8x32xf32>
    %cst_178 = arith.constant 1.000000e+00 : f32
    %494 = vector.broadcast %cst_178 : f32 to vector<8x32xf32>
    %495 = arith.addf %494, %493 : vector<8x32xf32>
    %496 = arith.divf %494, %495 : vector<8x32xf32>
    %497 = vector.extract_strided_slice %484 {offsets = [0, 64], sizes = [8, 32], strides = [1, 1]} : vector<8x128xf32> to vector<8x32xf32>
    %498 = math.tanh %497 : vector<8x32xf32>
    %499 = vector.extract_strided_slice %484 {offsets = [0, 96], sizes = [8, 32], strides = [1, 1]} : vector<8x128xf32> to vector<8x32xf32>
    %500 = arith.negf %499 : vector<8x32xf32>
    %501 = math.exp %500 : vector<8x32xf32>
    %cst_179 = arith.constant 1.000000e+00 : f32
    %502 = vector.broadcast %cst_179 : f32 to vector<8x32xf32>
    %503 = arith.addf %502, %501 : vector<8x32xf32>
    %504 = arith.divf %502, %503 : vector<8x32xf32>
    %505 = arith.mulf %496, %475 : vector<8x32xf32>
    %506 = arith.mulf %490, %498 : vector<8x32xf32>
    %507 = arith.addf %505, %506 : vector<8x32xf32>
    %508 = math.tanh %507 : vector<8x32xf32>
    %509 = arith.mulf %504, %508 : vector<8x32xf32>
    %c6_i32_180 = arith.constant 6 : i32
    %c0_i32_181 = arith.constant 0 : i32
    %510 = arith.addi %c0_i32_181, %c6_i32_180 : i32
    %511 = arith.index_cast %510 : i32 to index
    %c0_182 = arith.constant 0 : index
    %c0_183 = arith.constant 0 : index
    %512 = vector.load %arg11[%511, %c0_182, %c0_183] : memref<8x8x128xf32, #tpu.memory_space<vmem>>, vector<1x8x128xf32>
    %513 = vector.shape_cast %512 : vector<1x8x128xf32> to vector<8x128xf32>
    %c0_184 = arith.constant 0 : index
    %c0_185 = arith.constant 0 : index
    %514 = vector.load %arg6[%c0_184, %c0_185] : memref<32x128xf32, #tpu.memory_space<vmem>>, vector<32x128xf32>
    %cst_186 = arith.constant dense<0.000000e+00> : vector<8x128xf32>
    %515 = tpu.matmul %509, %514, %cst_186 {dimension_numbers = #tpu.dot_dimension_numbers<[1], [0], [0], [1], [0, 0, 1, 1], [], []>} : vector<8x32xf32>, vector<32x128xf32>, vector<8x128xf32> -> vector<8x128xf32>
    %516 = arith.addf %513, %515 : vector<8x128xf32>
    %517 = vector.extract_strided_slice %516 {offsets = [0, 0], sizes = [8, 32], strides = [1, 1]} : vector<8x128xf32> to vector<8x32xf32>
    %518 = arith.negf %517 : vector<8x32xf32>
    %519 = math.exp %518 : vector<8x32xf32>
    %cst_187 = arith.constant 1.000000e+00 : f32
    %520 = vector.broadcast %cst_187 : f32 to vector<8x32xf32>
    %521 = arith.addf %520, %519 : vector<8x32xf32>
    %522 = arith.divf %520, %521 : vector<8x32xf32>
    %523 = vector.extract_strided_slice %516 {offsets = [0, 32], sizes = [8, 32], strides = [1, 1]} : vector<8x128xf32> to vector<8x32xf32>
    %524 = arith.negf %523 : vector<8x32xf32>
    %525 = math.exp %524 : vector<8x32xf32>
    %cst_188 = arith.constant 1.000000e+00 : f32
    %526 = vector.broadcast %cst_188 : f32 to vector<8x32xf32>
    %527 = arith.addf %526, %525 : vector<8x32xf32>
    %528 = arith.divf %526, %527 : vector<8x32xf32>
    %529 = vector.extract_strided_slice %516 {offsets = [0, 64], sizes = [8, 32], strides = [1, 1]} : vector<8x128xf32> to vector<8x32xf32>
    %530 = math.tanh %529 : vector<8x32xf32>
    %531 = vector.extract_strided_slice %516 {offsets = [0, 96], sizes = [8, 32], strides = [1, 1]} : vector<8x128xf32> to vector<8x32xf32>
    %532 = arith.negf %531 : vector<8x32xf32>
    %533 = math.exp %532 : vector<8x32xf32>
    %cst_189 = arith.constant 1.000000e+00 : f32
    %534 = vector.broadcast %cst_189 : f32 to vector<8x32xf32>
    %535 = arith.addf %534, %533 : vector<8x32xf32>
    %536 = arith.divf %534, %535 : vector<8x32xf32>
    %537 = arith.mulf %528, %507 : vector<8x32xf32>
    %538 = arith.mulf %522, %530 : vector<8x32xf32>
    %539 = arith.addf %537, %538 : vector<8x32xf32>
    %540 = math.tanh %539 : vector<8x32xf32>
    %541 = arith.mulf %536, %540 : vector<8x32xf32>
    %c7_i32_190 = arith.constant 7 : i32
    %c0_i32_191 = arith.constant 0 : i32
    %542 = arith.addi %c0_i32_191, %c7_i32_190 : i32
    %543 = arith.index_cast %542 : i32 to index
    %c0_192 = arith.constant 0 : index
    %c0_193 = arith.constant 0 : index
    %544 = vector.load %arg11[%543, %c0_192, %c0_193] : memref<8x8x128xf32, #tpu.memory_space<vmem>>, vector<1x8x128xf32>
    %545 = vector.shape_cast %544 : vector<1x8x128xf32> to vector<8x128xf32>
    %c0_194 = arith.constant 0 : index
    %c0_195 = arith.constant 0 : index
    %546 = vector.load %arg6[%c0_194, %c0_195] : memref<32x128xf32, #tpu.memory_space<vmem>>, vector<32x128xf32>
    %cst_196 = arith.constant dense<0.000000e+00> : vector<8x128xf32>
    %547 = tpu.matmul %541, %546, %cst_196 {dimension_numbers = #tpu.dot_dimension_numbers<[1], [0], [0], [1], [0, 0, 1, 1], [], []>} : vector<8x32xf32>, vector<32x128xf32>, vector<8x128xf32> -> vector<8x128xf32>
    %548 = arith.addf %545, %547 : vector<8x128xf32>
    %549 = vector.extract_strided_slice %548 {offsets = [0, 0], sizes = [8, 32], strides = [1, 1]} : vector<8x128xf32> to vector<8x32xf32>
    %550 = arith.negf %549 : vector<8x32xf32>
    %551 = math.exp %550 : vector<8x32xf32>
    %cst_197 = arith.constant 1.000000e+00 : f32
    %552 = vector.broadcast %cst_197 : f32 to vector<8x32xf32>
    %553 = arith.addf %552, %551 : vector<8x32xf32>
    %554 = arith.divf %552, %553 : vector<8x32xf32>
    %555 = vector.extract_strided_slice %548 {offsets = [0, 32], sizes = [8, 32], strides = [1, 1]} : vector<8x128xf32> to vector<8x32xf32>
    %556 = arith.negf %555 : vector<8x32xf32>
    %557 = math.exp %556 : vector<8x32xf32>
    %cst_198 = arith.constant 1.000000e+00 : f32
    %558 = vector.broadcast %cst_198 : f32 to vector<8x32xf32>
    %559 = arith.addf %558, %557 : vector<8x32xf32>
    %560 = arith.divf %558, %559 : vector<8x32xf32>
    %561 = vector.extract_strided_slice %548 {offsets = [0, 64], sizes = [8, 32], strides = [1, 1]} : vector<8x128xf32> to vector<8x32xf32>
    %562 = math.tanh %561 : vector<8x32xf32>
    %563 = vector.extract_strided_slice %548 {offsets = [0, 96], sizes = [8, 32], strides = [1, 1]} : vector<8x128xf32> to vector<8x32xf32>
    %564 = arith.negf %563 : vector<8x32xf32>
    %565 = math.exp %564 : vector<8x32xf32>
    %cst_199 = arith.constant 1.000000e+00 : f32
    %566 = vector.broadcast %cst_199 : f32 to vector<8x32xf32>
    %567 = arith.addf %566, %565 : vector<8x32xf32>
    %568 = arith.divf %566, %567 : vector<8x32xf32>
    %569 = arith.mulf %560, %539 : vector<8x32xf32>
    %570 = arith.mulf %554, %562 : vector<8x32xf32>
    %571 = arith.addf %569, %570 : vector<8x32xf32>
    %572 = math.tanh %571 : vector<8x32xf32>
    %573 = arith.mulf %568, %572 : vector<8x32xf32>
    %c8_i32_200 = arith.constant 8 : i32
    %c0_201 = arith.constant 0 : index
    %c0_202 = arith.constant 0 : index
    %574 = vector.load %arg8[%c0_201, %c0_202] : memref<32x128xf32, #tpu.memory_space<vmem>>, vector<32x128xf32>
    %cst_203 = arith.constant dense<0.000000e+00> : vector<8x128xf32>
    %575 = tpu.matmul %573, %574, %cst_203 {dimension_numbers = #tpu.dot_dimension_numbers<[1], [0], [0], [1], [0, 0, 1, 1], [], []>} : vector<8x32xf32>, vector<32x128xf32>, vector<8x128xf32> -> vector<8x128xf32>
    %c0_204 = arith.constant 0 : index
    %c0_205 = arith.constant 0 : index
    %576 = vector.load %arg9[%c0_204, %c0_205] : memref<1x128xf32, #tpu.memory_space<vmem>>, vector<1x128xf32>
    %577 = vector.broadcast %576 : vector<1x128xf32> to vector<8x128xf32>
    %578 = arith.addf %575, %577 : vector<8x128xf32>
    %c0_206 = arith.constant 0 : index
    %c0_207 = arith.constant 0 : index
    %579 = vector.load %arg10[%c0_206, %c0_207] : memref<8x128xf32, #tpu.memory_space<vmem>>, vector<8x128xf32>
    tpu.vector_store %arg10[%c0_206, %c0_207], %578 {strides = array<i32>} : memref<8x128xf32, #tpu.memory_space<vmem>>, vector<8x128xf32>,
    return
  }
  func.func @transform_0(%arg0: i32) -> (i32, i32, i32) {
    %c0_i32 = arith.constant 0 : i32
    %c0_i32_0 = arith.constant 0 : i32
    %c0_i32_1 = arith.constant 0 : i32
    return %c0_i32, %arg0, %c0_i32_0 : i32, i32, i32
  }
  func.func @transform_1(%arg0: i32) -> (i32, i32) {
    %c0_i32 = arith.constant 0 : i32
    %c0_i32_0 = arith.constant 0 : i32
    %c0_i32_1 = arith.constant 0 : i32
    return %c0_i32, %c0_i32_0 : i32, i32
  }
  func.func @transform_2(%arg0: i32) -> (i32, i32) {
    %c0_i32 = arith.constant 0 : i32
    %c0_i32_0 = arith.constant 0 : i32
    %c0_i32_1 = arith.constant 0 : i32
    return %c0_i32, %c0_i32_0 : i32, i32
  }
  func.func @transform_3(%arg0: i32) -> (i32, i32) {
    %c0_i32 = arith.constant 0 : i32
    %c0_i32_0 = arith.constant 0 : i32
    %c0_i32_1 = arith.constant 0 : i32
    return %c0_i32, %c0_i32_0 : i32, i32
  }
  func.func @transform_4(%arg0: i32) -> (i32, i32) {
    %c0_i32 = arith.constant 0 : i32
    %c0_i32_0 = arith.constant 0 : i32
    %c0_i32_1 = arith.constant 0 : i32
    return %c0_i32, %c0_i32_0 : i32, i32
  }
  func.func @transform_5(%arg0: i32) -> (i32, i32) {
    %c0_i32 = arith.constant 0 : i32
    %c0_i32_0 = arith.constant 0 : i32
    %c0_i32_1 = arith.constant 0 : i32
    return %c0_i32, %c0_i32_0 : i32, i32
  }
  func.func @transform_6(%arg0: i32) -> (i32, i32) {
    %c0_i32 = arith.constant 0 : i32
    %c0_i32_0 = arith.constant 0 : i32
    %c0_i32_1 = arith.constant 0 : i32
    return %c0_i32, %c0_i32_0 : i32, i32
  }
  func.func @transform_7(%arg0: i32) -> (i32, i32) {
    %c0_i32 = arith.constant 0 : i32
    %c0_i32_0 = arith.constant 0 : i32
    %c0_i32_1 = arith.constant 0 : i32
    return %c0_i32, %c0_i32_0 : i32, i32
  }
  func.func @transform_8(%arg0: i32) -> (i32, i32) {
    %c0_i32 = arith.constant 0 : i32
    %c0_i32_0 = arith.constant 0 : i32
    %c0_i32_1 = arith.constant 0 : i32
    return %c0_i32, %c0_i32_0 : i32, i32
  }
  func.func @transform_9(%arg0: i32) -> (i32, i32) {
    %c0_i32 = arith.constant 0 : i32
    %c0_i32_0 = arith.constant 0 : i32
    return %arg0, %c0_i32 : i32, i32
  }
}

module attributes {stable_mosaic.version = 11 : i64} {
  func.func @kernel(%arg0: i32, %arg1: memref<8x8x128xf32, #tpu.memory_space<vmem>>, %arg2: memref<128x128xf32, #tpu.memory_space<vmem>>, %arg3: memref<32x128xf32, #tpu.memory_space<vmem>>, %arg4: memref<1x128xf32, #tpu.memory_space<vmem>>, %arg5: memref<32x128xf32, #tpu.memory_space<vmem>>, %arg6: memref<32x128xf32, #tpu.memory_space<vmem>>, %arg7: memref<1x128xf32, #tpu.memory_space<vmem>>, %arg8: memref<32x128xf32, #tpu.memory_space<vmem>>, %arg9: memref<1x128xf32, #tpu.memory_space<vmem>>, %arg10: memref<8x128xf32, #tpu.memory_space<vmem>>, %arg11: memref<8x8x128xf32, #tpu.memory_space<vmem>>, %arg12: memref<8x8x32xf32, #tpu.memory_space<vmem>>) attributes {dimension_semantics = [#tpu.dimension_semantics<parallel>], iteration_bounds = array<i64: 1>, scalar_prefetch = 0 : i64, scratch_operands = 2 : i64, tpu.core_type = #tpu.core_type<tc>, window_params = [{transform_indices = @transform_0, window_bounds = array<i64: 8, 8, 128>}, {pipeline_mode = #tpu.pipeline_mode<synchronous>, transform_indices = @transform_1, window_bounds = array<i64: 128, 128>}, {pipeline_mode = #tpu.pipeline_mode<synchronous>, transform_indices = @transform_2, window_bounds = array<i64: 32, 128>}, {pipeline_mode = #tpu.pipeline_mode<synchronous>, transform_indices = @transform_3, window_bounds = array<i64: 1, 128>}, {pipeline_mode = #tpu.pipeline_mode<synchronous>, transform_indices = @transform_4, window_bounds = array<i64: 32, 128>}, {pipeline_mode = #tpu.pipeline_mode<synchronous>, transform_indices = @transform_5, window_bounds = array<i64: 32, 128>}, {pipeline_mode = #tpu.pipeline_mode<synchronous>, transform_indices = @transform_6, window_bounds = array<i64: 1, 128>}, {pipeline_mode = #tpu.pipeline_mode<synchronous>, transform_indices = @transform_7, window_bounds = array<i64: 32, 128>}, {pipeline_mode = #tpu.pipeline_mode<synchronous>, transform_indices = @transform_8, window_bounds = array<i64: 1, 128>}, {transform_indices = @transform_9, window_bounds = array<i64: 8, 128>}]} {
    %cst = arith.constant 0.000000e+00 : f32
    %0 = vector.broadcast %cst : f32 to vector<8x32xf32>
    %cst_0 = arith.constant 0.000000e+00 : f32
    %1 = vector.broadcast %cst_0 : f32 to vector<8x32xf32>
    %c0 = arith.constant 0 : index
    %c0_1 = arith.constant 0 : index
    %c0_2 = arith.constant 0 : index
    %2 = vector.load %arg1[%c0, %c0_1, %c0_2] : memref<8x8x128xf32, #tpu.memory_space<vmem>>, vector<8x8x128xf32>
    %3 = vector.shape_cast %2 : vector<8x8x128xf32> to vector<64x128xf32>
    %c0_3 = arith.constant 0 : index
    %c0_4 = arith.constant 0 : index
    %4 = vector.load %arg2[%c0_3, %c0_4] : memref<128x128xf32, #tpu.memory_space<vmem>>, vector<128x128xf32>
    %cst_5 = arith.constant dense<0.000000e+00> : vector<64x128xf32>
    %5 = tpu.matmul %3, %4, %cst_5 {dimension_numbers = #tpu.dot_dimension_numbers<[1], [0], [0], [1], [0, 0, 1, 1], [], []>} : vector<64x128xf32>, vector<128x128xf32>, vector<64x128xf32> -> vector<64x128xf32>
    %c0_6 = arith.constant 0 : index
    %c0_7 = arith.constant 0 : index
    %6 = vector.load %arg4[%c0_6, %c0_7] : memref<1x128xf32, #tpu.memory_space<vmem>>, vector<1x128xf32>
    %7 = vector.broadcast %6 : vector<1x128xf32> to vector<64x128xf32>
    %8 = arith.addf %5, %7 : vector<64x128xf32>
    %9 = vector.shape_cast %8 : vector<64x128xf32> to vector<8x8x128xf32>
    %c0_8 = arith.constant 0 : index
    %c0_9 = arith.constant 0 : index
    %c0_10 = arith.constant 0 : index
    %10 = vector.load %arg11[%c0_8, %c0_9, %c0_10] : memref<8x8x128xf32, #tpu.memory_space<vmem>>, vector<8x8x128xf32>
    tpu.vector_store %arg11[%c0_8, %c0_9, %c0_10], %9 {strides = array<i32>} : memref<8x8x128xf32, #tpu.memory_space<vmem>>, vector<8x8x128xf32>,
    %c0_i32 = arith.constant 0 : i32
    %c0_i32_11 = arith.constant 0 : i32
    %11 = arith.addi %c0_i32_11, %c0_i32 : i32
    %12 = arith.index_cast %11 : i32 to index
    %c0_12 = arith.constant 0 : index
    %c0_13 = arith.constant 0 : index
    %13 = vector.load %arg11[%12, %c0_12, %c0_13] : memref<8x8x128xf32, #tpu.memory_space<vmem>>, vector<1x8x128xf32>
    %14 = vector.shape_cast %13 : vector<1x8x128xf32> to vector<8x128xf32>
    %c0_14 = arith.constant 0 : index
    %c0_15 = arith.constant 0 : index
    %15 = vector.load %arg3[%c0_14, %c0_15] : memref<32x128xf32, #tpu.memory_space<vmem>>, vector<32x128xf32>
    %cst_16 = arith.constant dense<0.000000e+00> : vector<8x128xf32>
    %16 = tpu.matmul %0, %15, %cst_16 {dimension_numbers = #tpu.dot_dimension_numbers<[1], [0], [0], [1], [0, 0, 1, 1], [], []>} : vector<8x32xf32>, vector<32x128xf32>, vector<8x128xf32> -> vector<8x128xf32>
    %17 = arith.addf %14, %16 : vector<8x128xf32>
    %18 = vector.extract_strided_slice %17 {offsets = [0, 0], sizes = [8, 32], strides = [1, 1]} : vector<8x128xf32> to vector<8x32xf32>
    %19 = arith.negf %18 : vector<8x32xf32>
    %20 = math.exp %19 : vector<8x32xf32>
    %cst_17 = arith.constant 1.000000e+00 : f32
    %21 = vector.broadcast %cst_17 : f32 to vector<8x32xf32>
    %22 = arith.addf %21, %20 : vector<8x32xf32>
    %23 = arith.divf %21, %22 : vector<8x32xf32>
    %24 = vector.extract_strided_slice %17 {offsets = [0, 32], sizes = [8, 32], strides = [1, 1]} : vector<8x128xf32> to vector<8x32xf32>
    %25 = arith.negf %24 : vector<8x32xf32>
    %26 = math.exp %25 : vector<8x32xf32>
    %cst_18 = arith.constant 1.000000e+00 : f32
    %27 = vector.broadcast %cst_18 : f32 to vector<8x32xf32>
    %28 = arith.addf %27, %26 : vector<8x32xf32>
    %29 = arith.divf %27, %28 : vector<8x32xf32>
    %30 = vector.extract_strided_slice %17 {offsets = [0, 64], sizes = [8, 32], strides = [1, 1]} : vector<8x128xf32> to vector<8x32xf32>
    %31 = math.tanh %30 : vector<8x32xf32>
    %32 = vector.extract_strided_slice %17 {offsets = [0, 96], sizes = [8, 32], strides = [1, 1]} : vector<8x128xf32> to vector<8x32xf32>
    %33 = arith.negf %32 : vector<8x32xf32>
    %34 = math.exp %33 : vector<8x32xf32>
    %cst_19 = arith.constant 1.000000e+00 : f32
    %35 = vector.broadcast %cst_19 : f32 to vector<8x32xf32>
    %36 = arith.addf %35, %34 : vector<8x32xf32>
    %37 = arith.divf %35, %36 : vector<8x32xf32>
    %38 = arith.mulf %29, %1 : vector<8x32xf32>
    %39 = arith.mulf %23, %31 : vector<8x32xf32>
    %40 = arith.addf %38, %39 : vector<8x32xf32>
    %41 = math.tanh %40 : vector<8x32xf32>
    %42 = arith.mulf %37, %41 : vector<8x32xf32>
    %c0_i32_20 = arith.constant 0 : i32
    %43 = arith.addi %c0_i32_20, %c0_i32 : i32
    %44 = arith.index_cast %43 : i32 to index
    %c0_21 = arith.constant 0 : index
    %c0_22 = arith.constant 0 : index
    %45 = vector.load %arg12[%44, %c0_21, %c0_22] : memref<8x8x32xf32, #tpu.memory_space<vmem>>, vector<1x8x32xf32>
    %46 = vector.shape_cast %45 : vector<1x8x32xf32> to vector<8x32xf32>
    %47 = vector.shape_cast %42 : vector<8x32xf32> to vector<1x8x32xf32>
    tpu.vector_store %arg12[%44, %c0_21, %c0_22], %47 {strides = array<i32>} : memref<8x8x32xf32, #tpu.memory_space<vmem>>, vector<1x8x32xf32>,
    %c1_i32 = arith.constant 1 : i32
    %c0_i32_23 = arith.constant 0 : i32
    %48 = arith.addi %c0_i32_23, %c1_i32 : i32
    %49 = arith.index_cast %48 : i32 to index
    %c0_24 = arith.constant 0 : index
    %c0_25 = arith.constant 0 : index
    %50 = vector.load %arg11[%49, %c0_24, %c0_25] : memref<8x8x128xf32, #tpu.memory_space<vmem>>, vector<1x8x128xf32>
    %51 = vector.shape_cast %50 : vector<1x8x128xf32> to vector<8x128xf32>
    %c0_26 = arith.constant 0 : index
    %c0_27 = arith.constant 0 : index
    %52 = vector.load %arg3[%c0_26, %c0_27] : memref<32x128xf32, #tpu.memory_space<vmem>>, vector<32x128xf32>
    %cst_28 = arith.constant dense<0.000000e+00> : vector<8x128xf32>
    %53 = tpu.matmul %42, %52, %cst_28 {dimension_numbers = #tpu.dot_dimension_numbers<[1], [0], [0], [1], [0, 0, 1, 1], [], []>} : vector<8x32xf32>, vector<32x128xf32>, vector<8x128xf32> -> vector<8x128xf32>
    %54 = arith.addf %51, %53 : vector<8x128xf32>
    %55 = vector.extract_strided_slice %54 {offsets = [0, 0], sizes = [8, 32], strides = [1, 1]} : vector<8x128xf32> to vector<8x32xf32>
    %56 = arith.negf %55 : vector<8x32xf32>
    %57 = math.exp %56 : vector<8x32xf32>
    %cst_29 = arith.constant 1.000000e+00 : f32
    %58 = vector.broadcast %cst_29 : f32 to vector<8x32xf32>
    %59 = arith.addf %58, %57 : vector<8x32xf32>
    %60 = arith.divf %58, %59 : vector<8x32xf32>
    %61 = vector.extract_strided_slice %54 {offsets = [0, 32], sizes = [8, 32], strides = [1, 1]} : vector<8x128xf32> to vector<8x32xf32>
    %62 = arith.negf %61 : vector<8x32xf32>
    %63 = math.exp %62 : vector<8x32xf32>
    %cst_30 = arith.constant 1.000000e+00 : f32
    %64 = vector.broadcast %cst_30 : f32 to vector<8x32xf32>
    %65 = arith.addf %64, %63 : vector<8x32xf32>
    %66 = arith.divf %64, %65 : vector<8x32xf32>
    %67 = vector.extract_strided_slice %54 {offsets = [0, 64], sizes = [8, 32], strides = [1, 1]} : vector<8x128xf32> to vector<8x32xf32>
    %68 = math.tanh %67 : vector<8x32xf32>
    %69 = vector.extract_strided_slice %54 {offsets = [0, 96], sizes = [8, 32], strides = [1, 1]} : vector<8x128xf32> to vector<8x32xf32>
    %70 = arith.negf %69 : vector<8x32xf32>
    %71 = math.exp %70 : vector<8x32xf32>
    %cst_31 = arith.constant 1.000000e+00 : f32
    %72 = vector.broadcast %cst_31 : f32 to vector<8x32xf32>
    %73 = arith.addf %72, %71 : vector<8x32xf32>
    %74 = arith.divf %72, %73 : vector<8x32xf32>
    %75 = arith.mulf %66, %40 : vector<8x32xf32>
    %76 = arith.mulf %60, %68 : vector<8x32xf32>
    %77 = arith.addf %75, %76 : vector<8x32xf32>
    %78 = math.tanh %77 : vector<8x32xf32>
    %79 = arith.mulf %74, %78 : vector<8x32xf32>
    %c0_i32_32 = arith.constant 0 : i32
    %80 = arith.addi %c0_i32_32, %c1_i32 : i32
    %81 = arith.index_cast %80 : i32 to index
    %c0_33 = arith.constant 0 : index
    %c0_34 = arith.constant 0 : index
    %82 = vector.load %arg12[%81, %c0_33, %c0_34] : memref<8x8x32xf32, #tpu.memory_space<vmem>>, vector<1x8x32xf32>
    %83 = vector.shape_cast %82 : vector<1x8x32xf32> to vector<8x32xf32>
    %84 = vector.shape_cast %79 : vector<8x32xf32> to vector<1x8x32xf32>
    tpu.vector_store %arg12[%81, %c0_33, %c0_34], %84 {strides = array<i32>} : memref<8x8x32xf32, #tpu.memory_space<vmem>>, vector<1x8x32xf32>,
    %c2_i32 = arith.constant 2 : i32
    %c0_i32_35 = arith.constant 0 : i32
    %85 = arith.addi %c0_i32_35, %c2_i32 : i32
    %86 = arith.index_cast %85 : i32 to index
    %c0_36 = arith.constant 0 : index
    %c0_37 = arith.constant 0 : index
    %87 = vector.load %arg11[%86, %c0_36, %c0_37] : memref<8x8x128xf32, #tpu.memory_space<vmem>>, vector<1x8x128xf32>
    %88 = vector.shape_cast %87 : vector<1x8x128xf32> to vector<8x128xf32>
    %c0_38 = arith.constant 0 : index
    %c0_39 = arith.constant 0 : index
    %89 = vector.load %arg3[%c0_38, %c0_39] : memref<32x128xf32, #tpu.memory_space<vmem>>, vector<32x128xf32>
    %cst_40 = arith.constant dense<0.000000e+00> : vector<8x128xf32>
    %90 = tpu.matmul %79, %89, %cst_40 {dimension_numbers = #tpu.dot_dimension_numbers<[1], [0], [0], [1], [0, 0, 1, 1], [], []>} : vector<8x32xf32>, vector<32x128xf32>, vector<8x128xf32> -> vector<8x128xf32>
    %91 = arith.addf %88, %90 : vector<8x128xf32>
    %92 = vector.extract_strided_slice %91 {offsets = [0, 0], sizes = [8, 32], strides = [1, 1]} : vector<8x128xf32> to vector<8x32xf32>
    %93 = arith.negf %92 : vector<8x32xf32>
    %94 = math.exp %93 : vector<8x32xf32>
    %cst_41 = arith.constant 1.000000e+00 : f32
    %95 = vector.broadcast %cst_41 : f32 to vector<8x32xf32>
    %96 = arith.addf %95, %94 : vector<8x32xf32>
    %97 = arith.divf %95, %96 : vector<8x32xf32>
    %98 = vector.extract_strided_slice %91 {offsets = [0, 32], sizes = [8, 32], strides = [1, 1]} : vector<8x128xf32> to vector<8x32xf32>
    %99 = arith.negf %98 : vector<8x32xf32>
    %100 = math.exp %99 : vector<8x32xf32>
    %cst_42 = arith.constant 1.000000e+00 : f32
    %101 = vector.broadcast %cst_42 : f32 to vector<8x32xf32>
    %102 = arith.addf %101, %100 : vector<8x32xf32>
    %103 = arith.divf %101, %102 : vector<8x32xf32>
    %104 = vector.extract_strided_slice %91 {offsets = [0, 64], sizes = [8, 32], strides = [1, 1]} : vector<8x128xf32> to vector<8x32xf32>
    %105 = math.tanh %104 : vector<8x32xf32>
    %106 = vector.extract_strided_slice %91 {offsets = [0, 96], sizes = [8, 32], strides = [1, 1]} : vector<8x128xf32> to vector<8x32xf32>
    %107 = arith.negf %106 : vector<8x32xf32>
    %108 = math.exp %107 : vector<8x32xf32>
    %cst_43 = arith.constant 1.000000e+00 : f32
    %109 = vector.broadcast %cst_43 : f32 to vector<8x32xf32>
    %110 = arith.addf %109, %108 : vector<8x32xf32>
    %111 = arith.divf %109, %110 : vector<8x32xf32>
    %112 = arith.mulf %103, %77 : vector<8x32xf32>
    %113 = arith.mulf %97, %105 : vector<8x32xf32>
    %114 = arith.addf %112, %113 : vector<8x32xf32>
    %115 = math.tanh %114 : vector<8x32xf32>
    %116 = arith.mulf %111, %115 : vector<8x32xf32>
    %c0_i32_44 = arith.constant 0 : i32
    %117 = arith.addi %c0_i32_44, %c2_i32 : i32
    %118 = arith.index_cast %117 : i32 to index
    %c0_45 = arith.constant 0 : index
    %c0_46 = arith.constant 0 : index
    %119 = vector.load %arg12[%118, %c0_45, %c0_46] : memref<8x8x32xf32, #tpu.memory_space<vmem>>, vector<1x8x32xf32>
    %120 = vector.shape_cast %119 : vector<1x8x32xf32> to vector<8x32xf32>
    %121 = vector.shape_cast %116 : vector<8x32xf32> to vector<1x8x32xf32>
    tpu.vector_store %arg12[%118, %c0_45, %c0_46], %121 {strides = array<i32>} : memref<8x8x32xf32, #tpu.memory_space<vmem>>, vector<1x8x32xf32>,
    %c3_i32 = arith.constant 3 : i32
    %c0_i32_47 = arith.constant 0 : i32
    %122 = arith.addi %c0_i32_47, %c3_i32 : i32
    %123 = arith.index_cast %122 : i32 to index
    %c0_48 = arith.constant 0 : index
    %c0_49 = arith.constant 0 : index
    %124 = vector.load %arg11[%123, %c0_48, %c0_49] : memref<8x8x128xf32, #tpu.memory_space<vmem>>, vector<1x8x128xf32>
    %125 = vector.shape_cast %124 : vector<1x8x128xf32> to vector<8x128xf32>
    %c0_50 = arith.constant 0 : index
    %c0_51 = arith.constant 0 : index
    %126 = vector.load %arg3[%c0_50, %c0_51] : memref<32x128xf32, #tpu.memory_space<vmem>>, vector<32x128xf32>
    %cst_52 = arith.constant dense<0.000000e+00> : vector<8x128xf32>
    %127 = tpu.matmul %116, %126, %cst_52 {dimension_numbers = #tpu.dot_dimension_numbers<[1], [0], [0], [1], [0, 0, 1, 1], [], []>} : vector<8x32xf32>, vector<32x128xf32>, vector<8x128xf32> -> vector<8x128xf32>
    %128 = arith.addf %125, %127 : vector<8x128xf32>
    %129 = vector.extract_strided_slice %128 {offsets = [0, 0], sizes = [8, 32], strides = [1, 1]} : vector<8x128xf32> to vector<8x32xf32>
    %130 = arith.negf %129 : vector<8x32xf32>
    %131 = math.exp %130 : vector<8x32xf32>
    %cst_53 = arith.constant 1.000000e+00 : f32
    %132 = vector.broadcast %cst_53 : f32 to vector<8x32xf32>
    %133 = arith.addf %132, %131 : vector<8x32xf32>
    %134 = arith.divf %132, %133 : vector<8x32xf32>
    %135 = vector.extract_strided_slice %128 {offsets = [0, 32], sizes = [8, 32], strides = [1, 1]} : vector<8x128xf32> to vector<8x32xf32>
    %136 = arith.negf %135 : vector<8x32xf32>
    %137 = math.exp %136 : vector<8x32xf32>
    %cst_54 = arith.constant 1.000000e+00 : f32
    %138 = vector.broadcast %cst_54 : f32 to vector<8x32xf32>
    %139 = arith.addf %138, %137 : vector<8x32xf32>
    %140 = arith.divf %138, %139 : vector<8x32xf32>
    %141 = vector.extract_strided_slice %128 {offsets = [0, 64], sizes = [8, 32], strides = [1, 1]} : vector<8x128xf32> to vector<8x32xf32>
    %142 = math.tanh %141 : vector<8x32xf32>
    %143 = vector.extract_strided_slice %128 {offsets = [0, 96], sizes = [8, 32], strides = [1, 1]} : vector<8x128xf32> to vector<8x32xf32>
    %144 = arith.negf %143 : vector<8x32xf32>
    %145 = math.exp %144 : vector<8x32xf32>
    %cst_55 = arith.constant 1.000000e+00 : f32
    %146 = vector.broadcast %cst_55 : f32 to vector<8x32xf32>
    %147 = arith.addf %146, %145 : vector<8x32xf32>
    %148 = arith.divf %146, %147 : vector<8x32xf32>
    %149 = arith.mulf %140, %114 : vector<8x32xf32>
    %150 = arith.mulf %134, %142 : vector<8x32xf32>
    %151 = arith.addf %149, %150 : vector<8x32xf32>
    %152 = math.tanh %151 : vector<8x32xf32>
    %153 = arith.mulf %148, %152 : vector<8x32xf32>
    %c0_i32_56 = arith.constant 0 : i32
    %154 = arith.addi %c0_i32_56, %c3_i32 : i32
    %155 = arith.index_cast %154 : i32 to index
    %c0_57 = arith.constant 0 : index
    %c0_58 = arith.constant 0 : index
    %156 = vector.load %arg12[%155, %c0_57, %c0_58] : memref<8x8x32xf32, #tpu.memory_space<vmem>>, vector<1x8x32xf32>
    %157 = vector.shape_cast %156 : vector<1x8x32xf32> to vector<8x32xf32>
    %158 = vector.shape_cast %153 : vector<8x32xf32> to vector<1x8x32xf32>
    tpu.vector_store %arg12[%155, %c0_57, %c0_58], %158 {strides = array<i32>} : memref<8x8x32xf32, #tpu.memory_space<vmem>>, vector<1x8x32xf32>,
    %c4_i32 = arith.constant 4 : i32
    %c0_i32_59 = arith.constant 0 : i32
    %159 = arith.addi %c0_i32_59, %c4_i32 : i32
    %160 = arith.index_cast %159 : i32 to index
    %c0_60 = arith.constant 0 : index
    %c0_61 = arith.constant 0 : index
    %161 = vector.load %arg11[%160, %c0_60, %c0_61] : memref<8x8x128xf32, #tpu.memory_space<vmem>>, vector<1x8x128xf32>
    %162 = vector.shape_cast %161 : vector<1x8x128xf32> to vector<8x128xf32>
    %c0_62 = arith.constant 0 : index
    %c0_63 = arith.constant 0 : index
    %163 = vector.load %arg3[%c0_62, %c0_63] : memref<32x128xf32, #tpu.memory_space<vmem>>, vector<32x128xf32>
    %cst_64 = arith.constant dense<0.000000e+00> : vector<8x128xf32>
    %164 = tpu.matmul %153, %163, %cst_64 {dimension_numbers = #tpu.dot_dimension_numbers<[1], [0], [0], [1], [0, 0, 1, 1], [], []>} : vector<8x32xf32>, vector<32x128xf32>, vector<8x128xf32> -> vector<8x128xf32>
    %165 = arith.addf %162, %164 : vector<8x128xf32>
    %166 = vector.extract_strided_slice %165 {offsets = [0, 0], sizes = [8, 32], strides = [1, 1]} : vector<8x128xf32> to vector<8x32xf32>
    %167 = arith.negf %166 : vector<8x32xf32>
    %168 = math.exp %167 : vector<8x32xf32>
    %cst_65 = arith.constant 1.000000e+00 : f32
    %169 = vector.broadcast %cst_65 : f32 to vector<8x32xf32>
    %170 = arith.addf %169, %168 : vector<8x32xf32>
    %171 = arith.divf %169, %170 : vector<8x32xf32>
    %172 = vector.extract_strided_slice %165 {offsets = [0, 32], sizes = [8, 32], strides = [1, 1]} : vector<8x128xf32> to vector<8x32xf32>
    %173 = arith.negf %172 : vector<8x32xf32>
    %174 = math.exp %173 : vector<8x32xf32>
    %cst_66 = arith.constant 1.000000e+00 : f32
    %175 = vector.broadcast %cst_66 : f32 to vector<8x32xf32>
    %176 = arith.addf %175, %174 : vector<8x32xf32>
    %177 = arith.divf %175, %176 : vector<8x32xf32>
    %178 = vector.extract_strided_slice %165 {offsets = [0, 64], sizes = [8, 32], strides = [1, 1]} : vector<8x128xf32> to vector<8x32xf32>
    %179 = math.tanh %178 : vector<8x32xf32>
    %180 = vector.extract_strided_slice %165 {offsets = [0, 96], sizes = [8, 32], strides = [1, 1]} : vector<8x128xf32> to vector<8x32xf32>
    %181 = arith.negf %180 : vector<8x32xf32>
    %182 = math.exp %181 : vector<8x32xf32>
    %cst_67 = arith.constant 1.000000e+00 : f32
    %183 = vector.broadcast %cst_67 : f32 to vector<8x32xf32>
    %184 = arith.addf %183, %182 : vector<8x32xf32>
    %185 = arith.divf %183, %184 : vector<8x32xf32>
    %186 = arith.mulf %177, %151 : vector<8x32xf32>
    %187 = arith.mulf %171, %179 : vector<8x32xf32>
    %188 = arith.addf %186, %187 : vector<8x32xf32>
    %189 = math.tanh %188 : vector<8x32xf32>
    %190 = arith.mulf %185, %189 : vector<8x32xf32>
    %c0_i32_68 = arith.constant 0 : i32
    %191 = arith.addi %c0_i32_68, %c4_i32 : i32
    %192 = arith.index_cast %191 : i32 to index
    %c0_69 = arith.constant 0 : index
    %c0_70 = arith.constant 0 : index
    %193 = vector.load %arg12[%192, %c0_69, %c0_70] : memref<8x8x32xf32, #tpu.memory_space<vmem>>, vector<1x8x32xf32>
    %194 = vector.shape_cast %193 : vector<1x8x32xf32> to vector<8x32xf32>
    %195 = vector.shape_cast %190 : vector<8x32xf32> to vector<1x8x32xf32>
    tpu.vector_store %arg12[%192, %c0_69, %c0_70], %195 {strides = array<i32>} : memref<8x8x32xf32, #tpu.memory_space<vmem>>, vector<1x8x32xf32>,
    %c5_i32 = arith.constant 5 : i32
    %c0_i32_71 = arith.constant 0 : i32
    %196 = arith.addi %c0_i32_71, %c5_i32 : i32
    %197 = arith.index_cast %196 : i32 to index
    %c0_72 = arith.constant 0 : index
    %c0_73 = arith.constant 0 : index
    %198 = vector.load %arg11[%197, %c0_72, %c0_73] : memref<8x8x128xf32, #tpu.memory_space<vmem>>, vector<1x8x128xf32>
    %199 = vector.shape_cast %198 : vector<1x8x128xf32> to vector<8x128xf32>
    %c0_74 = arith.constant 0 : index
    %c0_75 = arith.constant 0 : index
    %200 = vector.load %arg3[%c0_74, %c0_75] : memref<32x128xf32, #tpu.memory_space<vmem>>, vector<32x128xf32>
    %cst_76 = arith.constant dense<0.000000e+00> : vector<8x128xf32>
    %201 = tpu.matmul %190, %200, %cst_76 {dimension_numbers = #tpu.dot_dimension_numbers<[1], [0], [0], [1], [0, 0, 1, 1], [], []>} : vector<8x32xf32>, vector<32x128xf32>, vector<8x128xf32> -> vector<8x128xf32>
    %202 = arith.addf %199, %201 : vector<8x128xf32>
    %203 = vector.extract_strided_slice %202 {offsets = [0, 0], sizes = [8, 32], strides = [1, 1]} : vector<8x128xf32> to vector<8x32xf32>
    %204 = arith.negf %203 : vector<8x32xf32>
    %205 = math.exp %204 : vector<8x32xf32>
    %cst_77 = arith.constant 1.000000e+00 : f32
    %206 = vector.broadcast %cst_77 : f32 to vector<8x32xf32>
    %207 = arith.addf %206, %205 : vector<8x32xf32>
    %208 = arith.divf %206, %207 : vector<8x32xf32>
    %209 = vector.extract_strided_slice %202 {offsets = [0, 32], sizes = [8, 32], strides = [1, 1]} : vector<8x128xf32> to vector<8x32xf32>
    %210 = arith.negf %209 : vector<8x32xf32>
    %211 = math.exp %210 : vector<8x32xf32>
    %cst_78 = arith.constant 1.000000e+00 : f32
    %212 = vector.broadcast %cst_78 : f32 to vector<8x32xf32>
    %213 = arith.addf %212, %211 : vector<8x32xf32>
    %214 = arith.divf %212, %213 : vector<8x32xf32>
    %215 = vector.extract_strided_slice %202 {offsets = [0, 64], sizes = [8, 32], strides = [1, 1]} : vector<8x128xf32> to vector<8x32xf32>
    %216 = math.tanh %215 : vector<8x32xf32>
    %217 = vector.extract_strided_slice %202 {offsets = [0, 96], sizes = [8, 32], strides = [1, 1]} : vector<8x128xf32> to vector<8x32xf32>
    %218 = arith.negf %217 : vector<8x32xf32>
    %219 = math.exp %218 : vector<8x32xf32>
    %cst_79 = arith.constant 1.000000e+00 : f32
    %220 = vector.broadcast %cst_79 : f32 to vector<8x32xf32>
    %221 = arith.addf %220, %219 : vector<8x32xf32>
    %222 = arith.divf %220, %221 : vector<8x32xf32>
    %223 = arith.mulf %214, %188 : vector<8x32xf32>
    %224 = arith.mulf %208, %216 : vector<8x32xf32>
    %225 = arith.addf %223, %224 : vector<8x32xf32>
    %226 = math.tanh %225 : vector<8x32xf32>
    %227 = arith.mulf %222, %226 : vector<8x32xf32>
    %c0_i32_80 = arith.constant 0 : i32
    %228 = arith.addi %c0_i32_80, %c5_i32 : i32
    %229 = arith.index_cast %228 : i32 to index
    %c0_81 = arith.constant 0 : index
    %c0_82 = arith.constant 0 : index
    %230 = vector.load %arg12[%229, %c0_81, %c0_82] : memref<8x8x32xf32, #tpu.memory_space<vmem>>, vector<1x8x32xf32>
    %231 = vector.shape_cast %230 : vector<1x8x32xf32> to vector<8x32xf32>
    %232 = vector.shape_cast %227 : vector<8x32xf32> to vector<1x8x32xf32>
    tpu.vector_store %arg12[%229, %c0_81, %c0_82], %232 {strides = array<i32>} : memref<8x8x32xf32, #tpu.memory_space<vmem>>, vector<1x8x32xf32>,
    %c6_i32 = arith.constant 6 : i32
    %c0_i32_83 = arith.constant 0 : i32
    %233 = arith.addi %c0_i32_83, %c6_i32 : i32
    %234 = arith.index_cast %233 : i32 to index
    %c0_84 = arith.constant 0 : index
    %c0_85 = arith.constant 0 : index
    %235 = vector.load %arg11[%234, %c0_84, %c0_85] : memref<8x8x128xf32, #tpu.memory_space<vmem>>, vector<1x8x128xf32>
    %236 = vector.shape_cast %235 : vector<1x8x128xf32> to vector<8x128xf32>
    %c0_86 = arith.constant 0 : index
    %c0_87 = arith.constant 0 : index
    %237 = vector.load %arg3[%c0_86, %c0_87] : memref<32x128xf32, #tpu.memory_space<vmem>>, vector<32x128xf32>
    %cst_88 = arith.constant dense<0.000000e+00> : vector<8x128xf32>
    %238 = tpu.matmul %227, %237, %cst_88 {dimension_numbers = #tpu.dot_dimension_numbers<[1], [0], [0], [1], [0, 0, 1, 1], [], []>} : vector<8x32xf32>, vector<32x128xf32>, vector<8x128xf32> -> vector<8x128xf32>
    %239 = arith.addf %236, %238 : vector<8x128xf32>
    %240 = vector.extract_strided_slice %239 {offsets = [0, 0], sizes = [8, 32], strides = [1, 1]} : vector<8x128xf32> to vector<8x32xf32>
    %241 = arith.negf %240 : vector<8x32xf32>
    %242 = math.exp %241 : vector<8x32xf32>
    %cst_89 = arith.constant 1.000000e+00 : f32
    %243 = vector.broadcast %cst_89 : f32 to vector<8x32xf32>
    %244 = arith.addf %243, %242 : vector<8x32xf32>
    %245 = arith.divf %243, %244 : vector<8x32xf32>
    %246 = vector.extract_strided_slice %239 {offsets = [0, 32], sizes = [8, 32], strides = [1, 1]} : vector<8x128xf32> to vector<8x32xf32>
    %247 = arith.negf %246 : vector<8x32xf32>
    %248 = math.exp %247 : vector<8x32xf32>
    %cst_90 = arith.constant 1.000000e+00 : f32
    %249 = vector.broadcast %cst_90 : f32 to vector<8x32xf32>
    %250 = arith.addf %249, %248 : vector<8x32xf32>
    %251 = arith.divf %249, %250 : vector<8x32xf32>
    %252 = vector.extract_strided_slice %239 {offsets = [0, 64], sizes = [8, 32], strides = [1, 1]} : vector<8x128xf32> to vector<8x32xf32>
    %253 = math.tanh %252 : vector<8x32xf32>
    %254 = vector.extract_strided_slice %239 {offsets = [0, 96], sizes = [8, 32], strides = [1, 1]} : vector<8x128xf32> to vector<8x32xf32>
    %255 = arith.negf %254 : vector<8x32xf32>
    %256 = math.exp %255 : vector<8x32xf32>
    %cst_91 = arith.constant 1.000000e+00 : f32
    %257 = vector.broadcast %cst_91 : f32 to vector<8x32xf32>
    %258 = arith.addf %257, %256 : vector<8x32xf32>
    %259 = arith.divf %257, %258 : vector<8x32xf32>
    %260 = arith.mulf %251, %225 : vector<8x32xf32>
    %261 = arith.mulf %245, %253 : vector<8x32xf32>
    %262 = arith.addf %260, %261 : vector<8x32xf32>
    %263 = math.tanh %262 : vector<8x32xf32>
    %264 = arith.mulf %259, %263 : vector<8x32xf32>
    %c0_i32_92 = arith.constant 0 : i32
    %265 = arith.addi %c0_i32_92, %c6_i32 : i32
    %266 = arith.index_cast %265 : i32 to index
    %c0_93 = arith.constant 0 : index
    %c0_94 = arith.constant 0 : index
    %267 = vector.load %arg12[%266, %c0_93, %c0_94] : memref<8x8x32xf32, #tpu.memory_space<vmem>>, vector<1x8x32xf32>
    %268 = vector.shape_cast %267 : vector<1x8x32xf32> to vector<8x32xf32>
    %269 = vector.shape_cast %264 : vector<8x32xf32> to vector<1x8x32xf32>
    tpu.vector_store %arg12[%266, %c0_93, %c0_94], %269 {strides = array<i32>} : memref<8x8x32xf32, #tpu.memory_space<vmem>>, vector<1x8x32xf32>,
    %c7_i32 = arith.constant 7 : i32
    %c0_i32_95 = arith.constant 0 : i32
    %270 = arith.addi %c0_i32_95, %c7_i32 : i32
    %271 = arith.index_cast %270 : i32 to index
    %c0_96 = arith.constant 0 : index
    %c0_97 = arith.constant 0 : index
    %272 = vector.load %arg11[%271, %c0_96, %c0_97] : memref<8x8x128xf32, #tpu.memory_space<vmem>>, vector<1x8x128xf32>
    %273 = vector.shape_cast %272 : vector<1x8x128xf32> to vector<8x128xf32>
    %c0_98 = arith.constant 0 : index
    %c0_99 = arith.constant 0 : index
    %274 = vector.load %arg3[%c0_98, %c0_99] : memref<32x128xf32, #tpu.memory_space<vmem>>, vector<32x128xf32>
    %cst_100 = arith.constant dense<0.000000e+00> : vector<8x128xf32>
    %275 = tpu.matmul %264, %274, %cst_100 {dimension_numbers = #tpu.dot_dimension_numbers<[1], [0], [0], [1], [0, 0, 1, 1], [], []>} : vector<8x32xf32>, vector<32x128xf32>, vector<8x128xf32> -> vector<8x128xf32>
    %276 = arith.addf %273, %275 : vector<8x128xf32>
    %277 = vector.extract_strided_slice %276 {offsets = [0, 0], sizes = [8, 32], strides = [1, 1]} : vector<8x128xf32> to vector<8x32xf32>
    %278 = arith.negf %277 : vector<8x32xf32>
    %279 = math.exp %278 : vector<8x32xf32>
    %cst_101 = arith.constant 1.000000e+00 : f32
    %280 = vector.broadcast %cst_101 : f32 to vector<8x32xf32>
    %281 = arith.addf %280, %279 : vector<8x32xf32>
    %282 = arith.divf %280, %281 : vector<8x32xf32>
    %283 = vector.extract_strided_slice %276 {offsets = [0, 32], sizes = [8, 32], strides = [1, 1]} : vector<8x128xf32> to vector<8x32xf32>
    %284 = arith.negf %283 : vector<8x32xf32>
    %285 = math.exp %284 : vector<8x32xf32>
    %cst_102 = arith.constant 1.000000e+00 : f32
    %286 = vector.broadcast %cst_102 : f32 to vector<8x32xf32>
    %287 = arith.addf %286, %285 : vector<8x32xf32>
    %288 = arith.divf %286, %287 : vector<8x32xf32>
    %289 = vector.extract_strided_slice %276 {offsets = [0, 64], sizes = [8, 32], strides = [1, 1]} : vector<8x128xf32> to vector<8x32xf32>
    %290 = math.tanh %289 : vector<8x32xf32>
    %291 = vector.extract_strided_slice %276 {offsets = [0, 96], sizes = [8, 32], strides = [1, 1]} : vector<8x128xf32> to vector<8x32xf32>
    %292 = arith.negf %291 : vector<8x32xf32>
    %293 = math.exp %292 : vector<8x32xf32>
    %cst_103 = arith.constant 1.000000e+00 : f32
    %294 = vector.broadcast %cst_103 : f32 to vector<8x32xf32>
    %295 = arith.addf %294, %293 : vector<8x32xf32>
    %296 = arith.divf %294, %295 : vector<8x32xf32>
    %297 = arith.mulf %288, %262 : vector<8x32xf32>
    %298 = arith.mulf %282, %290 : vector<8x32xf32>
    %299 = arith.addf %297, %298 : vector<8x32xf32>
    %300 = math.tanh %299 : vector<8x32xf32>
    %301 = arith.mulf %296, %300 : vector<8x32xf32>
    %c0_i32_104 = arith.constant 0 : i32
    %302 = arith.addi %c0_i32_104, %c7_i32 : i32
    %303 = arith.index_cast %302 : i32 to index
    %c0_105 = arith.constant 0 : index
    %c0_106 = arith.constant 0 : index
    %304 = vector.load %arg12[%303, %c0_105, %c0_106] : memref<8x8x32xf32, #tpu.memory_space<vmem>>, vector<1x8x32xf32>
    %305 = vector.shape_cast %304 : vector<1x8x32xf32> to vector<8x32xf32>
    %306 = vector.shape_cast %301 : vector<8x32xf32> to vector<1x8x32xf32>
    tpu.vector_store %arg12[%303, %c0_105, %c0_106], %306 {strides = array<i32>} : memref<8x8x32xf32, #tpu.memory_space<vmem>>, vector<1x8x32xf32>,
    %c8_i32 = arith.constant 8 : i32
    %cst_107 = arith.constant 0.000000e+00 : f32
    %307 = vector.broadcast %cst_107 : f32 to vector<8x32xf32>
    %cst_108 = arith.constant 0.000000e+00 : f32
    %308 = vector.broadcast %cst_108 : f32 to vector<8x32xf32>
    %c0_109 = arith.constant 0 : index
    %c0_110 = arith.constant 0 : index
    %c0_111 = arith.constant 0 : index
    %309 = vector.load %arg12[%c0_109, %c0_110, %c0_111] : memref<8x8x32xf32, #tpu.memory_space<vmem>>, vector<8x8x32xf32>
    %310 = vector.shape_cast %309 : vector<8x8x32xf32> to vector<64x32xf32>
    %c0_112 = arith.constant 0 : index
    %c0_113 = arith.constant 0 : index
    %311 = vector.load %arg5[%c0_112, %c0_113] : memref<32x128xf32, #tpu.memory_space<vmem>>, vector<32x128xf32>
    %cst_114 = arith.constant dense<0.000000e+00> : vector<64x128xf32>
    %312 = tpu.matmul %310, %311, %cst_114 {dimension_numbers = #tpu.dot_dimension_numbers<[1], [0], [0], [1], [0, 0, 1, 1], [], []>} : vector<64x32xf32>, vector<32x128xf32>, vector<64x128xf32> -> vector<64x128xf32>
    %c0_115 = arith.constant 0 : index
    %c0_116 = arith.constant 0 : index
    %313 = vector.load %arg7[%c0_115, %c0_116] : memref<1x128xf32, #tpu.memory_space<vmem>>, vector<1x128xf32>
    %314 = vector.broadcast %313 : vector<1x128xf32> to vector<64x128xf32>
    %315 = arith.addf %312, %314 : vector<64x128xf32>
    %316 = vector.shape_cast %315 : vector<64x128xf32> to vector<8x8x128xf32>
    %c0_117 = arith.constant 0 : index
    %c0_118 = arith.constant 0 : index
    %c0_119 = arith.constant 0 : index
    %317 = vector.load %arg11[%c0_117, %c0_118, %c0_119] : memref<8x8x128xf32, #tpu.memory_space<vmem>>, vector<8x8x128xf32>
    tpu.vector_store %arg11[%c0_117, %c0_118, %c0_119], %316 {strides = array<i32>} : memref<8x8x128xf32, #tpu.memory_space<vmem>>, vector<8x8x128xf32>,
    %c0_i32_120 = arith.constant 0 : i32
    %c0_i32_121 = arith.constant 0 : i32
    %318 = arith.addi %c0_i32_121, %c0_i32_120 : i32
    %319 = arith.index_cast %318 : i32 to index
    %c0_122 = arith.constant 0 : index
    %c0_123 = arith.constant 0 : index
    %320 = vector.load %arg11[%319, %c0_122, %c0_123] : memref<8x8x128xf32, #tpu.memory_space<vmem>>, vector<1x8x128xf32>
    %321 = vector.shape_cast %320 : vector<1x8x128xf32> to vector<8x128xf32>
    %c0_124 = arith.constant 0 : index
    %c0_125 = arith.constant 0 : index
    %322 = vector.load %arg6[%c0_124, %c0_125] : memref<32x128xf32, #tpu.memory_space<vmem>>, vector<32x128xf32>
    %cst_126 = arith.constant dense<0.000000e+00> : vector<8x128xf32>
    %323 = tpu.matmul %307, %322, %cst_126 {dimension_numbers = #tpu.dot_dimension_numbers<[1], [0], [0], [1], [0, 0, 1, 1], [], []>} : vector<8x32xf32>, vector<32x128xf32>, vector<8x128xf32> -> vector<8x128xf32>
    %324 = arith.addf %321, %323 : vector<8x128xf32>
    %325 = vector.extract_strided_slice %324 {offsets = [0, 0], sizes = [8, 32], strides = [1, 1]} : vector<8x128xf32> to vector<8x32xf32>
    %326 = arith.negf %325 : vector<8x32xf32>
    %327 = math.exp %326 : vector<8x32xf32>
    %cst_127 = arith.constant 1.000000e+00 : f32
    %328 = vector.broadcast %cst_127 : f32 to vector<8x32xf32>
    %329 = arith.addf %328, %327 : vector<8x32xf32>
    %330 = arith.divf %328, %329 : vector<8x32xf32>
    %331 = vector.extract_strided_slice %324 {offsets = [0, 32], sizes = [8, 32], strides = [1, 1]} : vector<8x128xf32> to vector<8x32xf32>
    %332 = arith.negf %331 : vector<8x32xf32>
    %333 = math.exp %332 : vector<8x32xf32>
    %cst_128 = arith.constant 1.000000e+00 : f32
    %334 = vector.broadcast %cst_128 : f32 to vector<8x32xf32>
    %335 = arith.addf %334, %333 : vector<8x32xf32>
    %336 = arith.divf %334, %335 : vector<8x32xf32>
    %337 = vector.extract_strided_slice %324 {offsets = [0, 64], sizes = [8, 32], strides = [1, 1]} : vector<8x128xf32> to vector<8x32xf32>
    %338 = math.tanh %337 : vector<8x32xf32>
    %339 = vector.extract_strided_slice %324 {offsets = [0, 96], sizes = [8, 32], strides = [1, 1]} : vector<8x128xf32> to vector<8x32xf32>
    %340 = arith.negf %339 : vector<8x32xf32>
    %341 = math.exp %340 : vector<8x32xf32>
    %cst_129 = arith.constant 1.000000e+00 : f32
    %342 = vector.broadcast %cst_129 : f32 to vector<8x32xf32>
    %343 = arith.addf %342, %341 : vector<8x32xf32>
    %344 = arith.divf %342, %343 : vector<8x32xf32>
    %345 = arith.mulf %336, %308 : vector<8x32xf32>
    %346 = arith.mulf %330, %338 : vector<8x32xf32>
    %347 = arith.addf %345, %346 : vector<8x32xf32>
    %348 = math.tanh %347 : vector<8x32xf32>
    %349 = arith.mulf %344, %348 : vector<8x32xf32>
    %c1_i32_130 = arith.constant 1 : i32
    %c0_i32_131 = arith.constant 0 : i32
    %350 = arith.addi %c0_i32_131, %c1_i32_130 : i32
    %351 = arith.index_cast %350 : i32 to index
    %c0_132 = arith.constant 0 : index
    %c0_133 = arith.constant 0 : index
    %352 = vector.load %arg11[%351, %c0_132, %c0_133] : memref<8x8x128xf32, #tpu.memory_space<vmem>>, vector<1x8x128xf32>
    %353 = vector.shape_cast %352 : vector<1x8x128xf32> to vector<8x128xf32>
    %c0_134 = arith.constant 0 : index
    %c0_135 = arith.constant 0 : index
    %354 = vector.load %arg6[%c0_134, %c0_135] : memref<32x128xf32, #tpu.memory_space<vmem>>, vector<32x128xf32>
    %cst_136 = arith.constant dense<0.000000e+00> : vector<8x128xf32>
    %355 = tpu.matmul %349, %354, %cst_136 {dimension_numbers = #tpu.dot_dimension_numbers<[1], [0], [0], [1], [0, 0, 1, 1], [], []>} : vector<8x32xf32>, vector<32x128xf32>, vector<8x128xf32> -> vector<8x128xf32>
    %356 = arith.addf %353, %355 : vector<8x128xf32>
    %357 = vector.extract_strided_slice %356 {offsets = [0, 0], sizes = [8, 32], strides = [1, 1]} : vector<8x128xf32> to vector<8x32xf32>
    %358 = arith.negf %357 : vector<8x32xf32>
    %359 = math.exp %358 : vector<8x32xf32>
    %cst_137 = arith.constant 1.000000e+00 : f32
    %360 = vector.broadcast %cst_137 : f32 to vector<8x32xf32>
    %361 = arith.addf %360, %359 : vector<8x32xf32>
    %362 = arith.divf %360, %361 : vector<8x32xf32>
    %363 = vector.extract_strided_slice %356 {offsets = [0, 32], sizes = [8, 32], strides = [1, 1]} : vector<8x128xf32> to vector<8x32xf32>
    %364 = arith.negf %363 : vector<8x32xf32>
    %365 = math.exp %364 : vector<8x32xf32>
    %cst_138 = arith.constant 1.000000e+00 : f32
    %366 = vector.broadcast %cst_138 : f32 to vector<8x32xf32>
    %367 = arith.addf %366, %365 : vector<8x32xf32>
    %368 = arith.divf %366, %367 : vector<8x32xf32>
    %369 = vector.extract_strided_slice %356 {offsets = [0, 64], sizes = [8, 32], strides = [1, 1]} : vector<8x128xf32> to vector<8x32xf32>
    %370 = math.tanh %369 : vector<8x32xf32>
    %371 = vector.extract_strided_slice %356 {offsets = [0, 96], sizes = [8, 32], strides = [1, 1]} : vector<8x128xf32> to vector<8x32xf32>
    %372 = arith.negf %371 : vector<8x32xf32>
    %373 = math.exp %372 : vector<8x32xf32>
    %cst_139 = arith.constant 1.000000e+00 : f32
    %374 = vector.broadcast %cst_139 : f32 to vector<8x32xf32>
    %375 = arith.addf %374, %373 : vector<8x32xf32>
    %376 = arith.divf %374, %375 : vector<8x32xf32>
    %377 = arith.mulf %368, %347 : vector<8x32xf32>
    %378 = arith.mulf %362, %370 : vector<8x32xf32>
    %379 = arith.addf %377, %378 : vector<8x32xf32>
    %380 = math.tanh %379 : vector<8x32xf32>
    %381 = arith.mulf %376, %380 : vector<8x32xf32>
    %c2_i32_140 = arith.constant 2 : i32
    %c0_i32_141 = arith.constant 0 : i32
    %382 = arith.addi %c0_i32_141, %c2_i32_140 : i32
    %383 = arith.index_cast %382 : i32 to index
    %c0_142 = arith.constant 0 : index
    %c0_143 = arith.constant 0 : index
    %384 = vector.load %arg11[%383, %c0_142, %c0_143] : memref<8x8x128xf32, #tpu.memory_space<vmem>>, vector<1x8x128xf32>
    %385 = vector.shape_cast %384 : vector<1x8x128xf32> to vector<8x128xf32>
    %c0_144 = arith.constant 0 : index
    %c0_145 = arith.constant 0 : index
    %386 = vector.load %arg6[%c0_144, %c0_145] : memref<32x128xf32, #tpu.memory_space<vmem>>, vector<32x128xf32>
    %cst_146 = arith.constant dense<0.000000e+00> : vector<8x128xf32>
    %387 = tpu.matmul %381, %386, %cst_146 {dimension_numbers = #tpu.dot_dimension_numbers<[1], [0], [0], [1], [0, 0, 1, 1], [], []>} : vector<8x32xf32>, vector<32x128xf32>, vector<8x128xf32> -> vector<8x128xf32>
    %388 = arith.addf %385, %387 : vector<8x128xf32>
    %389 = vector.extract_strided_slice %388 {offsets = [0, 0], sizes = [8, 32], strides = [1, 1]} : vector<8x128xf32> to vector<8x32xf32>
    %390 = arith.negf %389 : vector<8x32xf32>
    %391 = math.exp %390 : vector<8x32xf32>
    %cst_147 = arith.constant 1.000000e+00 : f32
    %392 = vector.broadcast %cst_147 : f32 to vector<8x32xf32>
    %393 = arith.addf %392, %391 : vector<8x32xf32>
    %394 = arith.divf %392, %393 : vector<8x32xf32>
    %395 = vector.extract_strided_slice %388 {offsets = [0, 32], sizes = [8, 32], strides = [1, 1]} : vector<8x128xf32> to vector<8x32xf32>
    %396 = arith.negf %395 : vector<8x32xf32>
    %397 = math.exp %396 : vector<8x32xf32>
    %cst_148 = arith.constant 1.000000e+00 : f32
    %398 = vector.broadcast %cst_148 : f32 to vector<8x32xf32>
    %399 = arith.addf %398, %397 : vector<8x32xf32>
    %400 = arith.divf %398, %399 : vector<8x32xf32>
    %401 = vector.extract_strided_slice %388 {offsets = [0, 64], sizes = [8, 32], strides = [1, 1]} : vector<8x128xf32> to vector<8x32xf32>
    %402 = math.tanh %401 : vector<8x32xf32>
    %403 = vector.extract_strided_slice %388 {offsets = [0, 96], sizes = [8, 32], strides = [1, 1]} : vector<8x128xf32> to vector<8x32xf32>
    %404 = arith.negf %403 : vector<8x32xf32>
    %405 = math.exp %404 : vector<8x32xf32>
    %cst_149 = arith.constant 1.000000e+00 : f32
    %406 = vector.broadcast %cst_149 : f32 to vector<8x32xf32>
    %407 = arith.addf %406, %405 : vector<8x32xf32>
    %408 = arith.divf %406, %407 : vector<8x32xf32>
    %409 = arith.mulf %400, %379 : vector<8x32xf32>
    %410 = arith.mulf %394, %402 : vector<8x32xf32>
    %411 = arith.addf %409, %410 : vector<8x32xf32>
    %412 = math.tanh %411 : vector<8x32xf32>
    %413 = arith.mulf %408, %412 : vector<8x32xf32>
    %c3_i32_150 = arith.constant 3 : i32
    %c0_i32_151 = arith.constant 0 : i32
    %414 = arith.addi %c0_i32_151, %c3_i32_150 : i32
    %415 = arith.index_cast %414 : i32 to index
    %c0_152 = arith.constant 0 : index
    %c0_153 = arith.constant 0 : index
    %416 = vector.load %arg11[%415, %c0_152, %c0_153] : memref<8x8x128xf32, #tpu.memory_space<vmem>>, vector<1x8x128xf32>
    %417 = vector.shape_cast %416 : vector<1x8x128xf32> to vector<8x128xf32>
    %c0_154 = arith.constant 0 : index
    %c0_155 = arith.constant 0 : index
    %418 = vector.load %arg6[%c0_154, %c0_155] : memref<32x128xf32, #tpu.memory_space<vmem>>, vector<32x128xf32>
    %cst_156 = arith.constant dense<0.000000e+00> : vector<8x128xf32>
    %419 = tpu.matmul %413, %418, %cst_156 {dimension_numbers = #tpu.dot_dimension_numbers<[1], [0], [0], [1], [0, 0, 1, 1], [], []>} : vector<8x32xf32>, vector<32x128xf32>, vector<8x128xf32> -> vector<8x128xf32>
    %420 = arith.addf %417, %419 : vector<8x128xf32>
    %421 = vector.extract_strided_slice %420 {offsets = [0, 0], sizes = [8, 32], strides = [1, 1]} : vector<8x128xf32> to vector<8x32xf32>
    %422 = arith.negf %421 : vector<8x32xf32>
    %423 = math.exp %422 : vector<8x32xf32>
    %cst_157 = arith.constant 1.000000e+00 : f32
    %424 = vector.broadcast %cst_157 : f32 to vector<8x32xf32>
    %425 = arith.addf %424, %423 : vector<8x32xf32>
    %426 = arith.divf %424, %425 : vector<8x32xf32>
    %427 = vector.extract_strided_slice %420 {offsets = [0, 32], sizes = [8, 32], strides = [1, 1]} : vector<8x128xf32> to vector<8x32xf32>
    %428 = arith.negf %427 : vector<8x32xf32>
    %429 = math.exp %428 : vector<8x32xf32>
    %cst_158 = arith.constant 1.000000e+00 : f32
    %430 = vector.broadcast %cst_158 : f32 to vector<8x32xf32>
    %431 = arith.addf %430, %429 : vector<8x32xf32>
    %432 = arith.divf %430, %431 : vector<8x32xf32>
    %433 = vector.extract_strided_slice %420 {offsets = [0, 64], sizes = [8, 32], strides = [1, 1]} : vector<8x128xf32> to vector<8x32xf32>
    %434 = math.tanh %433 : vector<8x32xf32>
    %435 = vector.extract_strided_slice %420 {offsets = [0, 96], sizes = [8, 32], strides = [1, 1]} : vector<8x128xf32> to vector<8x32xf32>
    %436 = arith.negf %435 : vector<8x32xf32>
    %437 = math.exp %436 : vector<8x32xf32>
    %cst_159 = arith.constant 1.000000e+00 : f32
    %438 = vector.broadcast %cst_159 : f32 to vector<8x32xf32>
    %439 = arith.addf %438, %437 : vector<8x32xf32>
    %440 = arith.divf %438, %439 : vector<8x32xf32>
    %441 = arith.mulf %432, %411 : vector<8x32xf32>
    %442 = arith.mulf %426, %434 : vector<8x32xf32>
    %443 = arith.addf %441, %442 : vector<8x32xf32>
    %444 = math.tanh %443 : vector<8x32xf32>
    %445 = arith.mulf %440, %444 : vector<8x32xf32>
    %c4_i32_160 = arith.constant 4 : i32
    %c0_i32_161 = arith.constant 0 : i32
    %446 = arith.addi %c0_i32_161, %c4_i32_160 : i32
    %447 = arith.index_cast %446 : i32 to index
    %c0_162 = arith.constant 0 : index
    %c0_163 = arith.constant 0 : index
    %448 = vector.load %arg11[%447, %c0_162, %c0_163] : memref<8x8x128xf32, #tpu.memory_space<vmem>>, vector<1x8x128xf32>
    %449 = vector.shape_cast %448 : vector<1x8x128xf32> to vector<8x128xf32>
    %c0_164 = arith.constant 0 : index
    %c0_165 = arith.constant 0 : index
    %450 = vector.load %arg6[%c0_164, %c0_165] : memref<32x128xf32, #tpu.memory_space<vmem>>, vector<32x128xf32>
    %cst_166 = arith.constant dense<0.000000e+00> : vector<8x128xf32>
    %451 = tpu.matmul %445, %450, %cst_166 {dimension_numbers = #tpu.dot_dimension_numbers<[1], [0], [0], [1], [0, 0, 1, 1], [], []>} : vector<8x32xf32>, vector<32x128xf32>, vector<8x128xf32> -> vector<8x128xf32>
    %452 = arith.addf %449, %451 : vector<8x128xf32>
    %453 = vector.extract_strided_slice %452 {offsets = [0, 0], sizes = [8, 32], strides = [1, 1]} : vector<8x128xf32> to vector<8x32xf32>
    %454 = arith.negf %453 : vector<8x32xf32>
    %455 = math.exp %454 : vector<8x32xf32>
    %cst_167 = arith.constant 1.000000e+00 : f32
    %456 = vector.broadcast %cst_167 : f32 to vector<8x32xf32>
    %457 = arith.addf %456, %455 : vector<8x32xf32>
    %458 = arith.divf %456, %457 : vector<8x32xf32>
    %459 = vector.extract_strided_slice %452 {offsets = [0, 32], sizes = [8, 32], strides = [1, 1]} : vector<8x128xf32> to vector<8x32xf32>
    %460 = arith.negf %459 : vector<8x32xf32>
    %461 = math.exp %460 : vector<8x32xf32>
    %cst_168 = arith.constant 1.000000e+00 : f32
    %462 = vector.broadcast %cst_168 : f32 to vector<8x32xf32>
    %463 = arith.addf %462, %461 : vector<8x32xf32>
    %464 = arith.divf %462, %463 : vector<8x32xf32>
    %465 = vector.extract_strided_slice %452 {offsets = [0, 64], sizes = [8, 32], strides = [1, 1]} : vector<8x128xf32> to vector<8x32xf32>
    %466 = math.tanh %465 : vector<8x32xf32>
    %467 = vector.extract_strided_slice %452 {offsets = [0, 96], sizes = [8, 32], strides = [1, 1]} : vector<8x128xf32> to vector<8x32xf32>
    %468 = arith.negf %467 : vector<8x32xf32>
    %469 = math.exp %468 : vector<8x32xf32>
    %cst_169 = arith.constant 1.000000e+00 : f32
    %470 = vector.broadcast %cst_169 : f32 to vector<8x32xf32>
    %471 = arith.addf %470, %469 : vector<8x32xf32>
    %472 = arith.divf %470, %471 : vector<8x32xf32>
    %473 = arith.mulf %464, %443 : vector<8x32xf32>
    %474 = arith.mulf %458, %466 : vector<8x32xf32>
    %475 = arith.addf %473, %474 : vector<8x32xf32>
    %476 = math.tanh %475 : vector<8x32xf32>
    %477 = arith.mulf %472, %476 : vector<8x32xf32>
    %c5_i32_170 = arith.constant 5 : i32
    %c0_i32_171 = arith.constant 0 : i32
    %478 = arith.addi %c0_i32_171, %c5_i32_170 : i32
    %479 = arith.index_cast %478 : i32 to index
    %c0_172 = arith.constant 0 : index
    %c0_173 = arith.constant 0 : index
    %480 = vector.load %arg11[%479, %c0_172, %c0_173] : memref<8x8x128xf32, #tpu.memory_space<vmem>>, vector<1x8x128xf32>
    %481 = vector.shape_cast %480 : vector<1x8x128xf32> to vector<8x128xf32>
    %c0_174 = arith.constant 0 : index
    %c0_175 = arith.constant 0 : index
    %482 = vector.load %arg6[%c0_174, %c0_175] : memref<32x128xf32, #tpu.memory_space<vmem>>, vector<32x128xf32>
    %cst_176 = arith.constant dense<0.000000e+00> : vector<8x128xf32>
    %483 = tpu.matmul %477, %482, %cst_176 {dimension_numbers = #tpu.dot_dimension_numbers<[1], [0], [0], [1], [0, 0, 1, 1], [], []>} : vector<8x32xf32>, vector<32x128xf32>, vector<8x128xf32> -> vector<8x128xf32>
    %484 = arith.addf %481, %483 : vector<8x128xf32>
    %485 = vector.extract_strided_slice %484 {offsets = [0, 0], sizes = [8, 32], strides = [1, 1]} : vector<8x128xf32> to vector<8x32xf32>
    %486 = arith.negf %485 : vector<8x32xf32>
    %487 = math.exp %486 : vector<8x32xf32>
    %cst_177 = arith.constant 1.000000e+00 : f32
    %488 = vector.broadcast %cst_177 : f32 to vector<8x32xf32>
    %489 = arith.addf %488, %487 : vector<8x32xf32>
    %490 = arith.divf %488, %489 : vector<8x32xf32>
    %491 = vector.extract_strided_slice %484 {offsets = [0, 32], sizes = [8, 32], strides = [1, 1]} : vector<8x128xf32> to vector<8x32xf32>
    %492 = arith.negf %491 : vector<8x32xf32>
    %493 = math.exp %492 : vector<8x32xf32>
    %cst_178 = arith.constant 1.000000e+00 : f32
    %494 = vector.broadcast %cst_178 : f32 to vector<8x32xf32>
    %495 = arith.addf %494, %493 : vector<8x32xf32>
    %496 = arith.divf %494, %495 : vector<8x32xf32>
    %497 = vector.extract_strided_slice %484 {offsets = [0, 64], sizes = [8, 32], strides = [1, 1]} : vector<8x128xf32> to vector<8x32xf32>
    %498 = math.tanh %497 : vector<8x32xf32>
    %499 = vector.extract_strided_slice %484 {offsets = [0, 96], sizes = [8, 32], strides = [1, 1]} : vector<8x128xf32> to vector<8x32xf32>
    %500 = arith.negf %499 : vector<8x32xf32>
    %501 = math.exp %500 : vector<8x32xf32>
    %cst_179 = arith.constant 1.000000e+00 : f32
    %502 = vector.broadcast %cst_179 : f32 to vector<8x32xf32>
    %503 = arith.addf %502, %501 : vector<8x32xf32>
    %504 = arith.divf %502, %503 : vector<8x32xf32>
    %505 = arith.mulf %496, %475 : vector<8x32xf32>
    %506 = arith.mulf %490, %498 : vector<8x32xf32>
    %507 = arith.addf %505, %506 : vector<8x32xf32>
    %508 = math.tanh %507 : vector<8x32xf32>
    %509 = arith.mulf %504, %508 : vector<8x32xf32>
    %c6_i32_180 = arith.constant 6 : i32
    %c0_i32_181 = arith.constant 0 : i32
    %510 = arith.addi %c0_i32_181, %c6_i32_180 : i32
    %511 = arith.index_cast %510 : i32 to index
    %c0_182 = arith.constant 0 : index
    %c0_183 = arith.constant 0 : index
    %512 = vector.load %arg11[%511, %c0_182, %c0_183] : memref<8x8x128xf32, #tpu.memory_space<vmem>>, vector<1x8x128xf32>
    %513 = vector.shape_cast %512 : vector<1x8x128xf32> to vector<8x128xf32>
    %c0_184 = arith.constant 0 : index
    %c0_185 = arith.constant 0 : index
    %514 = vector.load %arg6[%c0_184, %c0_185] : memref<32x128xf32, #tpu.memory_space<vmem>>, vector<32x128xf32>
    %cst_186 = arith.constant dense<0.000000e+00> : vector<8x128xf32>
    %515 = tpu.matmul %509, %514, %cst_186 {dimension_numbers = #tpu.dot_dimension_numbers<[1], [0], [0], [1], [0, 0, 1, 1], [], []>} : vector<8x32xf32>, vector<32x128xf32>, vector<8x128xf32> -> vector<8x128xf32>
    %516 = arith.addf %513, %515 : vector<8x128xf32>
    %517 = vector.extract_strided_slice %516 {offsets = [0, 0], sizes = [8, 32], strides = [1, 1]} : vector<8x128xf32> to vector<8x32xf32>
    %518 = arith.negf %517 : vector<8x32xf32>
    %519 = math.exp %518 : vector<8x32xf32>
    %cst_187 = arith.constant 1.000000e+00 : f32
    %520 = vector.broadcast %cst_187 : f32 to vector<8x32xf32>
    %521 = arith.addf %520, %519 : vector<8x32xf32>
    %522 = arith.divf %520, %521 : vector<8x32xf32>
    %523 = vector.extract_strided_slice %516 {offsets = [0, 32], sizes = [8, 32], strides = [1, 1]} : vector<8x128xf32> to vector<8x32xf32>
    %524 = arith.negf %523 : vector<8x32xf32>
    %525 = math.exp %524 : vector<8x32xf32>
    %cst_188 = arith.constant 1.000000e+00 : f32
    %526 = vector.broadcast %cst_188 : f32 to vector<8x32xf32>
    %527 = arith.addf %526, %525 : vector<8x32xf32>
    %528 = arith.divf %526, %527 : vector<8x32xf32>
    %529 = vector.extract_strided_slice %516 {offsets = [0, 64], sizes = [8, 32], strides = [1, 1]} : vector<8x128xf32> to vector<8x32xf32>
    %530 = math.tanh %529 : vector<8x32xf32>
    %531 = vector.extract_strided_slice %516 {offsets = [0, 96], sizes = [8, 32], strides = [1, 1]} : vector<8x128xf32> to vector<8x32xf32>
    %532 = arith.negf %531 : vector<8x32xf32>
    %533 = math.exp %532 : vector<8x32xf32>
    %cst_189 = arith.constant 1.000000e+00 : f32
    %534 = vector.broadcast %cst_189 : f32 to vector<8x32xf32>
    %535 = arith.addf %534, %533 : vector<8x32xf32>
    %536 = arith.divf %534, %535 : vector<8x32xf32>
    %537 = arith.mulf %528, %507 : vector<8x32xf32>
    %538 = arith.mulf %522, %530 : vector<8x32xf32>
    %539 = arith.addf %537, %538 : vector<8x32xf32>
    %540 = math.tanh %539 : vector<8x32xf32>
    %541 = arith.mulf %536, %540 : vector<8x32xf32>
    %c7_i32_190 = arith.constant 7 : i32
    %c0_i32_191 = arith.constant 0 : i32
    %542 = arith.addi %c0_i32_191, %c7_i32_190 : i32
    %543 = arith.index_cast %542 : i32 to index
    %c0_192 = arith.constant 0 : index
    %c0_193 = arith.constant 0 : index
    %544 = vector.load %arg11[%543, %c0_192, %c0_193] : memref<8x8x128xf32, #tpu.memory_space<vmem>>, vector<1x8x128xf32>
    %545 = vector.shape_cast %544 : vector<1x8x128xf32> to vector<8x128xf32>
    %c0_194 = arith.constant 0 : index
    %c0_195 = arith.constant 0 : index
    %546 = vector.load %arg6[%c0_194, %c0_195] : memref<32x128xf32, #tpu.memory_space<vmem>>, vector<32x128xf32>
    %cst_196 = arith.constant dense<0.000000e+00> : vector<8x128xf32>
    %547 = tpu.matmul %541, %546, %cst_196 {dimension_numbers = #tpu.dot_dimension_numbers<[1], [0], [0], [1], [0, 0, 1, 1], [], []>} : vector<8x32xf32>, vector<32x128xf32>, vector<8x128xf32> -> vector<8x128xf32>
    %548 = arith.addf %545, %547 : vector<8x128xf32>
    %549 = vector.extract_strided_slice %548 {offsets = [0, 0], sizes = [8, 32], strides = [1, 1]} : vector<8x128xf32> to vector<8x32xf32>
    %550 = arith.negf %549 : vector<8x32xf32>
    %551 = math.exp %550 : vector<8x32xf32>
    %cst_197 = arith.constant 1.000000e+00 : f32
    %552 = vector.broadcast %cst_197 : f32 to vector<8x32xf32>
    %553 = arith.addf %552, %551 : vector<8x32xf32>
    %554 = arith.divf %552, %553 : vector<8x32xf32>
    %555 = vector.extract_strided_slice %548 {offsets = [0, 32], sizes = [8, 32], strides = [1, 1]} : vector<8x128xf32> to vector<8x32xf32>
    %556 = arith.negf %555 : vector<8x32xf32>
    %557 = math.exp %556 : vector<8x32xf32>
    %cst_198 = arith.constant 1.000000e+00 : f32
    %558 = vector.broadcast %cst_198 : f32 to vector<8x32xf32>
    %559 = arith.addf %558, %557 : vector<8x32xf32>
    %560 = arith.divf %558, %559 : vector<8x32xf32>
    %561 = vector.extract_strided_slice %548 {offsets = [0, 64], sizes = [8, 32], strides = [1, 1]} : vector<8x128xf32> to vector<8x32xf32>
    %562 = math.tanh %561 : vector<8x32xf32>
    %563 = vector.extract_strided_slice %548 {offsets = [0, 96], sizes = [8, 32], strides = [1, 1]} : vector<8x128xf32> to vector<8x32xf32>
    %564 = arith.negf %563 : vector<8x32xf32>
    %565 = math.exp %564 : vector<8x32xf32>
    %cst_199 = arith.constant 1.000000e+00 : f32
    %566 = vector.broadcast %cst_199 : f32 to vector<8x32xf32>
    %567 = arith.addf %566, %565 : vector<8x32xf32>
    %568 = arith.divf %566, %567 : vector<8x32xf32>
    %569 = arith.mulf %560, %539 : vector<8x32xf32>
    %570 = arith.mulf %554, %562 : vector<8x32xf32>
    %571 = arith.addf %569, %570 : vector<8x32xf32>
    %572 = math.tanh %571 : vector<8x32xf32>
    %573 = arith.mulf %568, %572 : vector<8x32xf32>
    %c8_i32_200 = arith.constant 8 : i32
    %c0_201 = arith.constant 0 : index
    %c0_202 = arith.constant 0 : index
    %574 = vector.load %arg8[%c0_201, %c0_202] : memref<32x128xf32, #tpu.memory_space<vmem>>, vector<32x128xf32>
    %cst_203 = arith.constant dense<0.000000e+00> : vector<8x128xf32>
    %575 = tpu.matmul %573, %574, %cst_203 {dimension_numbers = #tpu.dot_dimension_numbers<[1], [0], [0], [1], [0, 0, 1, 1], [], []>} : vector<8x32xf32>, vector<32x128xf32>, vector<8x128xf32> -> vector<8x128xf32>
    %c0_204 = arith.constant 0 : index
    %c0_205 = arith.constant 0 : index
    %576 = vector.load %arg9[%c0_204, %c0_205] : memref<1x128xf32, #tpu.memory_space<vmem>>, vector<1x128xf32>
    %577 = vector.broadcast %576 : vector<1x128xf32> to vector<8x128xf32>
    %578 = arith.addf %575, %577 : vector<8x128xf32>
    %c0_206 = arith.constant 0 : index
    %c0_207 = arith.constant 0 : index
    %579 = vector.load %arg10[%c0_206, %c0_207] : memref<8x128xf32, #tpu.memory_space<vmem>>, vector<8x128xf32>
    tpu.vector_store %arg10[%c0_206, %c0_207], %578 {strides = array<i32>} : memref<8x128xf32, #tpu.memory_space<vmem>>, vector<8x128xf32>,
    return
  }
  func.func @transform_0(%arg0: i32) -> (i32, i32, i32) {
    %c0_i32 = arith.constant 0 : i32
    %c0_i32_0 = arith.constant 0 : i32
    %c0_i32_1 = arith.constant 0 : i32
    return %c0_i32, %arg0, %c0_i32_0 : i32, i32, i32
  }
  func.func @transform_1(%arg0: i32) -> (i32, i32) {
    %c0_i32 = arith.constant 0 : i32
    %c0_i32_0 = arith.constant 0 : i32
    %c0_i32_1 = arith.constant 0 : i32
    return %c0_i32, %c0_i32_0 : i32, i32
  }
  func.func @transform_2(%arg0: i32) -> (i32, i32) {
    %c0_i32 = arith.constant 0 : i32
    %c0_i32_0 = arith.constant 0 : i32
    %c0_i32_1 = arith.constant 0 : i32
    return %c0_i32, %c0_i32_0 : i32, i32
  }
  func.func @transform_3(%arg0: i32) -> (i32, i32) {
    %c0_i32 = arith.constant 0 : i32
    %c0_i32_0 = arith.constant 0 : i32
    %c0_i32_1 = arith.constant 0 : i32
    return %c0_i32, %c0_i32_0 : i32, i32
  }
  func.func @transform_4(%arg0: i32) -> (i32, i32) {
    %c0_i32 = arith.constant 0 : i32
    %c0_i32_0 = arith.constant 0 : i32
    %c0_i32_1 = arith.constant 0 : i32
    return %c0_i32, %c0_i32_0 : i32, i32
  }
  func.func @transform_5(%arg0: i32) -> (i32, i32) {
    %c0_i32 = arith.constant 0 : i32
    %c0_i32_0 = arith.constant 0 : i32
    %c0_i32_1 = arith.constant 0 : i32
    return %c0_i32, %c0_i32_0 : i32, i32
  }
  func.func @transform_6(%arg0: i32) -> (i32, i32) {
    %c0_i32 = arith.constant 0 : i32
    %c0_i32_0 = arith.constant 0 : i32
    %c0_i32_1 = arith.constant 0 : i32
    return %c0_i32, %c0_i32_0 : i32, i32
  }
  func.func @transform_7(%arg0: i32) -> (i32, i32) {
    %c0_i32 = arith.constant 0 : i32
    %c0_i32_0 = arith.constant 0 : i32
    %c0_i32_1 = arith.constant 0 : i32
    return %c0_i32, %c0_i32_0 : i32, i32
  }
  func.func @transform_8(%arg0: i32) -> (i32, i32) {
    %c0_i32 = arith.constant 0 : i32
    %c0_i32_0 = arith.constant 0 : i32
    %c0_i32_1 = arith.constant 0 : i32
    return %c0_i32, %c0_i32_0 : i32, i32
  }
  func.func @transform_9(%arg0: i32) -> (i32, i32) {
    %c0_i32 = arith.constant 0 : i32
    %c0_i32_0 = arith.constant 0 : i32
    return %arg0, %c0_i32 : i32, i32
  }
}

</mosaic_0001>

<bundles_post_ra>
// kernel: tpu_custom_call.1
= control target key start
LH: loop header
LB: loop body
LE: loop exit
PB: predicated region body
PF: predicated region fallthrough
CT: control target
= control target key end

     0   :  { %14 = vsyncpa [#allocation5], 0  ;;  %s3510_s0 = inlined_call_operand.hbm [shape: f32[8,8,128], index: 0, kind: input, shape index: {}]   ;;  %s3511_s1 = inlined_call_operand.hbm [shape: f32[128,128], index: 1, kind: input, shape index: {}]   ;;  %s3512_s2 = inlined_call_operand.hbm [shape: f32[32,128], index: 2, kind: input, shape index: {}]   ;;  %s3513_s3 = inlined_call_operand.vmem [shape: f32[1,128], index: 3, kind: input, shape index: {}]   ;;  %s3514_s4 = inlined_call_operand.hbm [shape: f32[32,128], index: 4, kind: input, shape index: {}]   ;;  %s3515_s5 = inlined_call_operand.hbm [shape: f32[32,128], index: 5, kind: input, shape index: {}]   ;;  %s3516_s6 = inlined_call_operand.vmem [shape: f32[1,128], index: 6, kind: input, shape index: {}]   ;;  %s3517_s7 = inlined_call_operand.hbm [shape: f32[32,128], index: 7, kind: input, shape index: {}]   ;;  %s3518_s8 = inlined_call_operand.vmem [shape: f32[1,128], index: 8, kind: input, shape index: {}]   ;;  %s3519_s9 = inlined_call_operand.hbm [shape: f32[8,128], index: 9, kind: output, shape index: {}]  }
   0x1   :  { %15 = vsyncpa [#allocation8], 0 }
   0x2   :  { %16 = vsyncpa [#allocation11], 0 }
   0x3   :  { %17 = vsyncpa [#allocation14], 0 }
   0x4   :  { %18 = vsyncpa [#allocation6], 0  ;;  %s3061_s30 = smov [#allocation7]   ;;  %s3062_s11 = smov [#allocation10]  }
   0x5   :  { %s36_s10 = sshll.u32 %s3061_s30, 4  ;;  %s62_s12 = sshll.u32 %s3062_s11, 4  ;;  %s37_s10 = int_to_ptr.vmem [resolvable:$true] %s36_s10  ;;  %s3125_s12 = int_to_ptr.vmem [resolvable:$true] %s62_s12 }
   0x6   :  { %s2897_s15 = scalar_lea.hbm %s3511_s1, 2048 }
   0x7   :  { %p2898_p0 = scmp.ne.s32.totalorder %s3511_s1, %s2897_s15  ;;  %p2901_p1 = scmp.lt.u32.totalorder %s2897_s15, %s3511_s1 }
   0x9   :  { %p2903_p2 = pnand %p2901_p1, %p2898_p0 }
   0xb   :  { %2906 = shalt.err (!%p2903_p2)
}
   0xc   :  { %s2907_s20 = scalar_lea.vmem %s37_s10, 2048  ;;  %p2912_p4 = scmp.lt.s32.totalorder %s37_s10, %s37_s10 }
   0xd   :  { %p2908_p3 = scmp.ne.s32.totalorder %s37_s10, %s2907_s20  ;;  %p2913_p5 = scmp.lt.s32.totalorder %s2907_s20, %s2907_s20 }
   0xf   :  { %p2914_p6 = por %p2913_p5, %p2912_p4 }
  0x11   :  { %p2915_p7 = pnand %p2914_p6, %p2908_p3 }
  0x13   :  { %2918 = shalt.err (!%p2915_p7)
}
  0x14   :  { %s3063_s21 = smov 128   ;;  %s3064_s22 = smov 8  }
  0x15   :  { %42 = dma.hbm_to_vmem [thread:$0]  %s3511_s1, 2048, %s37_s10, [#allocation8], %s3063_s21, %s3063_s21, %s3064_s22  }
  0x16   :  { %s2919_s27 = scalar_lea.hbm %s3514_s4, 512 }
  0x17   :  { %p2920_p8 = scmp.ne.s32.totalorder %s3514_s4, %s2919_s27  ;;  %p2923_p9 = scmp.lt.u32.totalorder %s2919_s27, %s3514_s4 }
  0x19   :  { %p2925_p10 = pnand %p2923_p9, %p2920_p8 }
  0x1b   :  { %2928 = shalt.err (!%p2925_p10)
}
  0x1c   :  { %s2929_s13 = scalar_lea.vmem %s3125_s12, 512  ;;  %p2934_p12 = scmp.lt.s32.totalorder %s3125_s12, %s3125_s12 }
  0x1d   :  { %p2930_p11 = scmp.ne.s32.totalorder %s3125_s12, %s2929_s13  ;;  %p2935_p13 = scmp.lt.s32.totalorder %s2929_s13, %s2929_s13 }
  0x1f   :  { %p2936_p0 = por %p2935_p13, %p2934_p12 }
  0x21   :  { %p2937_p1 = pnand %p2936_p0, %p2930_p11 }
  0x23   :  { %2940 = shalt.err (!%p2937_p1)
}
  0x24   :  { %68 = dma.hbm_to_vmem [thread:$0]  %s3514_s4, 512, %s3125_s12, [#allocation11], %s3063_s21, %s3063_s21, %s3064_s22  }
  0x25   :  { %s3065_s14 = smov [#allocation4]   ;;  %s3066_s16 = smov [#allocation9]  }
  0x26   :  { %s24_s15 = sshll.u32 %s3065_s14, 4  ;;  %s48_s17 = sshll.u32 %s3066_s16, 4  ;;  %s25_s15 = int_to_ptr.vmem [resolvable:$true] %s24_s15  ;;  %s3162_s17 = int_to_ptr.vmem [resolvable:$true] %s48_s17 }
  0x27   :  { %s2941_s20 = scalar_lea.hbm %s3510_s0, 1024 }
  0x28   :  { %p2942_p2 = scmp.ne.s32.totalorder %s3510_s0, %s2941_s20  ;;  %p2945_p3 = scmp.lt.u32.totalorder %s2941_s20, %s3510_s0 }
  0x2a   :  { %p2947_p4 = pnand %p2945_p3, %p2942_p2 }
  0x2c   :  { %2950 = shalt.err (!%p2947_p4)
}
  0x2d   :  { %s2951_s4 = scalar_lea.vmem %s25_s15, 1024  ;;  %p2956_p6 = scmp.lt.s32.totalorder %s25_s15, %s25_s15 }
  0x2e   :  { %p2952_p5 = scmp.ne.s32.totalorder %s25_s15, %s2951_s4  ;;  %p2957_p7 = scmp.lt.s32.totalorder %s2951_s4, %s2951_s4 }
  0x30   :  { %p2958_p8 = por %p2957_p7, %p2956_p6 }
  0x32   :  { %p2959_p9 = pnand %p2958_p8, %p2952_p5 }
  0x34   :  { %2962 = shalt.err (!%p2959_p9)
}
  0x35   :  { %30 = dma.hbm_to_vmem [thread:$0]  %s3510_s0, 1024, %s25_s15, [#allocation5], %s3063_s21, %s3063_s21, %s3064_s22  }
  0x36   :  { %s2963_s30 = scalar_lea.hbm %s3512_s2, 512 }
  0x37   :  { %p2964_p10 = scmp.ne.s32.totalorder %s3512_s2, %s2963_s30  ;;  %p2967_p11 = scmp.lt.u32.totalorder %s2963_s30, %s3512_s2 }
  0x39   :  { %p2969_p12 = pnand %p2967_p11, %p2964_p10 }
  0x3b   :  { %2972 = shalt.err (!%p2969_p12)
}
  0x3c   :  { %s2973_s14 = scalar_lea.vmem %s3162_s17, 512  ;;  %p2978_p0 = scmp.lt.s32.totalorder %s3162_s17, %s3162_s17 }
  0x3d   :  { %p2974_p13 = scmp.ne.s32.totalorder %s3162_s17, %s2973_s14  ;;  %p2979_p1 = scmp.lt.s32.totalorder %s2973_s14, %s2973_s14 }
  0x3f   :  { %p2980_p2 = por %p2979_p1, %p2978_p0 }
  0x41   :  { %p2981_p3 = pnand %p2980_p2, %p2974_p13 }
  0x43   :  { %2984 = shalt.err (!%p2981_p3)
}
  0x44   :  { %54 = dma.hbm_to_vmem [thread:$0]  %s3512_s2, 512, %s3162_s17, [#allocation8], %s3063_s21, %s3063_s21, %s3064_s22  }
  0x45   :  { %s3067_s16 = smov [#allocation12]   ;;  %s3068_s19 = smov [#allocation13]  }
  0x46   :  { %s74_s18 = sshll.u32 %s3067_s16, 4  ;;  %s88_s20 = sshll.u32 %s3068_s19, 4  ;;  %s75_s18 = int_to_ptr.vmem [resolvable:$true] %s74_s18  ;;  %s3199_s20 = int_to_ptr.vmem [resolvable:$true] %s88_s20 }
  0x47   :  { %s2985_s25 = scalar_lea.hbm %s3515_s5, 512 }
  0x48   :  { %p2986_p4 = scmp.ne.s32.totalorder %s3515_s5, %s2985_s25  ;;  %p2989_p5 = scmp.lt.u32.totalorder %s2985_s25, %s3515_s5 }
  0x4a   :  { %p2991_p6 = pnand %p2989_p5, %p2986_p4 }
  0x4c   :  { %2994 = shalt.err (!%p2991_p6)
}
  0x4d   :  { %s2995_s2 = scalar_lea.vmem %s75_s18, 512  ;;  %p3000_p8 = scmp.lt.s32.totalorder %s75_s18, %s75_s18 }
  0x4e   :  { %p2996_p7 = scmp.ne.s32.totalorder %s75_s18, %s2995_s2  ;;  %p3001_p9 = scmp.lt.s32.totalorder %s2995_s2, %s2995_s2 }
  0x50   :  { %p3002_p10 = por %p3001_p9, %p3000_p8 }
  0x52   :  { %p3003_p11 = pnand %p3002_p10, %p2996_p7 }
  0x54   :  { %3006 = shalt.err (!%p3003_p11)
}
  0x55   :  { %80 = dma.hbm_to_vmem [thread:$0]  %s3515_s5, 512, %s75_s18, [#allocation11], %s3063_s21, %s3063_s21, %s3064_s22  }
  0x56   :  { %s3007_s11 = scalar_lea.hbm %s3517_s7, 512 }
  0x57   :  { %p3008_p12 = scmp.ne.s32.totalorder %s3517_s7, %s3007_s11  ;;  %p3011_p13 = scmp.lt.u32.totalorder %s3007_s11, %s3517_s7 }
  0x59   :  { %p3013_p0 = pnand %p3011_p13, %p3008_p12 }
  0x5b   :  { %3016 = shalt.err (!%p3013_p0)
}
  0x5c   :  { %s3017_s0 = scalar_lea.vmem %s3199_s20, 512  ;;  %p3022_p2 = scmp.lt.s32.totalorder %s3199_s20, %s3199_s20 }
  0x5d   :  { %p3018_p1 = scmp.ne.s32.totalorder %s3199_s20, %s3017_s0  ;;  %p3023_p3 = scmp.lt.s32.totalorder %s3017_s0, %s3017_s0 }
  0x5f   :  { %p3024_p4 = por %p3023_p3, %p3022_p2 }
  0x61   :  { %p3025_p5 = pnand %p3024_p4, %p3018_p1 }
  0x63   :  { %3028 = shalt.err (!%p3025_p5)
}
  0x64   :  { %94 = dma.hbm_to_vmem [thread:$0]  %s3517_s7, 512, %s3199_s20, [#allocation14], %s3063_s21, %s3063_s21, %s3064_s22  }
  0x65   :  { %3051 = dma.done.wait [#allocation5], 1024  }
  0x66   :  { %3052 = vsyncadd [#allocation5], 4294966272 }
  0x67   :  { %3053 = dma.done.wait [#allocation8], 2560  }
  0x68   :  { %3054 = vsyncadd [#allocation8], 4294964736 }
  0x69   :  { %3055 = dma.done.wait [#allocation11], 1024  }
  0x6a   :  { %3056 = vsyncadd [#allocation11], 4294966272 }
  0x6b   :  { %3057 = dma.done.wait [#allocation14], 512  }
  0x6c   :  { %3058 = vsyncadd [#allocation14], 4294966784  ;;  %v3069_v0 = vmov 0.0|0.0   ;;  %vm3070_vm0 = vmmov 0   ;;  %v3071_v1 = vmov 0.0   ;;  %v123_v2 = vld [vmem:[#allocation7] sm:$0xff] }
  0x6d   :  { %2645 = vmatprep.subr.bf16.mxu1 %v3069_v0  ;;  %2414 = vmatprep.mubr.msk.f32.mxu1 %vm3070_vm0, %v3071_v1  ;;  %v124_v3 = vld [vmem:[#allocation7 + $0x8] sm:$0xff]  ;;  %v125_v4 = vld [vmem:[#allocation7 + $0x10] sm:$0xff]  ;;  %v126_v6 = vld [vmem:[#allocation7 + $0x18] sm:$0xff]  ;;  %s3072_s22 = smov 64   ;;  %vm264_vm1 = vcmask 261120   ;;  %s3074_s20 = smov [#allocation15]  }
  0x6e   :  { %v2613_v5 = vpack.c.bf16 %v124_v3, %v123_v2  ;;  %v2617_v7 = vpack.c.bf16 %v126_v6, %v125_v4  ;;  %v127_v8 = vld [vmem:[#allocation7 + $0x20] sm:$0xff]  ;;  %v128_v9 = vld [vmem:[#allocation7 + $0x28] sm:$0xff]  ;;  %v129_v12 = vld [vmem:[#allocation7 + $0x30] sm:$0xff]  ;;  %s2187_s23 = sshll.u32 %s3074_s20, 4  ;;  %s2188_s23 = int_to_ptr.vmem [resolvable:$true] %s2187_s23 }
  0x6f   :  { %v260_v10 = vld [vmem:[#allocation9] sm:$0xff]  ;;  %v2621_v11 = vpack.c.bf16 %v128_v9, %v127_v8  ;;  %v130_v13 = vld [vmem:[#allocation7 + $0x38] sm:$0xff]  ;;  %v261_v14 = vld [vmem:[#allocation9 + $0x8] sm:$0xff]  ;;  %s3029_s24 = scalar_lea.vmem %s2188_s23, 128  ;;  %p3034_p7 = scmp.lt.s32.totalorder %s2188_s23, %s2188_s23 }
  0x70   :  { %2614 = vmatprep.subr.bf16.mxu0 %v2613_v5  ;;  %v3239_v15 = vpack.c.bf16 %v261_v14, %v260_v10  ;;  %v115_v16 = vld [vmem:[#allocation4] sm:$0xff]  ;;  %v262_v17 = vld [vmem:[#allocation9 + $0x10] sm:$0xff]  ;;  %v263_v18 = vld [vmem:[#allocation9 + $0x18] sm:$0xff]  ;;  %v2625_v20 = vpack.c.bf16 %v130_v13, %v129_v12  ;;  %p3030_p6 = scmp.ne.s32.totalorder %s2188_s23, %s3029_s24  ;;  %p3035_p8 = scmp.lt.s32.totalorder %s3029_s24, %s3029_s24 }
  0x71   :  { %2616 = vmatpush3.bf16.msra.mxu0 %v2613_v5  ;;  %2394 = vmatprep.mubr.f32.mxu0 %v115_v16  ;;  %v3242_v19 = vpack.c.bf16 %v263_v18, %v262_v17  ;;  %v131_v21 = vld [vmem:[#allocation7 + $0x40] sm:$0xff]  ;;  %v132_v22 = vld [vmem:[#allocation7 + $0x48] sm:$0xff]  ;;  %v133_v24 = vld [vmem:[#allocation7 + $0x50] sm:$0xff] }
  0x72   :  { %2618 = vmatprep.subr.bf16.mxu0 %v2617_v7  ;;  %2647 = vmatpush3.bf16.msra.mxu1 %v3239_v15  ;;  %v2629_v23 = vpack.c.bf16 %v132_v22, %v131_v21  ;;  %v134_v25 = vld [vmem:[#allocation7 + $0x58] sm:$0xff]  ;;  %v135_v27 = vld [vmem:[#allocation7 + $0x60] sm:$0xff]  ;;  %v136_v28 = vld [vmem:[#allocation7 + $0x68] sm:$0xff]  ;;  %p3036_p9 = por %p3035_p8, %p3034_p7 }
  0x73   :  { %2648 = vmatprep.subr.bf16.mxu1 %v3069_v0  ;;  %v2633_v26 = vpack.c.bf16 %v134_v25, %v133_v24  ;;  %v2637_v29 = vpack.c.bf16 %v136_v28, %v135_v27  ;;  %v137_v30 = vld [vmem:[#allocation7 + $0x70] sm:$0xff]  ;;  %v138_v31 = vld [vmem:[#allocation7 + $0x78] sm:$0xff]  ;;  %v116_v33 = vld [vmem:[#allocation4 + $0x8] sm:$0xff] }
  0x74   :  { %v2641_v32 = vpack.c.bf16 %v138_v31, %v137_v30  ;;  %v3262_v36 = vld [vmem:[%s3513_s3] ss:$0 sm:$0xff]  ;;  %s3073_s3 = smov 32   ;;  %v118_v8 = vld [vmem:[#allocation4 + $0x18] sm:$0xff]  ;;  %p3037_p10 = pnand %p3036_p9, %p3030_p6 }
  0x75   :  { %2620 = vmatpush3.bf16.msra.mxu0 %v2617_v7  ;;  %v117_v7 = vld [vmem:[#allocation4 + $0x10] sm:$0xff] }
  0x76   :  { %2622 = vmatprep.subr.bf16.mxu0 %v2621_v11  ;;  %2650 = vmatpush3.bf16.msra.mxu1 %v3242_v19 }
  0x77   :  { %2651 = vmatprep.subr.bf16.mxu1 %v3069_v0 }
  0x79   :  { %2624 = vmatpush3.bf16.msra.mxu0 %v2621_v11  ;;  %2415 = vmatmul.mubr.f32.vlgmr.msra.gmra.mrb[0].mxu1 %v3071_v1 }
  0x7a   :  { %2626 = vmatprep.subr.bf16.mxu0 %v2625_v20  ;;  %2653 = vmatpush3.bf16.msra.mxu1 %v3239_v15 }
  0x7b   :  { %2654 = vmatprep.subr.bf16.mxu1 %v3069_v0  ;;  %2425 = vmatprep.mubr.msk.f32.mxu1 %vm3070_vm0, %v3071_v1 }
  0x7d   :  { %2628 = vmatpush3.bf16.msra.mxu0 %v2625_v20 }
  0x7e   :  { %2630 = vmatprep.subr.bf16.mxu0 %v2629_v23  ;;  %2656 = vmatpush3.bf16.msra.mxu1 %v3242_v19 }
  0x7f   :  { %2657 = vmatprep.subr.bf16.mxu1 %v3069_v0 }
  0x81   :  { %2632 = vmatpush3.bf16.msra.mxu0 %v2629_v23 }
  0x82   :  { %2634 = vmatprep.subr.bf16.mxu0 %v2633_v26 }
  0x85   :  { %2636 = vmatpush3.bf16.msra.mxu0 %v2633_v26 }
  0x86   :  { %2638 = vmatprep.subr.bf16.mxu0 %v2637_v29 }
  0x89   :  { %2640 = vmatpush3.bf16.msra.mxu0 %v2637_v29 }
  0x8a   :  { %2642 = vmatprep.subr.bf16.mxu0 %v2641_v32 }
  0x8d   :  { %2644 = vmatpush3.bf16.msra.mxu0 %v2641_v32 }
  0x8e   :  { %2675 = vmatprep.subr.bf16.mxu0 %v3069_v0 }
  0x90   :  { %2395 = vmatmul.mubr.f32.vlgmr.msra.gmra.mrb[0].mxu0 %v116_v33 }
  0x91   :  { %2677 = vmatpush3.bf16.msra.mxu0 %v3239_v15  ;;  %2397 = vmatprep.mubr.f32.mxu0 %v117_v7 }
  0x92   :  { %2678 = vmatprep.subr.bf16.mxu0 %v3069_v0 }
  0x94   :  { %2398 = vmatmul.mubr.f32.gmra.mrb[2].mxu0 %v118_v8 }
  0x95   :  { %2680 = vmatpush3.bf16.msra.mxu0 %v3242_v19 }
  0x96   :  { %2687 = vmatprep.subr.bf16.mxu0 %v3069_v0 }
 0x14c   :  { %v334_v34 = vpop.f32.mrb[0].mxu1 }
 0x14d   :  { %v2416_v35 = vpop.f32.mrb[1].mxu1 }
 0x163   :  { %v2396_v37 = vpop.f32.mrb[0].mxu0 }
 0x164   :  { %v212_v38 = vpop.f32.mrb[1].mxu0  ;;  %v218_v55 = vadd.f32 %v2396_v37, %v3262_v36 }
 0x165   :  { %v213_v39 = vadd.f32 %v3262_v36, %v212_v38 }
 0x167   :  { %v338_v40 = vadd.f32 %v334_v34, %v213_v39  ;;  %v2399_v12 = vpop.f32.mrb[2].mxu0 }
 0x168   :  { %v222_v13 = vpop.f32.mrb[3].mxu0  ;;  %v228_v35 = vadd.f32 %v2399_v12, %v3262_v36 }
 0x169   :  { %2769 = vtanh.f32 %v338_v40  ;;  %v2200_v42 = vmul.f32 -1.442695, %v338_v40  ;;  %v223_v16 = vadd.f32 %v3262_v36, %v222_v13 }
 0x16b   :  { %2771 = vpow2.f32 %v2200_v42 }
 0x173   :  { %v2770_v41 = vpop.eup %2769 }
 0x174   :  { %348 = vrot.lane.b32.xlu0 %v2770_v41, %s3072_s22 }
 0x175   :  { %v2772_v43 = vpop.eup %2771 }
 0x176   :  { %v342_v44 = vadd.f32 1.0, %v2772_v43 }
 0x178   :  { %2773 = vrcp.f32 %v342_v44 }
 0x182   :  { %v2774_v45 = vpop.eup %2773 }
 0x183   :  { %v346_v48 = vmul.f32 0.0, %v2774_v45 }
 0x1e6   :  { %v349_v46 = vpop.permute.xlu0 %348 }
 0x1e7   :  { %v351_v47 = vmul.f32 %v2774_v45, %v349_v46 }
 0x1e9   :  { %353 = vrot.lane.b32.xlu0 %v351_v47, %s3073_s3 }
 0x25b   :  { %v354_v49 = vpop.permute.xlu0 %353 }
 0x25c   :  { %v356_v50 = vadd.f32 %v354_v49, %v346_v48 }
 0x25e   :  { %2775 = vtanh.f32 %v356_v50 }
 0x268   :  { %v2776_v51 = vpop.eup %2775 }
 0x269   :  { %359 = vrot.lane.b32.xlu1 %v2776_v51, %s3072_s22  ;;  %v120_v51 = vld [vmem:[#allocation4 + $0x28] sm:$0xff] }
 0x2db   :  { %v360_v52 = vpop.permute.xlu1 %359 }
 0x2dc   :  { %v362_v53 = vmul.f32 %v2774_v45, %v360_v52 }
 0x2de   :  { %364 = vrot.lane.b32.xlu1 %v362_v53, %s3073_s3 }
 0x350   :  { %v365_v54 = vpop.permute.xlu1 %364 }
 0x351   :  { %367 = vst.msk [vmem:[#allocation3] sm:$0xff] %vm264_vm1, %v365_v54  ;;  %2426 = vmatmul.mubr.msk.f32.vlgmr.msra.gmra.mrb[2].mxu1 %vm264_vm1, %v365_v54 }
 0x352   :  { %2659 = vmatpush3.bf16.msra.mxu1 %v3239_v15  ;;  %2436 = vmatprep.mubr.msk.f32.mxu1 %vm3070_vm0, %v3071_v1 }
 0x353   :  { %2660 = vmatprep.subr.bf16.mxu1 %v3069_v0 }
 0x356   :  { %2662 = vmatpush3.bf16.msra.mxu1 %v3242_v19 }
 0x357   :  { %2663 = vmatprep.subr.bf16.mxu1 %v3069_v0 }
 0x424   :  { %v442_v56 = vpop.f32.mrb[2].mxu1 }
 0x425   :  { %v446_v57 = vadd.f32 %v442_v56, %v218_v55  ;;  %v2427_v58 = vpop.f32.mrb[3].mxu1 }
 0x427   :  { %2777 = vtanh.f32 %v446_v57  ;;  %v2202_v60 = vmul.f32 -1.442695, %v446_v57 }
 0x429   :  { %2779 = vpow2.f32 %v2202_v60 }
 0x431   :  { %v2778_v59 = vpop.eup %2777 }
 0x432   :  { %456 = vrot.lane.b32.xlu0 %v2778_v59, %s3072_s22 }
 0x433   :  { %v2780_v61 = vpop.eup %2779 }
 0x434   :  { %v450_v62 = vadd.f32 1.0, %v2780_v61 }
 0x436   :  { %2781 = vrcp.f32 %v450_v62 }
 0x440   :  { %v2782_v63 = vpop.eup %2781 }
 0x441   :  { %v454_v4 = vmul.f32 %v2782_v63, %v356_v50  ;;  %v119_v50 = vld [vmem:[#allocation4 + $0x20] sm:$0xff] }
 0x442   :  { %2400 = vmatprep.mubr.f32.mxu0 %v119_v50 }
 0x443   :  { %2401 = vmatmul.mubr.f32.gmra.mrb[4].mxu0 %v120_v51 }
 0x4a4   :  { %v457_v2 = vpop.permute.xlu0 %456 }
 0x4a5   :  { %v459_v3 = vmul.f32 %v2782_v63, %v457_v2 }
 0x4a7   :  { %461 = vrot.lane.b32.xlu1 %v459_v3, %s3073_s3 }
 0x516   :  { %v2402_v55 = vpop.f32.mrb[4].mxu0 }
 0x517   :  { %v232_v56 = vpop.f32.mrb[5].mxu0 }
 0x518   :  { %v233_v58 = vadd.f32 %v3262_v36, %v232_v56 }
 0x519   :  { %v462_v5 = vpop.permute.xlu1 %461 }
 0x51a   :  { %v464_v6 = vadd.f32 %v462_v5, %v454_v4 }
 0x51c   :  { %2783 = vtanh.f32 %v464_v6 }
 0x526   :  { %v2784_v9 = vpop.eup %2783 }
 0x527   :  { %467 = vrot.lane.b32.xlu0 %v2784_v9, %s3072_s22 }
 0x599   :  { %v468_v10 = vpop.permute.xlu0 %467 }
 0x59a   :  { %v470_v11 = vmul.f32 %v2782_v63, %v468_v10  ;;  %v121_v10 = vld [vmem:[#allocation4 + $0x30] sm:$0xff] }
 0x59b   :  { %2403 = vmatprep.mubr.f32.mxu0 %v121_v10 }
 0x59c   :  { %472 = vrot.lane.b32.xlu1 %v470_v11, %s3073_s3  ;;  %v122_v11 = vld [vmem:[#allocation4 + $0x38] sm:$0xff] }
 0x59d   :  { %2404 = vmatmul.mubr.f32.gmra.mrb[6].mxu0 %v122_v11  ;;  %v1290_v11 = vld [vmem:[#allocation12 + $0x10] sm:$0xff] }
 0x59e   :  { %2469 = vmatprep.mubr.msk.f32.mxu0 %vm3070_vm0, %v3071_v1 }
 0x60e   :  { %v473_v14 = vpop.permute.xlu1 %472 }
 0x60f   :  { %476 = vst.msk [vmem:[#allocation3 + $0x8] sm:$0xff] %vm264_vm1, %v473_v14  ;;  %2437 = vmatmul.mubr.msk.f32.vlgmr.msra.gmra.mrb[4].mxu1 %vm264_vm1, %v473_v14 }
 0x610   :  { %2665 = vmatpush3.bf16.msra.mxu1 %v3239_v15  ;;  %2447 = vmatprep.mubr.msk.f32.mxu1 %vm3070_vm0, %v3071_v1 }
 0x611   :  { %2666 = vmatprep.subr.bf16.mxu1 %v3069_v0 }
 0x614   :  { %2668 = vmatpush3.bf16.msra.mxu1 %v3242_v19 }
 0x615   :  { %2669 = vmatprep.subr.bf16.mxu1 %v3069_v0 }
 0x6e2   :  { %v551_v17 = vpop.f32.mrb[4].mxu1 }
 0x6e3   :  { %v555_v18 = vadd.f32 %v551_v17, %v223_v16  ;;  %v2438_v20 = vpop.f32.mrb[5].mxu1  ;;  %v3322_v16 = vpop.f32.mrb[6].mxu0 }
 0x6e4   :  { %v242_v17 = vpop.f32.mrb[7].mxu0  ;;  %v238_v20 = vadd.f32 %v2402_v55, %v3262_v36 }
 0x6e5   :  { %2785 = vtanh.f32 %v555_v18  ;;  %v2204_v22 = vmul.f32 -1.442695, %v555_v18 }
 0x6e7   :  { %2787 = vpow2.f32 %v2204_v22 }
 0x6ef   :  { %v2786_v21 = vpop.eup %2785 }
 0x6f0   :  { %565 = vrot.lane.b32.xlu0 %v2786_v21, %s3072_s22 }
 0x6f1   :  { %v2788_v23 = vpop.eup %2787 }
 0x6f2   :  { %v559_v24 = vadd.f32 1.0, %v2788_v23 }
 0x6f4   :  { %2789 = vrcp.f32 %v559_v24 }
 0x6fe   :  { %v2790_v25 = vpop.eup %2789 }
 0x6ff   :  { %v563_v28 = vmul.f32 %v2790_v25, %v464_v6 }
 0x762   :  { %v566_v26 = vpop.permute.xlu0 %565 }
 0x763   :  { %v568_v27 = vmul.f32 %v2790_v25, %v566_v26 }
 0x765   :  { %570 = vrot.lane.b32.xlu1 %v568_v27, %s3073_s3 }
 0x7d7   :  { %v571_v29 = vpop.permute.xlu1 %570 }
 0x7d8   :  { %v573_v30 = vadd.f32 %v571_v29, %v563_v28 }
 0x7da   :  { %2791 = vtanh.f32 %v573_v30 }
 0x7e4   :  { %v2792_v31 = vpop.eup %2791 }
 0x7e5   :  { %576 = vrot.lane.b32.xlu0 %v2792_v31, %s3072_s22 }
 0x857   :  { %v577_v32 = vpop.permute.xlu0 %576 }
 0x858   :  { %v579_v33 = vmul.f32 %v2790_v25, %v577_v32  ;;  %v1139_v32 = vld [vmem:[#allocation10] sm:$0xff] }
 0x85a   :  { %581 = vrot.lane.b32.xlu1 %v579_v33, %s3073_s3  ;;  %v1140_v33 = vld [vmem:[#allocation10 + $0x8] sm:$0xff] }
 0x8cc   :  { %v582_v34 = vpop.permute.xlu1 %581 }
 0x8cd   :  { %585 = vst.msk [vmem:[#allocation3 + $0x10] sm:$0xff] %vm264_vm1, %v582_v34  ;;  %2448 = vmatmul.mubr.msk.f32.vlgmr.msra.gmra.mrb[6].mxu1 %vm264_vm1, %v582_v34  ;;  %v2693_v34 = vpack.c.bf16 %v1140_v33, %v1139_v32 }
 0x8ce   :  { %2671 = vmatpush3.bf16.msra.mxu1 %v3239_v15  ;;  %2458 = vmatprep.mubr.msk.f32.mxu1 %vm3070_vm0, %v3071_v1 }
 0x8cf   :  { %2672 = vmatprep.subr.bf16.mxu1 %v3069_v0 }
 0x8d2   :  { %2674 = vmatpush3.bf16.msra.mxu1 %v3242_v19 }
 0x8d3   :  { %2681 = vmatprep.subr.bf16.mxu1 %v3069_v0 }
 0x9a0   :  { %v660_v37 = vpop.f32.mrb[6].mxu1 }
 0x9a1   :  { %v664_v38 = vadd.f32 %v660_v37, %v228_v35  ;;  %v2449_v39 = vpop.f32.mrb[7].mxu1 }
 0x9a2   :  { %v1141_v39 = vld [vmem:[#allocation10 + $0x10] sm:$0xff] }
 0x9a3   :  { %2793 = vtanh.f32 %v664_v38  ;;  %v2206_v41 = vmul.f32 -1.442695, %v664_v38 }
 0x9a5   :  { %2795 = vpow2.f32 %v2206_v41 }
 0x9ad   :  { %v2794_v40 = vpop.eup %2793 }
 0x9ae   :  { %674 = vrot.lane.b32.xlu0 %v2794_v40, %s3072_s22  ;;  %v1142_v40 = vld [vmem:[#allocation10 + $0x18] sm:$0xff] }
 0x9af   :  { %v2796_v42 = vpop.eup %2795  ;;  %v2697_v41 = vpack.c.bf16 %v1142_v40, %v1141_v39 }
 0x9b0   :  { %v668_v43 = vadd.f32 1.0, %v2796_v42 }
 0x9b2   :  { %2797 = vrcp.f32 %v668_v43  ;;  %v1131_v43 = vld [vmem:[#allocation3] sm:$0xff] }
 0x9bc   :  { %v2798_v44 = vpop.eup %2797 }
 0x9bd   :  { %v672_v47 = vmul.f32 %v2798_v44, %v573_v30 }
 0xa20   :  { %v675_v45 = vpop.permute.xlu0 %674 }
 0xa21   :  { %v677_v46 = vmul.f32 %v2798_v44, %v675_v45  ;;  %v1133_v45 = vld [vmem:[#allocation3 + $0x10] sm:$0xff] }
 0xa23   :  { %679 = vrot.lane.b32.xlu1 %v677_v46, %s3073_s3 }
 0xa95   :  { %v680_v48 = vpop.permute.xlu1 %679 }
 0xa96   :  { %v682_v49 = vadd.f32 %v680_v48, %v672_v47 }
 0xa98   :  { %2799 = vtanh.f32 %v682_v49 }
 0xaa2   :  { %v2800_v52 = vpop.eup %2799 }
 0xaa3   :  { %685 = vrot.lane.b32.xlu0 %v2800_v52, %s3072_s22 }
 0xb15   :  { %v686_v53 = vpop.permute.xlu0 %685 }
 0xb16   :  { %v688_v54 = vmul.f32 %v2798_v44, %v686_v53  ;;  %v1132_v44 = vld [vmem:[#allocation3 + $0x8] sm:$0xff] }
 0xb18   :  { %690 = vrot.lane.b32.xlu1 %v688_v54, %s3073_s3 }
 0xb8a   :  { %v691_v57 = vpop.permute.xlu1 %690 }
 0xb8b   :  { %694 = vst.msk [vmem:[#allocation3 + $0x18] sm:$0xff] %vm264_vm1, %v691_v57  ;;  %2459 = vmatmul.mubr.msk.f32.vlgmr.msra.gmra.mrb[8].mxu1 %vm264_vm1, %v691_v57 }
 0xb8c   :  { %2683 = vmatpush3.bf16.msra.mxu1 %v3239_v15  ;;  %2480 = vmatprep.mubr.msk.f32.mxu1 %vm3070_vm0, %v3071_v1 }
 0xb8d   :  { %2684 = vmatprep.subr.bf16.mxu1 %v3069_v0 }
 0xb90   :  { %2686 = vmatpush3.bf16.msra.mxu1 %v3242_v19 }
 0xb91   :  { %2694 = vmatprep.subr.bf16.mxu1 %v2693_v34 }
 0xb92   :  { %v1134_v46 = vld [vmem:[#allocation3 + $0x18] sm:$0xff] }
 0xc5e   :  { %v769_v59 = vpop.f32.mrb[8].mxu1 }
 0xc5f   :  { %v773_v60 = vadd.f32 %v769_v59, %v233_v58  ;;  %v2460_v61 = vpop.f32.mrb[9].mxu1 }
 0xc61   :  { %2801 = vtanh.f32 %v773_v60  ;;  %v2208_v63 = vmul.f32 -1.442695, %v773_v60 }
 0xc63   :  { %2803 = vpow2.f32 %v2208_v63 }
 0xc6b   :  { %v2802_v62 = vpop.eup %2801 }
 0xc6c   :  { %783 = vrot.lane.b32.xlu0 %v2802_v62, %s3072_s22 }
 0xc6d   :  { %v2804_v2 = vpop.eup %2803 }
 0xc6e   :  { %v777_v3 = vadd.f32 1.0, %v2804_v2 }
 0xc70   :  { %2805 = vrcp.f32 %v777_v3 }
 0xc7a   :  { %v2806_v4 = vpop.eup %2805 }
 0xc7b   :  { %v781_v7 = vmul.f32 %v2806_v4, %v682_v49  ;;  %v243_v49 = vadd.f32 %v3262_v36, %v242_v17 }
 0xcde   :  { %v784_v5 = vpop.permute.xlu0 %783 }
 0xcdf   :  { %v786_v6 = vmul.f32 %v2806_v4, %v784_v5 }
 0xce1   :  { %788 = vrot.lane.b32.xlu1 %v786_v6, %s3073_s3 }
 0xd53   :  { %v789_v8 = vpop.permute.xlu1 %788 }
 0xd54   :  { %v791_v9 = vadd.f32 %v789_v8, %v781_v7  ;;  %v1288_v8 = vld [vmem:[#allocation12] sm:$0xff] }
 0xd56   :  { %2807 = vtanh.f32 %v791_v9 }
 0xd60   :  { %v2808_v12 = vpop.eup %2807 }
 0xd61   :  { %794 = vrot.lane.b32.xlu0 %v2808_v12, %s3072_s22  ;;  %v1291_v12 = vld [vmem:[#allocation12 + $0x18] sm:$0xff] }
 0xdd3   :  { %v795_v13 = vpop.permute.xlu0 %794 }
 0xdd4   :  { %v797_v14 = vmul.f32 %v2806_v4, %v795_v13  ;;  %v3367_v13 = vpack.c.bf16 %v1291_v12, %v1290_v11 }
 0xdd6   :  { %799 = vrot.lane.b32.xlu1 %v797_v14, %s3073_s3 }
 0xe48   :  { %v800_v18 = vpop.permute.xlu1 %799 }
 0xe49   :  { %803 = vst.msk [vmem:[#allocation3 + $0x20] sm:$0xff] %vm264_vm1, %v800_v18  ;;  %2470 = vmatmul.mubr.msk.f32.vlgmr.msra.gmra.mrb[8].mxu0 %vm264_vm1, %v800_v18 }
 0xe4a   :  { %2689 = vmatpush3.bf16.msra.mxu0 %v3239_v15  ;;  %2491 = vmatprep.mubr.msk.f32.mxu0 %vm3070_vm0, %v3071_v1 }
 0xe4b   :  { %2690 = vmatprep.subr.bf16.mxu0 %v3069_v0 }
 0xe4e   :  { %2692 = vmatpush3.bf16.msra.mxu0 %v3242_v19 }
 0xe4f   :  { %2701 = vmatprep.subr.bf16.mxu0 %v3069_v0 }
 0xe50   :  { %v1135_v47 = vld [vmem:[#allocation3 + $0x20] sm:$0xff] }
 0xf1c   :  { %v878_v21 = vpop.f32.mrb[8].mxu0 }
 0xf1d   :  { %v882_v22 = vadd.f32 %v878_v21, %v238_v20  ;;  %v2471_v23 = vpop.f32.mrb[9].mxu0  ;;  %v248_v21 = vadd.f32 %v3322_v16, %v3262_v36 }
 0xf1f   :  { %2809 = vtanh.f32 %v882_v22  ;;  %v2210_v25 = vmul.f32 -1.442695, %v882_v22 }
 0xf21   :  { %2811 = vpow2.f32 %v2210_v25  ;;  %v3393_v25 = vld [vmem:[%s3516_s6] ss:$0 sm:$0xff] }
 0xf29   :  { %v2810_v24 = vpop.eup %2809 }
 0xf2a   :  { %892 = vrot.lane.b32.xlu0 %v2810_v24, %s3072_s22 }
 0xf2b   :  { %v2812_v15 = vpop.eup %2811 }
 0xf2c   :  { %v886_v26 = vadd.f32 1.0, %v2812_v15 }
 0xf2e   :  { %2813 = vrcp.f32 %v886_v26 }
 0xf38   :  { %v2814_v27 = vpop.eup %2813 }
 0xf39   :  { %v890_v19 = vmul.f32 %v2814_v27, %v791_v9  ;;  %v1289_v9 = vld [vmem:[#allocation12 + $0x8] sm:$0xff] }
 0xf3a   :  { %v3363_v10 = vpack.c.bf16 %v1289_v9, %v1288_v8 }
 0xf9c   :  { %v893_v28 = vpop.permute.xlu0 %892 }
 0xf9d   :  { %v895_v29 = vmul.f32 %v2814_v27, %v893_v28 }
 0xf9f   :  { %897 = vrot.lane.b32.xlu1 %v895_v29, %s3073_s3 }
0x1011   :  { %v898_v30 = vpop.permute.xlu1 %897 }
0x1012   :  { %v900_v31 = vadd.f32 %v898_v30, %v890_v19 }
0x1014   :  { %2815 = vtanh.f32 %v900_v31 }
0x101e   :  { %v2816_v35 = vpop.eup %2815 }
0x101f   :  { %903 = vrot.lane.b32.xlu0 %v2816_v35, %s3072_s22 }
0x1091   :  { %v904_v37 = vpop.permute.xlu0 %903 }
0x1092   :  { %v906_v38 = vmul.f32 %v2814_v27, %v904_v37 }
0x1094   :  { %908 = vrot.lane.b32.xlu1 %v906_v38, %s3073_s3 }
0x1106   :  { %v909_v42 = vpop.permute.xlu1 %908 }
0x1107   :  { %912 = vst.msk [vmem:[#allocation3 + $0x28] sm:$0xff] %vm264_vm1, %v909_v42  ;;  %2481 = vmatmul.mubr.msk.f32.vlgmr.msra.gmra.mrb[10].mxu1 %vm264_vm1, %v909_v42 }
0x1108   :  { %2696 = vmatpush3.bf16.msra.mxu1 %v2693_v34  ;;  %2502 = vmatprep.mubr.msk.f32.mxu1 %vm264_vm1, %v1131_v43 }
0x1109   :  { %2698 = vmatprep.subr.bf16.mxu1 %v2697_v41 }
0x110c   :  { %2700 = vmatpush3.bf16.msra.mxu1 %v2697_v41 }
0x110d   :  { %2713 = vmatprep.subr.bf16.mxu1 %v3069_v0 }
0x110e   :  { %v1136_v48 = vld [vmem:[#allocation3 + $0x28] sm:$0xff] }
0x110f   :  { %2503 = vmatmul.mubr.msk.f32.vlgmr.msra.gmra.mrb[12].mxu1 %vm264_vm1, %v1132_v44 }
0x1110   :  { %2505 = vmatprep.mubr.msk.f32.mxu1 %vm264_vm1, %v1133_v45  ;;  %2715 = vmatpush3.bf16.msra.mxu1 %v3363_v10 }
0x1111   :  { %2716 = vmatprep.subr.bf16.mxu1 %v3069_v0 }
0x1113   :  { %2506 = vmatmul.mubr.msk.f32.gmra.mrb[14].mxu1 %vm264_vm1, %v1134_v46 }
0x1114   :  { %2508 = vmatprep.mubr.msk.f32.mxu1 %vm264_vm1, %v1135_v47  ;;  %2718 = vmatpush3.bf16.msra.mxu1 %v3367_v13 }
0x1115   :  { %2725 = vmatprep.subr.bf16.mxu1 %v3069_v0 }
0x1117   :  { %2509 = vmatmul.mubr.msk.f32.gmra.mrb[16].mxu1 %vm264_vm1, %v1136_v48 }
0x11da   :  { %v987_v50 = vpop.f32.mrb[10].mxu1 }
0x11db   :  { %v991_v51 = vadd.f32 %v987_v50, %v243_v49  ;;  %v2482_v52 = vpop.f32.mrb[11].mxu1 }
0x11dd   :  { %2817 = vtanh.f32 %v991_v51  ;;  %v2212_v60 = vmul.f32 -1.442695, %v991_v51 }
0x11df   :  { %2819 = vpow2.f32 %v2212_v60 }
0x11e2   :  { %v3347_v53 = vpop.f32.mrb[12].mxu1 }
0x11e3   :  { %v1240_v54 = vpop.f32.mrb[13].mxu1 }
0x11e4   :  { %v1241_v15 = vadd.f32 %v3393_v25, %v1240_v54 }
0x11e6   :  { %v3349_v55 = vpop.f32.mrb[14].mxu1 }
0x11e7   :  { %v2818_v56 = vpop.eup %2817  ;;  %v3351_v57 = vpop.f32.mrb[15].mxu1 }
0x11e8   :  { %1001 = vrot.lane.b32.xlu0 %v2818_v56, %s3072_s22  ;;  %v1246_v56 = vadd.f32 %v3347_v53, %v3393_v25 }
0x11e9   :  { %v2820_v61 = vpop.eup %2819 }
0x11ea   :  { %v3354_v58 = vpop.f32.mrb[16].mxu1  ;;  %v995_v62 = vadd.f32 1.0, %v2820_v61 }
0x11eb   :  { %v3356_v59 = vpop.f32.mrb[17].mxu1 }
0x11ec   :  { %2821 = vrcp.f32 %v995_v62 }
0x11f6   :  { %v2822_v63 = vpop.eup %2821 }
0x11f7   :  { %v999_v4 = vmul.f32 %v2822_v63, %v900_v31 }
0x125a   :  { %v1002_v2 = vpop.permute.xlu0 %1001 }
0x125b   :  { %v1004_v3 = vmul.f32 %v2822_v63, %v1002_v2 }
0x125d   :  { %1006 = vrot.lane.b32.xlu1 %v1004_v3, %s3073_s3 }
0x12cf   :  { %v1007_v5 = vpop.permute.xlu1 %1006 }
0x12d0   :  { %v3359_v6 = vadd.f32 %v1007_v5, %v999_v4 }
0x12d2   :  { %2823 = vtanh.f32 %v3359_v6 }
0x12dc   :  { %v2824_v7 = vpop.eup %2823 }
0x12dd   :  { %1012 = vrot.lane.b32.xlu0 %v2824_v7, %s3072_s22 }
0x134f   :  { %v1013_v14 = vpop.permute.xlu0 %1012 }
0x1350   :  { %v1015_v17 = vmul.f32 %v2822_v63, %v1013_v14 }
0x1352   :  { %1017 = vrot.lane.b32.xlu1 %v1015_v17, %s3073_s3 }
0x13c4   :  { %v1018_v18 = vpop.permute.xlu1 %1017 }
0x13c5   :  { %1021 = vst.msk [vmem:[#allocation3 + $0x30] sm:$0xff] %vm264_vm1, %v1018_v18  ;;  %2492 = vmatmul.mubr.msk.f32.vlgmr.msra.gmra.mrb[10].mxu0 %vm264_vm1, %v1018_v18 }
0x13c6   :  { %2703 = vmatpush3.bf16.msra.mxu0 %v3363_v10  ;;  %2522 = vmatprep.mubr.msk.f32.mxu0 %vm3070_vm0, %v3071_v1 }
0x13c7   :  { %2704 = vmatprep.subr.bf16.mxu0 %v3069_v0 }
0x13ca   :  { %2706 = vmatpush3.bf16.msra.mxu0 %v3367_v13 }
0x13cb   :  { %2707 = vmatprep.subr.bf16.mxu0 %v3069_v0 }
0x13cc   :  { %v1137_v20 = vld [vmem:[#allocation3 + $0x30] sm:$0xff] }
0x13cd   :  { %2523 = vmatmul.mubr.f32.vlgmr.msra.gmra.mrb[12].mxu0 %v3071_v1  ;;  %2511 = vmatprep.mubr.msk.f32.mxu1 %vm264_vm1, %v1137_v20 }
0x13ce   :  { %2709 = vmatpush3.bf16.msra.mxu0 %v3363_v10  ;;  %2533 = vmatprep.mubr.msk.f32.mxu0 %vm3070_vm0, %v3071_v1 }
0x13cf   :  { %2710 = vmatprep.subr.bf16.mxu0 %v3069_v0 }
0x13d2   :  { %2712 = vmatpush3.bf16.msra.mxu0 %v3367_v13 }
0x13d3   :  { %2719 = vmatprep.subr.bf16.mxu0 %v3069_v0 }
0x1498   :  { %v1096_v22 = vpop.f32.mrb[10].mxu0 }
0x1499   :  { %v1100_v23 = vadd.f32 %v1096_v22, %v248_v21  ;;  %v2493_v24 = vpop.f32.mrb[11].mxu0 }
0x149b   :  { %v2214_v39 = vmul.f32 -1.442695, %v1100_v23 }
0x14a0   :  { %v1358_v26 = vpop.f32.mrb[12].mxu0 }
0x14a1   :  { %v1362_v27 = vadd.f32 %v1358_v26, %v1241_v15  ;;  %v2524_v28 = vpop.f32.mrb[13].mxu0 }
0x14a3   :  { %2825 = vtanh.f32 %v1362_v27  ;;  %v2224_v19 = vmul.f32 -1.442695, %v1362_v27 }
0x14a5   :  { %2827 = vpow2.f32 %v2224_v19 }
0x14ad   :  { %v2826_v29 = vpop.eup %2825 }
0x14ae   :  { %1372 = vrot.lane.b32.xlu0 %v2826_v29, %s3072_s22 }
0x14af   :  { %v2828_v36 = vpop.eup %2827 }
0x14b0   :  { %v1366_v16 = vadd.f32 1.0, %v2828_v36 }
0x14b2   :  { %2829 = vrcp.f32 %v1366_v16 }
0x14bc   :  { %v2830_v30 = vpop.eup %2829 }
0x14bd   :  { %v1370_v33 = vmul.f32 0.0, %v2830_v30 }
0x1520   :  { %v1373_v31 = vpop.permute.xlu0 %1372 }
0x1521   :  { %v1375_v32 = vmul.f32 %v2830_v30, %v1373_v31 }
0x1523   :  { %1377 = vrot.lane.b32.xlu1 %v1375_v32, %s3073_s3 }
0x1595   :  { %v1378_v34 = vpop.permute.xlu1 %1377 }
0x1596   :  { %v1380_v35 = vadd.f32 %v1378_v34, %v1370_v33 }
0x1598   :  { %2831 = vtanh.f32 %v1380_v35 }
0x1599   :  { %2833 = vtanh.f32 %v1100_v23  ;;  %v1251_v23 = vadd.f32 %v3393_v25, %v3351_v57 }
0x159a   :  { %2835 = vpow2.f32 %v2214_v39 }
0x15a2   :  { %v2832_v37 = vpop.eup %2831 }
0x15a3   :  { %1383 = vrot.lane.b32.xlu0 %v2832_v37, %s3072_s22  ;;  %v2834_v38 = vpop.eup %2833 }
0x15a4   :  { %v2836_v40 = vpop.eup %2835 }
0x15a5   :  { %v1104_v41 = vadd.f32 1.0, %v2836_v40 }
0x15a7   :  { %1110 = vrot.lane.b32.xlu0 %v2834_v38, %s3072_s22  ;;  %2837 = vrcp.f32 %v1104_v41  ;;  %v1256_v38 = vadd.f32 %v3349_v55, %v3393_v25 }
0x15b1   :  { %v2838_v44 = vpop.eup %2837 }
0x15b2   :  { %v1108_v48 = vmul.f32 %v2838_v44, %v3359_v6 }
0x1615   :  { %v1384_v42 = vpop.permute.xlu0 %1383 }
0x1616   :  { %v1386_v43 = vmul.f32 %v2830_v30, %v1384_v42 }
0x1618   :  { %1389 = vrot.lane.b32.xlu1 %v1386_v43, %s3073_s3 }
0x1619   :  { %v1111_v45 = vpop.permute.xlu0 %1110 }
0x161a   :  { %v1113_v46 = vmul.f32 %v2838_v44, %v1111_v45 }
0x161c   :  { %1115 = vrot.lane.b32.xlu0 %v1113_v46, %s3073_s3 }
0x168a   :  { %v1390_v47 = vpop.permute.xlu1 %1389 }
0x168b   :  { %2534 = vmatmul.mubr.msk.f32.vlgmr.msra.gmra.mrb[14].mxu0 %vm264_vm1, %v1390_v47 }
0x168c   :  { %2721 = vmatpush3.bf16.msra.mxu0 %v3363_v10  ;;  %2555 = vmatprep.mubr.msk.f32.mxu0 %vm3070_vm0, %v3071_v1 }
0x168d   :  { %2722 = vmatprep.subr.bf16.mxu0 %v3069_v0 }
0x168e   :  { %v1116_v49 = vpop.permute.xlu0 %1115 }
0x168f   :  { %v1118_v50 = vadd.f32 %v1116_v49, %v1108_v48 }
0x1690   :  { %2724 = vmatpush3.bf16.msra.mxu0 %v3367_v13 }
0x1691   :  { %2839 = vtanh.f32 %v1118_v50  ;;  %2731 = vmatprep.subr.bf16.mxu0 %v3069_v0 }
0x169b   :  { %v2840_v51 = vpop.eup %2839 }
0x169c   :  { %1121 = vrot.lane.b32.xlu0 %v2840_v51, %s3072_s22 }
0x170e   :  { %v1122_v52 = vpop.permute.xlu0 %1121 }
0x170f   :  { %v1124_v54 = vmul.f32 %v2838_v44, %v1122_v52 }
0x1711   :  { %1126 = vrot.lane.b32.xlu0 %v1124_v54, %s3073_s3 }
0x175e   :  { %v1459_v60 = vpop.f32.mrb[14].mxu0 }
0x175f   :  { %v1463_v61 = vadd.f32 %v1459_v60, %v1246_v56  ;;  %v2535_v62 = vpop.f32.mrb[15].mxu0  ;;  %v1261_v60 = vadd.f32 %v3393_v25, %v3356_v59 }
0x1761   :  { %2841 = vtanh.f32 %v1463_v61  ;;  %v2226_v4 = vmul.f32 -1.442695, %v1463_v61 }
0x1763   :  { %2843 = vpow2.f32 %v2226_v4 }
0x176b   :  { %v2842_v63 = vpop.eup %2841 }
0x176c   :  { %1473 = vrot.lane.b32.xlu1 %v2842_v63, %s3072_s22 }
0x176d   :  { %v2844_v5 = vpop.eup %2843 }
0x176e   :  { %v1467_v53 = vadd.f32 1.0, %v2844_v5 }
0x1770   :  { %2845 = vrcp.f32 %v1467_v53 }
0x177a   :  { %v2846_v6 = vpop.eup %2845 }
0x177b   :  { %v1471_v9 = vmul.f32 %v2846_v6, %v1380_v35 }
0x1783   :  { %v1127_v2 = vpop.permute.xlu0 %1126 }
0x1784   :  { %1130 = vst.msk [vmem:[#allocation3 + $0x38] sm:$0xff] %vm264_vm1, %v1127_v2 }
0x178b   :  { %v1138_v3 = vld [vmem:[#allocation3 + $0x38] sm:$0xff] }
0x178c   :  { %2512 = vmatmul.mubr.msk.f32.gmra.mrb[18].mxu1 %vm264_vm1, %v1138_v3 }
0x178d   :  { %2544 = vmatprep.mubr.msk.f32.mxu1 %vm3070_vm0, %v3071_v1 }
0x17de   :  { %v1474_v7 = vpop.permute.xlu1 %1473 }
0x17df   :  { %v1476_v8 = vmul.f32 %v2846_v6, %v1474_v7 }
0x17e1   :  { %1478 = vrot.lane.b32.xlu1 %v1476_v8, %s3073_s3 }
0x1853   :  { %v1479_v11 = vpop.permute.xlu1 %1478 }
0x1854   :  { %v1481_v12 = vadd.f32 %v1479_v11, %v1471_v9 }
0x1856   :  { %2847 = vtanh.f32 %v1481_v12 }
0x185f   :  { %v3420_v14 = vpop.f32.mrb[18].mxu1 }
0x1860   :  { %v2848_v17 = vpop.eup %2847  ;;  %v3422_v18 = vpop.f32.mrb[19].mxu1 }
0x1861   :  { %1484 = vrot.lane.b32.xlu1 %v2848_v17, %s3072_s22 }
0x18d3   :  { %v1485_v20 = vpop.permute.xlu1 %1484 }
0x18d4   :  { %v1487_v21 = vmul.f32 %v2846_v6, %v1485_v20 }
0x18d6   :  { %1490 = vrot.lane.b32.xlu1 %v1487_v21, %s3073_s3  ;;  %v1266_v21 = vadd.f32 %v3354_v58, %v3393_v25 }
0x1948   :  { %v1491_v22 = vpop.permute.xlu1 %1490 }
0x1949   :  { %2545 = vmatmul.mubr.msk.f32.vlgmr.msra.gmra.mrb[20].mxu1 %vm264_vm1, %v1491_v22 }
0x194a   :  { %2727 = vmatpush3.bf16.msra.mxu1 %v3363_v10  ;;  %2566 = vmatprep.mubr.msk.f32.mxu1 %vm3070_vm0, %v3071_v1 }
0x194b   :  { %2728 = vmatprep.subr.bf16.mxu1 %v3069_v0 }
0x194e   :  { %2730 = vmatpush3.bf16.msra.mxu1 %v3367_v13 }
0x194f   :  { %2737 = vmatprep.subr.bf16.mxu1 %v3069_v0 }
0x1a1c   :  { %v1560_v24 = vpop.f32.mrb[20].mxu1 }
0x1a1d   :  { %v1564_v15 = vadd.f32 %v1560_v24, %v1251_v23  ;;  %v2546_v26 = vpop.f32.mrb[21].mxu1 }
0x1a1f   :  { %2849 = vtanh.f32 %v1564_v15  ;;  %v2228_v28 = vmul.f32 -1.442695, %v1564_v15 }
0x1a21   :  { %2851 = vpow2.f32 %v2228_v28 }
0x1a29   :  { %v2850_v27 = vpop.eup %2849 }
0x1a2a   :  { %1574 = vrot.lane.b32.xlu0 %v2850_v27, %s3072_s22 }
0x1a2b   :  { %v2852_v29 = vpop.eup %2851 }
0x1a2c   :  { %v1568_v19 = vadd.f32 1.0, %v2852_v29 }
0x1a2e   :  { %2853 = vrcp.f32 %v1568_v19 }
0x1a38   :  { %v2854_v36 = vpop.eup %2853 }
0x1a39   :  { %v1572_v31 = vmul.f32 %v2854_v36, %v1481_v12 }
0x1a9c   :  { %v1575_v16 = vpop.permute.xlu0 %1574 }
0x1a9d   :  { %v1577_v30 = vmul.f32 %v2854_v36, %v1575_v16 }
0x1a9f   :  { %1579 = vrot.lane.b32.xlu1 %v1577_v30, %s3073_s3 }
0x1b11   :  { %v1580_v32 = vpop.permute.xlu1 %1579 }
0x1b12   :  { %v1582_v57 = vadd.f32 %v1580_v32, %v1572_v31 }
0x1b14   :  { %2855 = vtanh.f32 %v1582_v57 }
0x1b1e   :  { %v2856_v33 = vpop.eup %2855 }
0x1b1f   :  { %1585 = vrot.lane.b32.xlu0 %v2856_v33, %s3072_s22 }
0x1b91   :  { %v1586_v34 = vpop.permute.xlu0 %1585 }
0x1b92   :  { %v1588_v35 = vmul.f32 %v2854_v36, %v1586_v34 }
0x1b94   :  { %1591 = vrot.lane.b32.xlu1 %v1588_v35, %s3073_s3 }
0x1c06   :  { %v1592_v37 = vpop.permute.xlu1 %1591 }
0x1c07   :  { %2556 = vmatmul.mubr.msk.f32.vlgmr.msra.gmra.mrb[16].mxu0 %vm264_vm1, %v1592_v37 }
0x1c08   :  { %2733 = vmatpush3.bf16.msra.mxu0 %v3363_v10  ;;  %2577 = vmatprep.mubr.msk.f32.mxu0 %vm3070_vm0, %v3071_v1 }
0x1c09   :  { %2734 = vmatprep.subr.bf16.mxu0 %v3069_v0 }
0x1c0c   :  { %2736 = vmatpush3.bf16.msra.mxu0 %v3367_v13 }
0x1c0d   :  { %2743 = vmatprep.subr.bf16.mxu0 %v3069_v0 }
0x1cda   :  { %v1661_v39 = vpop.f32.mrb[16].mxu0 }
0x1cdb   :  { %v1665_v40 = vadd.f32 %v1661_v39, %v1256_v38  ;;  %v2557_v41 = vpop.f32.mrb[17].mxu0 }
0x1cdd   :  { %2857 = vtanh.f32 %v1665_v40  ;;  %v2230_v43 = vmul.f32 -1.442695, %v1665_v40 }
0x1cdf   :  { %2859 = vpow2.f32 %v2230_v43 }
0x1ce7   :  { %v2858_v42 = vpop.eup %2857 }
0x1ce8   :  { %1675 = vrot.lane.b32.xlu0 %v2858_v42, %s3072_s22 }
0x1ce9   :  { %v2860_v44 = vpop.eup %2859 }
0x1cea   :  { %v1669_v45 = vadd.f32 1.0, %v2860_v44 }
0x1cec   :  { %2861 = vrcp.f32 %v1669_v45 }
0x1cf6   :  { %v2862_v46 = vpop.eup %2861 }
0x1cf7   :  { %v1673_v49 = vmul.f32 %v2862_v46, %v1582_v57  ;;  %v1271_v57 = vadd.f32 %v3393_v25, %v3422_v18 }
0x1d5a   :  { %v1676_v47 = vpop.permute.xlu0 %1675 }
0x1d5b   :  { %v1678_v48 = vmul.f32 %v2862_v46, %v1676_v47 }
0x1d5d   :  { %1680 = vrot.lane.b32.xlu1 %v1678_v48, %s3073_s3 }
0x1dcf   :  { %v1681_v50 = vpop.permute.xlu1 %1680 }
0x1dd0   :  { %v1683_v55 = vadd.f32 %v1681_v50, %v1673_v49  ;;  %v1276_v49 = vadd.f32 %v3420_v14, %v3393_v25  ;;  %v2094_v14 = vld [vmem:[#allocation13] sm:$0xff] }
0x1dd2   :  { %2863 = vtanh.f32 %v1683_v55 }
0x1ddc   :  { %v2864_v51 = vpop.eup %2863 }
0x1ddd   :  { %1686 = vrot.lane.b32.xlu0 %v2864_v51, %s3072_s22 }
0x1e4f   :  { %v1687_v52 = vpop.permute.xlu0 %1686 }
0x1e50   :  { %v1689_v54 = vmul.f32 %v2862_v46, %v1687_v52 }
0x1e52   :  { %1692 = vrot.lane.b32.xlu1 %v1689_v54, %s3073_s3 }
0x1ec4   :  { %v1693_v56 = vpop.permute.xlu1 %1692 }
0x1ec5   :  { %2567 = vmatmul.mubr.msk.f32.vlgmr.msra.gmra.mrb[22].mxu1 %vm264_vm1, %v1693_v56 }
0x1ec6   :  { %2739 = vmatpush3.bf16.msra.mxu1 %v3363_v10  ;;  %2588 = vmatprep.mubr.msk.f32.mxu1 %vm3070_vm0, %v3071_v1 }
0x1ec7   :  { %2740 = vmatprep.subr.bf16.mxu1 %v3069_v0 }
0x1eca   :  { %2742 = vmatpush3.bf16.msra.mxu1 %v3367_v13 }
0x1ecb   :  { %2749 = vmatprep.subr.bf16.mxu1 %v3069_v0 }
0x1f98   :  { %v1762_v61 = vpop.f32.mrb[22].mxu1 }
0x1f99   :  { %v1766_v62 = vadd.f32 %v1762_v61, %v1261_v60  ;;  %v2568_v63 = vpop.f32.mrb[23].mxu1 }
0x1f9b   :  { %2865 = vtanh.f32 %v1766_v62  ;;  %v2232_v3 = vmul.f32 -1.442695, %v1766_v62 }
0x1f9d   :  { %2867 = vpow2.f32 %v2232_v3 }
0x1fa5   :  { %v2866_v2 = vpop.eup %2865 }
0x1fa6   :  { %1776 = vrot.lane.b32.xlu0 %v2866_v2, %s3072_s22 }
0x1fa7   :  { %v2868_v4 = vpop.eup %2867 }
0x1fa8   :  { %v1770_v5 = vadd.f32 1.0, %v2868_v4  ;;  %v2095_v4 = vld [vmem:[#allocation13 + $0x8] sm:$0xff] }
0x1faa   :  { %2869 = vrcp.f32 %v1770_v5  ;;  %v2096_v5 = vld [vmem:[#allocation13 + $0x10] sm:$0xff] }
0x1fb4   :  { %v2870_v53 = vpop.eup %2869 }
0x1fb5   :  { %v1774_v8 = vmul.f32 %v2870_v53, %v1683_v55 }
0x2018   :  { %v1777_v6 = vpop.permute.xlu0 %1776 }
0x2019   :  { %v1779_v7 = vmul.f32 %v2870_v53, %v1777_v6  ;;  %v2097_v6 = vld [vmem:[#allocation13 + $0x18] sm:$0xff] }
0x201b   :  { %1781 = vrot.lane.b32.xlu1 %v1779_v7, %s3073_s3  ;;  %v2753_v7 = vpack.c.bf16 %v2097_v6, %v2096_v5 }
0x208d   :  { %v1782_v9 = vpop.permute.xlu1 %1781 }
0x208e   :  { %v1784_v59 = vadd.f32 %v1782_v9, %v1774_v8 }
0x2090   :  { %2871 = vtanh.f32 %v1784_v59 }
0x209a   :  { %v2872_v11 = vpop.eup %2871 }
0x209b   :  { %1787 = vrot.lane.b32.xlu0 %v2872_v11, %s3072_s22 }
0x210d   :  { %v1788_v12 = vpop.permute.xlu0 %1787 }
0x210e   :  { %v1790_v17 = vmul.f32 %v2870_v53, %v1788_v12  ;;  %v2750_v53 = vpack.c.bf16 %v2095_v4, %v2094_v14  ;;  %v2239_v12 = vld [vmem:[%s3518_s8] ss:$0 sm:$0xff] }
0x2110   :  { %1793 = vrot.lane.b32.xlu1 %v1790_v17, %s3073_s3 }
0x2182   :  { %v1794_v20 = vpop.permute.xlu1 %1793 }
0x2183   :  { %2578 = vmatmul.mubr.msk.f32.vlgmr.msra.gmra.mrb[18].mxu0 %vm264_vm1, %v1794_v20 }
0x2184   :  { %2745 = vmatpush3.bf16.msra.mxu0 %v3363_v10  ;;  %2599 = vmatprep.mubr.msk.f32.mxu0 %vm3070_vm0, %v3071_v1 }
0x2185   :  { %2746 = vmatprep.subr.bf16.mxu0 %v3069_v0 }
0x2188   :  { %2748 = vmatpush3.bf16.msra.mxu0 %v3367_v13 }
0x2256   :  { %v1863_v22 = vpop.f32.mrb[18].mxu0 }
0x2257   :  { %v1867_v23 = vadd.f32 %v1863_v22, %v1266_v21  ;;  %v2579_v24 = vpop.f32.mrb[19].mxu0 }
0x2259   :  { %2873 = vtanh.f32 %v1867_v23  ;;  %v2234_v26 = vmul.f32 -1.442695, %v1867_v23 }
0x225b   :  { %2875 = vpow2.f32 %v2234_v26 }
0x2263   :  { %v2874_v15 = vpop.eup %2873 }
0x2264   :  { %1877 = vrot.lane.b32.xlu0 %v2874_v15, %s3072_s22 }
0x2265   :  { %v2876_v10 = vpop.eup %2875 }
0x2266   :  { %v1871_v27 = vadd.f32 1.0, %v2876_v10 }
0x2268   :  { %2877 = vrcp.f32 %v1871_v27 }
0x2272   :  { %v2878_v28 = vpop.eup %2877 }
0x2273   :  { %v1875_v13 = vmul.f32 %v2878_v28, %v1784_v59 }
0x22d6   :  { %v1878_v29 = vpop.permute.xlu0 %1877 }
0x22d7   :  { %v1880_v19 = vmul.f32 %v2878_v28, %v1878_v29 }
0x22d9   :  { %1882 = vrot.lane.b32.xlu1 %v1880_v19, %s3073_s3 }
0x234b   :  { %v1883_v36 = vpop.permute.xlu1 %1882 }
0x234c   :  { %v1885_v58 = vadd.f32 %v1883_v36, %v1875_v13 }
0x234e   :  { %2879 = vtanh.f32 %v1885_v58 }
0x2358   :  { %v2880_v16 = vpop.eup %2879 }
0x2359   :  { %1888 = vrot.lane.b32.xlu0 %v2880_v16, %s3072_s22 }
0x23cb   :  { %v1889_v30 = vpop.permute.xlu0 %1888 }
0x23cc   :  { %v1891_v31 = vmul.f32 %v2878_v28, %v1889_v30 }
0x23ce   :  { %1894 = vrot.lane.b32.xlu1 %v1891_v31, %s3073_s3 }
0x2440   :  { %v1895_v32 = vpop.permute.xlu1 %1894 }
0x2441   :  { %2589 = vmatmul.mubr.msk.f32.vlgmr.msra.gmra.mrb[24].mxu1 %vm264_vm1, %v1895_v32 }
0x2442   :  { %2610 = vmatprep.mubr.msk.f32.mxu1 %vm3070_vm0, %v3071_v1  ;;  %2751 = vmatpush3.bf16.msra.mxu1 %v2750_v53 }
0x2443   :  { %2752 = vmatprep.subr.bf16.mxu1 %v3069_v0 }
0x2446   :  { %2754 = vmatpush3.bf16.msra.mxu1 %v2753_v7 }
0x2514   :  { %v1964_v33 = vpop.f32.mrb[24].mxu1 }
0x2515   :  { %v1968_v34 = vadd.f32 %v1964_v33, %v1271_v57  ;;  %v2590_v35 = vpop.f32.mrb[25].mxu1 }
0x2517   :  { %2881 = vtanh.f32 %v1968_v34  ;;  %v2236_v38 = vmul.f32 -1.442695, %v1968_v34 }
0x2519   :  { %2883 = vpow2.f32 %v2236_v38 }
0x2521   :  { %v2882_v37 = vpop.eup %2881 }
0x2522   :  { %1978 = vrot.lane.b32.xlu0 %v2882_v37, %s3072_s22 }
0x2523   :  { %v2884_v39 = vpop.eup %2883 }
0x2524   :  { %v1972_v40 = vadd.f32 1.0, %v2884_v39 }
0x2526   :  { %2885 = vrcp.f32 %v1972_v40 }
0x2530   :  { %v2886_v41 = vpop.eup %2885 }
0x2531   :  { %v1976_v1 = vmul.f32 %v2886_v41, %v1885_v58 }
0x2594   :  { %v1979_v42 = vpop.permute.xlu0 %1978 }
0x2595   :  { %v1981_v43 = vmul.f32 %v2886_v41, %v1979_v42 }
0x2597   :  { %1983 = vrot.lane.b32.xlu1 %v1981_v43, %s3073_s3 }
0x2609   :  { %v1984_v44 = vpop.permute.xlu1 %1983 }
0x260a   :  { %v1986_v18 = vadd.f32 %v1984_v44, %v1976_v1 }
0x260c   :  { %2887 = vtanh.f32 %v1986_v18 }
0x2616   :  { %v2888_v45 = vpop.eup %2887 }
0x2617   :  { %1989 = vrot.lane.b32.xlu0 %v2888_v45, %s3072_s22 }
0x2689   :  { %v1990_v46 = vpop.permute.xlu0 %1989 }
0x268a   :  { %v1992_v47 = vmul.f32 %v2886_v41, %v1990_v46 }
0x268c   :  { %1995 = vrot.lane.b32.xlu1 %v1992_v47, %s3073_s3 }
0x26fe   :  { %v1996_v48 = vpop.permute.xlu1 %1995 }
0x26ff   :  { %2600 = vmatmul.mubr.msk.f32.vlgmr.msra.gmra.mrb[20].mxu0 %vm264_vm1, %v1996_v48 }
0x27d2   :  { %v2065_v50 = vpop.f32.mrb[20].mxu0 }
0x27d3   :  { %v2069_v55 = vadd.f32 %v2065_v50, %v1276_v49  ;;  %v2601_v51 = vpop.f32.mrb[21].mxu0 }
0x27d5   :  { %2889 = vtanh.f32 %v2069_v55  ;;  %v2238_v54 = vmul.f32 -1.442695, %v2069_v55 }
0x27d7   :  { %2891 = vpow2.f32 %v2238_v54 }
0x27df   :  { %v2890_v52 = vpop.eup %2889 }
0x27e0   :  { %2079 = vrot.lane.b32.xlu0 %v2890_v52, %s3072_s22 }
0x27e1   :  { %v2892_v56 = vpop.eup %2891 }
0x27e2   :  { %v2073_v60 = vadd.f32 1.0, %v2892_v56 }
0x27e4   :  { %2893 = vrcp.f32 %v2073_v60 }
0x27ee   :  { %v2894_v61 = vpop.eup %2893 }
0x27ef   :  { %v2077_v2 = vmul.f32 %v2894_v61, %v1986_v18 }
0x2852   :  { %v2080_v62 = vpop.permute.xlu0 %2079 }
0x2853   :  { %v2082_v63 = vmul.f32 %v2894_v61, %v2080_v62 }
0x2855   :  { %2084 = vrot.lane.b32.xlu1 %v2082_v63, %s3073_s3 }
0x28c7   :  { %v2085_v3 = vpop.permute.xlu1 %2084 }
0x28c8   :  { %v2087_v25 = vadd.f32 %v2085_v3, %v2077_v2 }
0x28ca   :  { %2895 = vtanh.f32 %v2087_v25 }
0x28d4   :  { %v2896_v8 = vpop.eup %2895 }
0x28d5   :  { %2090 = vrot.lane.b32.xlu0 %v2896_v8, %s3072_s22 }
0x2947   :  { %v2091_v9 = vpop.permute.xlu0 %2090 }
0x2948   :  { %v2093_v59 = vmul.f32 %v2894_v61, %v2091_v9 }
0x294a   :  { %2106 = vrot.lane.b32.xlu1 %v2093_v59, %s3073_s3 }
0x29bc   :  { %v2107_v11 = vpop.permute.xlu1 %2106 }
0x29bd   :  { %2611 = vmatmul.mubr.msk.f32.vlgmr.msra.gmra.mrb[26].mxu1 %vm264_vm1, %v2107_v11 }
0x2a90   :  { %v2176_v17 = vpop.f32.mrb[26].mxu1 }
0x2a91   :  { %v2177_v20 = vadd.f32 %v2239_v12, %v2176_v17  ;;  %v2612_v0 = vpop.f32.mrb[27].mxu1 }
0x2a93   :  { %2180 = vst [vmem:[#allocation15] sm:$0xff] %v2177_v20 }
0x2a94   :  { %3040 = shalt.err (!%p3037_p10)
}
0x2a95   :  { %s3041_s4 = scalar_lea.hbm %s3519_s9, 128 }
0x2a96   :  { %p3042_p11 = scmp.ne.s32.totalorder %s3519_s9, %s3041_s4  ;;  %p3045_p12 = scmp.lt.u32.totalorder %s3041_s4, %s3519_s9 }
0x2a98   :  { %p3047_p13 = pnand %p3045_p12, %p3042_p11 }
0x2a9a   :  { %3050 = shalt.err (!%p3047_p13)
}
0x2a9b   :  { %2190 = dma.vmem_to_hbm [thread:$0]  %s2188_s23, 128, %s3519_s9, [#allocation6]  }
0x2a9c   :  { %3059 = dma.done.wait [#allocation6], 128  }
0x2a9d   :  { %3060 = vsyncadd [#allocation6], 4294967168 }
0x2a9e   :  { %2194 = vsyncpa [#allocation5], 1 }
0x2a9f   :  { %2195 = vsyncpa [#allocation8], 1 }
0x2aa0   :  { %2196 = vsyncpa [#allocation11], 1 }
0x2aa1   :  { %2197 = vsyncpa [#allocation14], 1 }
0x2aa2   :  { %2198 = vsyncpa [#allocation6], 1 }

// kernel: tpu_custom_call.1
= control target key start
LH: loop header
LB: loop body
LE: loop exit
PB: predicated region body
PF: predicated region fallthrough
CT: control target
= control target key end

     0   :  { %14 = vsyncpa [#allocation5], 0  ;;  %s3510_s0 = inlined_call_operand.hbm [shape: f32[8,8,128], index: 0, kind: input, shape index: {}]   ;;  %s3511_s1 = inlined_call_operand.hbm [shape: f32[128,128], index: 1, kind: input, shape index: {}]   ;;  %s3512_s2 = inlined_call_operand.hbm [shape: f32[32,128], index: 2, kind: input, shape index: {}]   ;;  %s3513_s3 = inlined_call_operand.vmem [shape: f32[1,128], index: 3, kind: input, shape index: {}]   ;;  %s3514_s4 = inlined_call_operand.hbm [shape: f32[32,128], index: 4, kind: input, shape index: {}]   ;;  %s3515_s5 = inlined_call_operand.hbm [shape: f32[32,128], index: 5, kind: input, shape index: {}]   ;;  %s3516_s6 = inlined_call_operand.vmem [shape: f32[1,128], index: 6, kind: input, shape index: {}]   ;;  %s3517_s7 = inlined_call_operand.hbm [shape: f32[32,128], index: 7, kind: input, shape index: {}]   ;;  %s3518_s8 = inlined_call_operand.vmem [shape: f32[1,128], index: 8, kind: input, shape index: {}]   ;;  %s3519_s9 = inlined_call_operand.hbm [shape: f32[8,128], index: 9, kind: output, shape index: {}]  }
   0x1   :  { %15 = vsyncpa [#allocation8], 0 }
   0x2   :  { %16 = vsyncpa [#allocation11], 0 }
   0x3   :  { %17 = vsyncpa [#allocation14], 0 }
   0x4   :  { %18 = vsyncpa [#allocation6], 0  ;;  %s3061_s30 = smov [#allocation7]   ;;  %s3062_s11 = smov [#allocation10]  }
   0x5   :  { %s36_s10 = sshll.u32 %s3061_s30, 4  ;;  %s62_s12 = sshll.u32 %s3062_s11, 4  ;;  %s37_s10 = int_to_ptr.vmem [resolvable:$true] %s36_s10  ;;  %s3125_s12 = int_to_ptr.vmem [resolvable:$true] %s62_s12 }
   0x6   :  { %s2897_s15 = scalar_lea.hbm %s3511_s1, 2048 }
   0x7   :  { %p2898_p0 = scmp.ne.s32.totalorder %s3511_s1, %s2897_s15  ;;  %p2901_p1 = scmp.lt.u32.totalorder %s2897_s15, %s3511_s1 }
   0x9   :  { %p2903_p2 = pnand %p2901_p1, %p2898_p0 }
   0xb   :  { %2906 = shalt.err (!%p2903_p2)
}
   0xc   :  { %s2907_s20 = scalar_lea.vmem %s37_s10, 2048  ;;  %p2912_p4 = scmp.lt.s32.totalorder %s37_s10, %s37_s10 }
   0xd   :  { %p2908_p3 = scmp.ne.s32.totalorder %s37_s10, %s2907_s20  ;;  %p2913_p5 = scmp.lt.s32.totalorder %s2907_s20, %s2907_s20 }
   0xf   :  { %p2914_p6 = por %p2913_p5, %p2912_p4 }
  0x11   :  { %p2915_p7 = pnand %p2914_p6, %p2908_p3 }
  0x13   :  { %2918 = shalt.err (!%p2915_p7)
}
  0x14   :  { %s3063_s21 = smov 128   ;;  %s3064_s22 = smov 8  }
  0x15   :  { %42 = dma.hbm_to_vmem [thread:$0]  %s3511_s1, 2048, %s37_s10, [#allocation8], %s3063_s21, %s3063_s21, %s3064_s22  }
  0x16   :  { %s2919_s27 = scalar_lea.hbm %s3514_s4, 512 }
  0x17   :  { %p2920_p8 = scmp.ne.s32.totalorder %s3514_s4, %s2919_s27  ;;  %p2923_p9 = scmp.lt.u32.totalorder %s2919_s27, %s3514_s4 }
  0x19   :  { %p2925_p10 = pnand %p2923_p9, %p2920_p8 }
  0x1b   :  { %2928 = shalt.err (!%p2925_p10)
}
  0x1c   :  { %s2929_s13 = scalar_lea.vmem %s3125_s12, 512  ;;  %p2934_p12 = scmp.lt.s32.totalorder %s3125_s12, %s3125_s12 }
  0x1d   :  { %p2930_p11 = scmp.ne.s32.totalorder %s3125_s12, %s2929_s13  ;;  %p2935_p13 = scmp.lt.s32.totalorder %s2929_s13, %s2929_s13 }
  0x1f   :  { %p2936_p0 = por %p2935_p13, %p2934_p12 }
  0x21   :  { %p2937_p1 = pnand %p2936_p0, %p2930_p11 }
  0x23   :  { %2940 = shalt.err (!%p2937_p1)
}
  0x24   :  { %68 = dma.hbm_to_vmem [thread:$0]  %s3514_s4, 512, %s3125_s12, [#allocation11], %s3063_s21, %s3063_s21, %s3064_s22  }
  0x25   :  { %s3065_s14 = smov [#allocation4]   ;;  %s3066_s16 = smov [#allocation9]  }
  0x26   :  { %s24_s15 = sshll.u32 %s3065_s14, 4  ;;  %s48_s17 = sshll.u32 %s3066_s16, 4  ;;  %s25_s15 = int_to_ptr.vmem [resolvable:$true] %s24_s15  ;;  %s3162_s17 = int_to_ptr.vmem [resolvable:$true] %s48_s17 }
  0x27   :  { %s2941_s20 = scalar_lea.hbm %s3510_s0, 1024 }
  0x28   :  { %p2942_p2 = scmp.ne.s32.totalorder %s3510_s0, %s2941_s20  ;;  %p2945_p3 = scmp.lt.u32.totalorder %s2941_s20, %s3510_s0 }
  0x2a   :  { %p2947_p4 = pnand %p2945_p3, %p2942_p2 }
  0x2c   :  { %2950 = shalt.err (!%p2947_p4)
}
  0x2d   :  { %s2951_s4 = scalar_lea.vmem %s25_s15, 1024  ;;  %p2956_p6 = scmp.lt.s32.totalorder %s25_s15, %s25_s15 }
  0x2e   :  { %p2952_p5 = scmp.ne.s32.totalorder %s25_s15, %s2951_s4  ;;  %p2957_p7 = scmp.lt.s32.totalorder %s2951_s4, %s2951_s4 }
  0x30   :  { %p2958_p8 = por %p2957_p7, %p2956_p6 }
  0x32   :  { %p2959_p9 = pnand %p2958_p8, %p2952_p5 }
  0x34   :  { %2962 = shalt.err (!%p2959_p9)
}
  0x35   :  { %30 = dma.hbm_to_vmem [thread:$0]  %s3510_s0, 1024, %s25_s15, [#allocation5], %s3063_s21, %s3063_s21, %s3064_s22  }
  0x36   :  { %s2963_s30 = scalar_lea.hbm %s3512_s2, 512 }
  0x37   :  { %p2964_p10 = scmp.ne.s32.totalorder %s3512_s2, %s2963_s30  ;;  %p2967_p11 = scmp.lt.u32.totalorder %s2963_s30, %s3512_s2 }
  0x39   :  { %p2969_p12 = pnand %p2967_p11, %p2964_p10 }
  0x3b   :  { %2972 = shalt.err (!%p2969_p12)
}
  0x3c   :  { %s2973_s14 = scalar_lea.vmem %s3162_s17, 512  ;;  %p2978_p0 = scmp.lt.s32.totalorder %s3162_s17, %s3162_s17 }
  0x3d   :  { %p2974_p13 = scmp.ne.s32.totalorder %s3162_s17, %s2973_s14  ;;  %p2979_p1 = scmp.lt.s32.totalorder %s2973_s14, %s2973_s14 }
  0x3f   :  { %p2980_p2 = por %p2979_p1, %p2978_p0 }
  0x41   :  { %p2981_p3 = pnand %p2980_p2, %p2974_p13 }
  0x43   :  { %2984 = shalt.err (!%p2981_p3)
}
  0x44   :  { %54 = dma.hbm_to_vmem [thread:$0]  %s3512_s2, 512, %s3162_s17, [#allocation8], %s3063_s21, %s3063_s21, %s3064_s22  }
  0x45   :  { %s3067_s16 = smov [#allocation12]   ;;  %s3068_s19 = smov [#allocation13]  }
  0x46   :  { %s74_s18 = sshll.u32 %s3067_s16, 4  ;;  %s88_s20 = sshll.u32 %s3068_s19, 4  ;;  %s75_s18 = int_to_ptr.vmem [resolvable:$true] %s74_s18  ;;  %s3199_s20 = int_to_ptr.vmem [resolvable:$true] %s88_s20 }
  0x47   :  { %s2985_s25 = scalar_lea.hbm %s3515_s5, 512 }
  0x48   :  { %p2986_p4 = scmp.ne.s32.totalorder %s3515_s5, %s2985_s25  ;;  %p2989_p5 = scmp.lt.u32.totalorder %s2985_s25, %s3515_s5 }
  0x4a   :  { %p2991_p6 = pnand %p2989_p5, %p2986_p4 }
  0x4c   :  { %2994 = shalt.err (!%p2991_p6)
}
  0x4d   :  { %s2995_s2 = scalar_lea.vmem %s75_s18, 512  ;;  %p3000_p8 = scmp.lt.s32.totalorder %s75_s18, %s75_s18 }
  0x4e   :  { %p2996_p7 = scmp.ne.s32.totalorder %s75_s18, %s2995_s2  ;;  %p3001_p9 = scmp.lt.s32.totalorder %s2995_s2, %s2995_s2 }
  0x50   :  { %p3002_p10 = por %p3001_p9, %p3000_p8 }
  0x52   :  { %p3003_p11 = pnand %p3002_p10, %p2996_p7 }
  0x54   :  { %3006 = shalt.err (!%p3003_p11)
}
  0x55   :  { %80 = dma.hbm_to_vmem [thread:$0]  %s3515_s5, 512, %s75_s18, [#allocation11], %s3063_s21, %s3063_s21, %s3064_s22  }
  0x56   :  { %s3007_s11 = scalar_lea.hbm %s3517_s7, 512 }
  0x57   :  { %p3008_p12 = scmp.ne.s32.totalorder %s3517_s7, %s3007_s11  ;;  %p3011_p13 = scmp.lt.u32.totalorder %s3007_s11, %s3517_s7 }
  0x59   :  { %p3013_p0 = pnand %p3011_p13, %p3008_p12 }
  0x5b   :  { %3016 = shalt.err (!%p3013_p0)
}
  0x5c   :  { %s3017_s0 = scalar_lea.vmem %s3199_s20, 512  ;;  %p3022_p2 = scmp.lt.s32.totalorder %s3199_s20, %s3199_s20 }
  0x5d   :  { %p3018_p1 = scmp.ne.s32.totalorder %s3199_s20, %s3017_s0  ;;  %p3023_p3 = scmp.lt.s32.totalorder %s3017_s0, %s3017_s0 }
  0x5f   :  { %p3024_p4 = por %p3023_p3, %p3022_p2 }
  0x61   :  { %p3025_p5 = pnand %p3024_p4, %p3018_p1 }
  0x63   :  { %3028 = shalt.err (!%p3025_p5)
}
  0x64   :  { %94 = dma.hbm_to_vmem [thread:$0]  %s3517_s7, 512, %s3199_s20, [#allocation14], %s3063_s21, %s3063_s21, %s3064_s22  }
  0x65   :  { %3051 = dma.done.wait [#allocation5], 1024  }
  0x66   :  { %3052 = vsyncadd [#allocation5], 4294966272 }
  0x67   :  { %3053 = dma.done.wait [#allocation8], 2560  }
  0x68   :  { %3054 = vsyncadd [#allocation8], 4294964736 }
  0x69   :  { %3055 = dma.done.wait [#allocation11], 1024  }
  0x6a   :  { %3056 = vsyncadd [#allocation11], 4294966272 }
  0x6b   :  { %3057 = dma.done.wait [#allocation14], 512  }
  0x6c   :  { %3058 = vsyncadd [#allocation14], 4294966784  ;;  %v3069_v0 = vmov 0.0|0.0   ;;  %vm3070_vm0 = vmmov 0   ;;  %v3071_v1 = vmov 0.0   ;;  %v123_v2 = vld [vmem:[#allocation7] sm:$0xff] }
  0x6d   :  { %2645 = vmatprep.subr.bf16.mxu1 %v3069_v0  ;;  %2414 = vmatprep.mubr.msk.f32.mxu1 %vm3070_vm0, %v3071_v1  ;;  %v124_v3 = vld [vmem:[#allocation7 + $0x8] sm:$0xff]  ;;  %v125_v4 = vld [vmem:[#allocation7 + $0x10] sm:$0xff]  ;;  %v126_v6 = vld [vmem:[#allocation7 + $0x18] sm:$0xff]  ;;  %s3072_s22 = smov 64   ;;  %vm264_vm1 = vcmask 261120   ;;  %s3074_s20 = smov [#allocation15]  }
  0x6e   :  { %v2613_v5 = vpack.c.bf16 %v124_v3, %v123_v2  ;;  %v2617_v7 = vpack.c.bf16 %v126_v6, %v125_v4  ;;  %v127_v8 = vld [vmem:[#allocation7 + $0x20] sm:$0xff]  ;;  %v128_v9 = vld [vmem:[#allocation7 + $0x28] sm:$0xff]  ;;  %v129_v12 = vld [vmem:[#allocation7 + $0x30] sm:$0xff]  ;;  %s2187_s23 = sshll.u32 %s3074_s20, 4  ;;  %s2188_s23 = int_to_ptr.vmem [resolvable:$true] %s2187_s23 }
  0x6f   :  { %v260_v10 = vld [vmem:[#allocation9] sm:$0xff]  ;;  %v2621_v11 = vpack.c.bf16 %v128_v9, %v127_v8  ;;  %v130_v13 = vld [vmem:[#allocation7 + $0x38] sm:$0xff]  ;;  %v261_v14 = vld [vmem:[#allocation9 + $0x8] sm:$0xff]  ;;  %s3029_s24 = scalar_lea.vmem %s2188_s23, 128  ;;  %p3034_p7 = scmp.lt.s32.totalorder %s2188_s23, %s2188_s23 }
  0x70   :  { %2614 = vmatprep.subr.bf16.mxu0 %v2613_v5  ;;  %v3239_v15 = vpack.c.bf16 %v261_v14, %v260_v10  ;;  %v115_v16 = vld [vmem:[#allocation4] sm:$0xff]  ;;  %v262_v17 = vld [vmem:[#allocation9 + $0x10] sm:$0xff]  ;;  %v263_v18 = vld [vmem:[#allocation9 + $0x18] sm:$0xff]  ;;  %v2625_v20 = vpack.c.bf16 %v130_v13, %v129_v12  ;;  %p3030_p6 = scmp.ne.s32.totalorder %s2188_s23, %s3029_s24  ;;  %p3035_p8 = scmp.lt.s32.totalorder %s3029_s24, %s3029_s24 }
  0x71   :  { %2616 = vmatpush3.bf16.msra.mxu0 %v2613_v5  ;;  %2394 = vmatprep.mubr.f32.mxu0 %v115_v16  ;;  %v3242_v19 = vpack.c.bf16 %v263_v18, %v262_v17  ;;  %v131_v21 = vld [vmem:[#allocation7 + $0x40] sm:$0xff]  ;;  %v132_v22 = vld [vmem:[#allocation7 + $0x48] sm:$0xff]  ;;  %v133_v24 = vld [vmem:[#allocation7 + $0x50] sm:$0xff] }
  0x72   :  { %2618 = vmatprep.subr.bf16.mxu0 %v2617_v7  ;;  %2647 = vmatpush3.bf16.msra.mxu1 %v3239_v15  ;;  %v2629_v23 = vpack.c.bf16 %v132_v22, %v131_v21  ;;  %v134_v25 = vld [vmem:[#allocation7 + $0x58] sm:$0xff]  ;;  %v135_v27 = vld [vmem:[#allocation7 + $0x60] sm:$0xff]  ;;  %v136_v28 = vld [vmem:[#allocation7 + $0x68] sm:$0xff]  ;;  %p3036_p9 = por %p3035_p8, %p3034_p7 }
  0x73   :  { %2648 = vmatprep.subr.bf16.mxu1 %v3069_v0  ;;  %v2633_v26 = vpack.c.bf16 %v134_v25, %v133_v24  ;;  %v2637_v29 = vpack.c.bf16 %v136_v28, %v135_v27  ;;  %v137_v30 = vld [vmem:[#allocation7 + $0x70] sm:$0xff]  ;;  %v138_v31 = vld [vmem:[#allocation7 + $0x78] sm:$0xff]  ;;  %v116_v33 = vld [vmem:[#allocation4 + $0x8] sm:$0xff] }
  0x74   :  { %v2641_v32 = vpack.c.bf16 %v138_v31, %v137_v30  ;;  %v3262_v36 = vld [vmem:[%s3513_s3] ss:$0 sm:$0xff]  ;;  %s3073_s3 = smov 32   ;;  %v118_v8 = vld [vmem:[#allocation4 + $0x18] sm:$0xff]  ;;  %p3037_p10 = pnand %p3036_p9, %p3030_p6 }
  0x75   :  { %2620 = vmatpush3.bf16.msra.mxu0 %v2617_v7  ;;  %v117_v7 = vld [vmem:[#allocation4 + $0x10] sm:$0xff] }
  0x76   :  { %2622 = vmatprep.subr.bf16.mxu0 %v2621_v11  ;;  %2650 = vmatpush3.bf16.msra.mxu1 %v3242_v19 }
  0x77   :  { %2651 = vmatprep.subr.bf16.mxu1 %v3069_v0 }
  0x79   :  { %2624 = vmatpush3.bf16.msra.mxu0 %v2621_v11  ;;  %2415 = vmatmul.mubr.f32.vlgmr.msra.gmra.mrb[0].mxu1 %v3071_v1 }
  0x7a   :  { %2626 = vmatprep.subr.bf16.mxu0 %v2625_v20  ;;  %2653 = vmatpush3.bf16.msra.mxu1 %v3239_v15 }
  0x7b   :  { %2654 = vmatprep.subr.bf16.mxu1 %v3069_v0  ;;  %2425 = vmatprep.mubr.msk.f32.mxu1 %vm3070_vm0, %v3071_v1 }
  0x7d   :  { %2628 = vmatpush3.bf16.msra.mxu0 %v2625_v20 }
  0x7e   :  { %2630 = vmatprep.subr.bf16.mxu0 %v2629_v23  ;;  %2656 = vmatpush3.bf16.msra.mxu1 %v3242_v19 }
  0x7f   :  { %2657 = vmatprep.subr.bf16.mxu1 %v3069_v0 }
  0x81   :  { %2632 = vmatpush3.bf16.msra.mxu0 %v2629_v23 }
  0x82   :  { %2634 = vmatprep.subr.bf16.mxu0 %v2633_v26 }
  0x85   :  { %2636 = vmatpush3.bf16.msra.mxu0 %v2633_v26 }
  0x86   :  { %2638 = vmatprep.subr.bf16.mxu0 %v2637_v29 }
  0x89   :  { %2640 = vmatpush3.bf16.msra.mxu0 %v2637_v29 }
  0x8a   :  { %2642 = vmatprep.subr.bf16.mxu0 %v2641_v32 }
  0x8d   :  { %2644 = vmatpush3.bf16.msra.mxu0 %v2641_v32 }
  0x8e   :  { %2675 = vmatprep.subr.bf16.mxu0 %v3069_v0 }
  0x90   :  { %2395 = vmatmul.mubr.f32.vlgmr.msra.gmra.mrb[0].mxu0 %v116_v33 }
  0x91   :  { %2677 = vmatpush3.bf16.msra.mxu0 %v3239_v15  ;;  %2397 = vmatprep.mubr.f32.mxu0 %v117_v7 }
  0x92   :  { %2678 = vmatprep.subr.bf16.mxu0 %v3069_v0 }
  0x94   :  { %2398 = vmatmul.mubr.f32.gmra.mrb[2].mxu0 %v118_v8 }
  0x95   :  { %2680 = vmatpush3.bf16.msra.mxu0 %v3242_v19 }
  0x96   :  { %2687 = vmatprep.subr.bf16.mxu0 %v3069_v0 }
 0x14c   :  { %v334_v34 = vpop.f32.mrb[0].mxu1 }
 0x14d   :  { %v2416_v35 = vpop.f32.mrb[1].mxu1 }
 0x163   :  { %v2396_v37 = vpop.f32.mrb[0].mxu0 }
 0x164   :  { %v212_v38 = vpop.f32.mrb[1].mxu0  ;;  %v218_v55 = vadd.f32 %v2396_v37, %v3262_v36 }
 0x165   :  { %v213_v39 = vadd.f32 %v3262_v36, %v212_v38 }
 0x167   :  { %v338_v40 = vadd.f32 %v334_v34, %v213_v39  ;;  %v2399_v12 = vpop.f32.mrb[2].mxu0 }
 0x168   :  { %v222_v13 = vpop.f32.mrb[3].mxu0  ;;  %v228_v35 = vadd.f32 %v2399_v12, %v3262_v36 }
 0x169   :  { %2769 = vtanh.f32 %v338_v40  ;;  %v2200_v42 = vmul.f32 -1.442695, %v338_v40  ;;  %v223_v16 = vadd.f32 %v3262_v36, %v222_v13 }
 0x16b   :  { %2771 = vpow2.f32 %v2200_v42 }
 0x173   :  { %v2770_v41 = vpop.eup %2769 }
 0x174   :  { %348 = vrot.lane.b32.xlu0 %v2770_v41, %s3072_s22 }
 0x175   :  { %v2772_v43 = vpop.eup %2771 }
 0x176   :  { %v342_v44 = vadd.f32 1.0, %v2772_v43 }
 0x178   :  { %2773 = vrcp.f32 %v342_v44 }
 0x182   :  { %v2774_v45 = vpop.eup %2773 }
 0x183   :  { %v346_v48 = vmul.f32 0.0, %v2774_v45 }
 0x1e6   :  { %v349_v46 = vpop.permute.xlu0 %348 }
 0x1e7   :  { %v351_v47 = vmul.f32 %v2774_v45, %v349_v46 }
 0x1e9   :  { %353 = vrot.lane.b32.xlu0 %v351_v47, %s3073_s3 }
 0x25b   :  { %v354_v49 = vpop.permute.xlu0 %353 }
 0x25c   :  { %v356_v50 = vadd.f32 %v354_v49, %v346_v48 }
 0x25e   :  { %2775 = vtanh.f32 %v356_v50 }
 0x268   :  { %v2776_v51 = vpop.eup %2775 }
 0x269   :  { %359 = vrot.lane.b32.xlu1 %v2776_v51, %s3072_s22  ;;  %v120_v51 = vld [vmem:[#allocation4 + $0x28] sm:$0xff] }
 0x2db   :  { %v360_v52 = vpop.permute.xlu1 %359 }
 0x2dc   :  { %v362_v53 = vmul.f32 %v2774_v45, %v360_v52 }
 0x2de   :  { %364 = vrot.lane.b32.xlu1 %v362_v53, %s3073_s3 }
 0x350   :  { %v365_v54 = vpop.permute.xlu1 %364 }
 0x351   :  { %367 = vst.msk [vmem:[#allocation3] sm:$0xff] %vm264_vm1, %v365_v54  ;;  %2426 = vmatmul.mubr.msk.f32.vlgmr.msra.gmra.mrb[2].mxu1 %vm264_vm1, %v365_v54 }
 0x352   :  { %2659 = vmatpush3.bf16.msra.mxu1 %v3239_v15  ;;  %2436 = vmatprep.mubr.msk.f32.mxu1 %vm3070_vm0, %v3071_v1 }
 0x353   :  { %2660 = vmatprep.subr.bf16.mxu1 %v3069_v0 }
 0x356   :  { %2662 = vmatpush3.bf16.msra.mxu1 %v3242_v19 }
 0x357   :  { %2663 = vmatprep.subr.bf16.mxu1 %v3069_v0 }
 0x424   :  { %v442_v56 = vpop.f32.mrb[2].mxu1 }
 0x425   :  { %v446_v57 = vadd.f32 %v442_v56, %v218_v55  ;;  %v2427_v58 = vpop.f32.mrb[3].mxu1 }
 0x427   :  { %2777 = vtanh.f32 %v446_v57  ;;  %v2202_v60 = vmul.f32 -1.442695, %v446_v57 }
 0x429   :  { %2779 = vpow2.f32 %v2202_v60 }
 0x431   :  { %v2778_v59 = vpop.eup %2777 }
 0x432   :  { %456 = vrot.lane.b32.xlu0 %v2778_v59, %s3072_s22 }
 0x433   :  { %v2780_v61 = vpop.eup %2779 }
 0x434   :  { %v450_v62 = vadd.f32 1.0, %v2780_v61 }
 0x436   :  { %2781 = vrcp.f32 %v450_v62 }
 0x440   :  { %v2782_v63 = vpop.eup %2781 }
 0x441   :  { %v454_v4 = vmul.f32 %v2782_v63, %v356_v50  ;;  %v119_v50 = vld [vmem:[#allocation4 + $0x20] sm:$0xff] }
 0x442   :  { %2400 = vmatprep.mubr.f32.mxu0 %v119_v50 }
 0x443   :  { %2401 = vmatmul.mubr.f32.gmra.mrb[4].mxu0 %v120_v51 }
 0x4a4   :  { %v457_v2 = vpop.permute.xlu0 %456 }
 0x4a5   :  { %v459_v3 = vmul.f32 %v2782_v63, %v457_v2 }
 0x4a7   :  { %461 = vrot.lane.b32.xlu1 %v459_v3, %s3073_s3 }
 0x516   :  { %v2402_v55 = vpop.f32.mrb[4].mxu0 }
 0x517   :  { %v232_v56 = vpop.f32.mrb[5].mxu0 }
 0x518   :  { %v233_v58 = vadd.f32 %v3262_v36, %v232_v56 }
 0x519   :  { %v462_v5 = vpop.permute.xlu1 %461 }
 0x51a   :  { %v464_v6 = vadd.f32 %v462_v5, %v454_v4 }
 0x51c   :  { %2783 = vtanh.f32 %v464_v6 }
 0x526   :  { %v2784_v9 = vpop.eup %2783 }
 0x527   :  { %467 = vrot.lane.b32.xlu0 %v2784_v9, %s3072_s22 }
 0x599   :  { %v468_v10 = vpop.permute.xlu0 %467 }
 0x59a   :  { %v470_v11 = vmul.f32 %v2782_v63, %v468_v10  ;;  %v121_v10 = vld [vmem:[#allocation4 + $0x30] sm:$0xff] }
 0x59b   :  { %2403 = vmatprep.mubr.f32.mxu0 %v121_v10 }
 0x59c   :  { %472 = vrot.lane.b32.xlu1 %v470_v11, %s3073_s3  ;;  %v122_v11 = vld [vmem:[#allocation4 + $0x38] sm:$0xff] }
 0x59d   :  { %2404 = vmatmul.mubr.f32.gmra.mrb[6].mxu0 %v122_v11  ;;  %v1290_v11 = vld [vmem:[#allocation12 + $0x10] sm:$0xff] }
 0x59e   :  { %2469 = vmatprep.mubr.msk.f32.mxu0 %vm3070_vm0, %v3071_v1 }
 0x60e   :  { %v473_v14 = vpop.permute.xlu1 %472 }
 0x60f   :  { %476 = vst.msk [vmem:[#allocation3 + $0x8] sm:$0xff] %vm264_vm1, %v473_v14  ;;  %2437 = vmatmul.mubr.msk.f32.vlgmr.msra.gmra.mrb[4].mxu1 %vm264_vm1, %v473_v14 }
 0x610   :  { %2665 = vmatpush3.bf16.msra.mxu1 %v3239_v15  ;;  %2447 = vmatprep.mubr.msk.f32.mxu1 %vm3070_vm0, %v3071_v1 }
 0x611   :  { %2666 = vmatprep.subr.bf16.mxu1 %v3069_v0 }
 0x614   :  { %2668 = vmatpush3.bf16.msra.mxu1 %v3242_v19 }
 0x615   :  { %2669 = vmatprep.subr.bf16.mxu1 %v3069_v0 }
 0x6e2   :  { %v551_v17 = vpop.f32.mrb[4].mxu1 }
 0x6e3   :  { %v555_v18 = vadd.f32 %v551_v17, %v223_v16  ;;  %v2438_v20 = vpop.f32.mrb[5].mxu1  ;;  %v3322_v16 = vpop.f32.mrb[6].mxu0 }
 0x6e4   :  { %v242_v17 = vpop.f32.mrb[7].mxu0  ;;  %v238_v20 = vadd.f32 %v2402_v55, %v3262_v36 }
 0x6e5   :  { %2785 = vtanh.f32 %v555_v18  ;;  %v2204_v22 = vmul.f32 -1.442695, %v555_v18 }
 0x6e7   :  { %2787 = vpow2.f32 %v2204_v22 }
 0x6ef   :  { %v2786_v21 = vpop.eup %2785 }
 0x6f0   :  { %565 = vrot.lane.b32.xlu0 %v2786_v21, %s3072_s22 }
 0x6f1   :  { %v2788_v23 = vpop.eup %2787 }
 0x6f2   :  { %v559_v24 = vadd.f32 1.0, %v2788_v23 }
 0x6f4   :  { %2789 = vrcp.f32 %v559_v24 }
 0x6fe   :  { %v2790_v25 = vpop.eup %2789 }
 0x6ff   :  { %v563_v28 = vmul.f32 %v2790_v25, %v464_v6 }
 0x762   :  { %v566_v26 = vpop.permute.xlu0 %565 }
 0x763   :  { %v568_v27 = vmul.f32 %v2790_v25, %v566_v26 }
 0x765   :  { %570 = vrot.lane.b32.xlu1 %v568_v27, %s3073_s3 }
 0x7d7   :  { %v571_v29 = vpop.permute.xlu1 %570 }
 0x7d8   :  { %v573_v30 = vadd.f32 %v571_v29, %v563_v28 }
 0x7da   :  { %2791 = vtanh.f32 %v573_v30 }
 0x7e4   :  { %v2792_v31 = vpop.eup %2791 }
 0x7e5   :  { %576 = vrot.lane.b32.xlu0 %v2792_v31, %s3072_s22 }
 0x857   :  { %v577_v32 = vpop.permute.xlu0 %576 }
 0x858   :  { %v579_v33 = vmul.f32 %v2790_v25, %v577_v32  ;;  %v1139_v32 = vld [vmem:[#allocation10] sm:$0xff] }
 0x85a   :  { %581 = vrot.lane.b32.xlu1 %v579_v33, %s3073_s3  ;;  %v1140_v33 = vld [vmem:[#allocation10 + $0x8] sm:$0xff] }
 0x8cc   :  { %v582_v34 = vpop.permute.xlu1 %581 }
 0x8cd   :  { %585 = vst.msk [vmem:[#allocation3 + $0x10] sm:$0xff] %vm264_vm1, %v582_v34  ;;  %2448 = vmatmul.mubr.msk.f32.vlgmr.msra.gmra.mrb[6].mxu1 %vm264_vm1, %v582_v34  ;;  %v2693_v34 = vpack.c.bf16 %v1140_v33, %v1139_v32 }
 0x8ce   :  { %2671 = vmatpush3.bf16.msra.mxu1 %v3239_v15  ;;  %2458 = vmatprep.mubr.msk.f32.mxu1 %vm3070_vm0, %v3071_v1 }
 0x8cf   :  { %2672 = vmatprep.subr.bf16.mxu1 %v3069_v0 }
 0x8d2   :  { %2674 = vmatpush3.bf16.msra.mxu1 %v3242_v19 }
 0x8d3   :  { %2681 = vmatprep.subr.bf16.mxu1 %v3069_v0 }
 0x9a0   :  { %v660_v37 = vpop.f32.mrb[6].mxu1 }
 0x9a1   :  { %v664_v38 = vadd.f32 %v660_v37, %v228_v35  ;;  %v2449_v39 = vpop.f32.mrb[7].mxu1 }
 0x9a2   :  { %v1141_v39 = vld [vmem:[#allocation10 + $0x10] sm:$0xff] }
 0x9a3   :  { %2793 = vtanh.f32 %v664_v38  ;;  %v2206_v41 = vmul.f32 -1.442695, %v664_v38 }
 0x9a5   :  { %2795 = vpow2.f32 %v2206_v41 }
 0x9ad   :  { %v2794_v40 = vpop.eup %2793 }
 0x9ae   :  { %674 = vrot.lane.b32.xlu0 %v2794_v40, %s3072_s22  ;;  %v1142_v40 = vld [vmem:[#allocation10 + $0x18] sm:$0xff] }
 0x9af   :  { %v2796_v42 = vpop.eup %2795  ;;  %v2697_v41 = vpack.c.bf16 %v1142_v40, %v1141_v39 }
 0x9b0   :  { %v668_v43 = vadd.f32 1.0, %v2796_v42 }
 0x9b2   :  { %2797 = vrcp.f32 %v668_v43  ;;  %v1131_v43 = vld [vmem:[#allocation3] sm:$0xff] }
 0x9bc   :  { %v2798_v44 = vpop.eup %2797 }
 0x9bd   :  { %v672_v47 = vmul.f32 %v2798_v44, %v573_v30 }
 0xa20   :  { %v675_v45 = vpop.permute.xlu0 %674 }
 0xa21   :  { %v677_v46 = vmul.f32 %v2798_v44, %v675_v45  ;;  %v1133_v45 = vld [vmem:[#allocation3 + $0x10] sm:$0xff] }
 0xa23   :  { %679 = vrot.lane.b32.xlu1 %v677_v46, %s3073_s3 }
 0xa95   :  { %v680_v48 = vpop.permute.xlu1 %679 }
 0xa96   :  { %v682_v49 = vadd.f32 %v680_v48, %v672_v47 }
 0xa98   :  { %2799 = vtanh.f32 %v682_v49 }
 0xaa2   :  { %v2800_v52 = vpop.eup %2799 }
 0xaa3   :  { %685 = vrot.lane.b32.xlu0 %v2800_v52, %s3072_s22 }
 0xb15   :  { %v686_v53 = vpop.permute.xlu0 %685 }
 0xb16   :  { %v688_v54 = vmul.f32 %v2798_v44, %v686_v53  ;;  %v1132_v44 = vld [vmem:[#allocation3 + $0x8] sm:$0xff] }
 0xb18   :  { %690 = vrot.lane.b32.xlu1 %v688_v54, %s3073_s3 }
 0xb8a   :  { %v691_v57 = vpop.permute.xlu1 %690 }
 0xb8b   :  { %694 = vst.msk [vmem:[#allocation3 + $0x18] sm:$0xff] %vm264_vm1, %v691_v57  ;;  %2459 = vmatmul.mubr.msk.f32.vlgmr.msra.gmra.mrb[8].mxu1 %vm264_vm1, %v691_v57 }
 0xb8c   :  { %2683 = vmatpush3.bf16.msra.mxu1 %v3239_v15  ;;  %2480 = vmatprep.mubr.msk.f32.mxu1 %vm3070_vm0, %v3071_v1 }
 0xb8d   :  { %2684 = vmatprep.subr.bf16.mxu1 %v3069_v0 }
 0xb90   :  { %2686 = vmatpush3.bf16.msra.mxu1 %v3242_v19 }
 0xb91   :  { %2694 = vmatprep.subr.bf16.mxu1 %v2693_v34 }
 0xb92   :  { %v1134_v46 = vld [vmem:[#allocation3 + $0x18] sm:$0xff] }
 0xc5e   :  { %v769_v59 = vpop.f32.mrb[8].mxu1 }
 0xc5f   :  { %v773_v60 = vadd.f32 %v769_v59, %v233_v58  ;;  %v2460_v61 = vpop.f32.mrb[9].mxu1 }
 0xc61   :  { %2801 = vtanh.f32 %v773_v60  ;;  %v2208_v63 = vmul.f32 -1.442695, %v773_v60 }
 0xc63   :  { %2803 = vpow2.f32 %v2208_v63 }
 0xc6b   :  { %v2802_v62 = vpop.eup %2801 }
 0xc6c   :  { %783 = vrot.lane.b32.xlu0 %v2802_v62, %s3072_s22 }
 0xc6d   :  { %v2804_v2 = vpop.eup %2803 }
 0xc6e   :  { %v777_v3 = vadd.f32 1.0, %v2804_v2 }
 0xc70   :  { %2805 = vrcp.f32 %v777_v3 }
 0xc7a   :  { %v2806_v4 = vpop.eup %2805 }
 0xc7b   :  { %v781_v7 = vmul.f32 %v2806_v4, %v682_v49  ;;  %v243_v49 = vadd.f32 %v3262_v36, %v242_v17 }
 0xcde   :  { %v784_v5 = vpop.permute.xlu0 %783 }
 0xcdf   :  { %v786_v6 = vmul.f32 %v2806_v4, %v784_v5 }
 0xce1   :  { %788 = vrot.lane.b32.xlu1 %v786_v6, %s3073_s3 }
 0xd53   :  { %v789_v8 = vpop.permute.xlu1 %788 }
 0xd54   :  { %v791_v9 = vadd.f32 %v789_v8, %v781_v7  ;;  %v1288_v8 = vld [vmem:[#allocation12] sm:$0xff] }
 0xd56   :  { %2807 = vtanh.f32 %v791_v9 }
 0xd60   :  { %v2808_v12 = vpop.eup %2807 }
 0xd61   :  { %794 = vrot.lane.b32.xlu0 %v2808_v12, %s3072_s22  ;;  %v1291_v12 = vld [vmem:[#allocation12 + $0x18] sm:$0xff] }
 0xdd3   :  { %v795_v13 = vpop.permute.xlu0 %794 }
 0xdd4   :  { %v797_v14 = vmul.f32 %v2806_v4, %v795_v13  ;;  %v3367_v13 = vpack.c.bf16 %v1291_v12, %v1290_v11 }
 0xdd6   :  { %799 = vrot.lane.b32.xlu1 %v797_v14, %s3073_s3 }
 0xe48   :  { %v800_v18 = vpop.permute.xlu1 %799 }
 0xe49   :  { %803 = vst.msk [vmem:[#allocation3 + $0x20] sm:$0xff] %vm264_vm1, %v800_v18  ;;  %2470 = vmatmul.mubr.msk.f32.vlgmr.msra.gmra.mrb[8].mxu0 %vm264_vm1, %v800_v18 }
 0xe4a   :  { %2689 = vmatpush3.bf16.msra.mxu0 %v3239_v15  ;;  %2491 = vmatprep.mubr.msk.f32.mxu0 %vm3070_vm0, %v3071_v1 }
 0xe4b   :  { %2690 = vmatprep.subr.bf16.mxu0 %v3069_v0 }
 0xe4e   :  { %2692 = vmatpush3.bf16.msra.mxu0 %v3242_v19 }
 0xe4f   :  { %2701 = vmatprep.subr.bf16.mxu0 %v3069_v0 }
 0xe50   :  { %v1135_v47 = vld [vmem:[#allocation3 + $0x20] sm:$0xff] }
 0xf1c   :  { %v878_v21 = vpop.f32.mrb[8].mxu0 }
 0xf1d   :  { %v882_v22 = vadd.f32 %v878_v21, %v238_v20  ;;  %v2471_v23 = vpop.f32.mrb[9].mxu0  ;;  %v248_v21 = vadd.f32 %v3322_v16, %v3262_v36 }
 0xf1f   :  { %2809 = vtanh.f32 %v882_v22  ;;  %v2210_v25 = vmul.f32 -1.442695, %v882_v22 }
 0xf21   :  { %2811 = vpow2.f32 %v2210_v25  ;;  %v3393_v25 = vld [vmem:[%s3516_s6] ss:$0 sm:$0xff] }
 0xf29   :  { %v2810_v24 = vpop.eup %2809 }
 0xf2a   :  { %892 = vrot.lane.b32.xlu0 %v2810_v24, %s3072_s22 }
 0xf2b   :  { %v2812_v15 = vpop.eup %2811 }
 0xf2c   :  { %v886_v26 = vadd.f32 1.0, %v2812_v15 }
 0xf2e   :  { %2813 = vrcp.f32 %v886_v26 }
 0xf38   :  { %v2814_v27 = vpop.eup %2813 }
 0xf39   :  { %v890_v19 = vmul.f32 %v2814_v27, %v791_v9  ;;  %v1289_v9 = vld [vmem:[#allocation12 + $0x8] sm:$0xff] }
 0xf3a   :  { %v3363_v10 = vpack.c.bf16 %v1289_v9, %v1288_v8 }
 0xf9c   :  { %v893_v28 = vpop.permute.xlu0 %892 }
 0xf9d   :  { %v895_v29 = vmul.f32 %v2814_v27, %v893_v28 }
 0xf9f   :  { %897 = vrot.lane.b32.xlu1 %v895_v29, %s3073_s3 }
0x1011   :  { %v898_v30 = vpop.permute.xlu1 %897 }
0x1012   :  { %v900_v31 = vadd.f32 %v898_v30, %v890_v19 }
0x1014   :  { %2815 = vtanh.f32 %v900_v31 }
0x101e   :  { %v2816_v35 = vpop.eup %2815 }
0x101f   :  { %903 = vrot.lane.b32.xlu0 %v2816_v35, %s3072_s22 }
0x1091   :  { %v904_v37 = vpop.permute.xlu0 %903 }
0x1092   :  { %v906_v38 = vmul.f32 %v2814_v27, %v904_v37 }
0x1094   :  { %908 = vrot.lane.b32.xlu1 %v906_v38, %s3073_s3 }
0x1106   :  { %v909_v42 = vpop.permute.xlu1 %908 }
0x1107   :  { %912 = vst.msk [vmem:[#allocation3 + $0x28] sm:$0xff] %vm264_vm1, %v909_v42  ;;  %2481 = vmatmul.mubr.msk.f32.vlgmr.msra.gmra.mrb[10].mxu1 %vm264_vm1, %v909_v42 }
0x1108   :  { %2696 = vmatpush3.bf16.msra.mxu1 %v2693_v34  ;;  %2502 = vmatprep.mubr.msk.f32.mxu1 %vm264_vm1, %v1131_v43 }
0x1109   :  { %2698 = vmatprep.subr.bf16.mxu1 %v2697_v41 }
0x110c   :  { %2700 = vmatpush3.bf16.msra.mxu1 %v2697_v41 }
0x110d   :  { %2713 = vmatprep.subr.bf16.mxu1 %v3069_v0 }
0x110e   :  { %v1136_v48 = vld [vmem:[#allocation3 + $0x28] sm:$0xff] }
0x110f   :  { %2503 = vmatmul.mubr.msk.f32.vlgmr.msra.gmra.mrb[12].mxu1 %vm264_vm1, %v1132_v44 }
0x1110   :  { %2505 = vmatprep.mubr.msk.f32.mxu1 %vm264_vm1, %v1133_v45  ;;  %2715 = vmatpush3.bf16.msra.mxu1 %v3363_v10 }
0x1111   :  { %2716 = vmatprep.subr.bf16.mxu1 %v3069_v0 }
0x1113   :  { %2506 = vmatmul.mubr.msk.f32.gmra.mrb[14].mxu1 %vm264_vm1, %v1134_v46 }
0x1114   :  { %2508 = vmatprep.mubr.msk.f32.mxu1 %vm264_vm1, %v1135_v47  ;;  %2718 = vmatpush3.bf16.msra.mxu1 %v3367_v13 }
0x1115   :  { %2725 = vmatprep.subr.bf16.mxu1 %v3069_v0 }
0x1117   :  { %2509 = vmatmul.mubr.msk.f32.gmra.mrb[16].mxu1 %vm264_vm1, %v1136_v48 }
0x11da   :  { %v987_v50 = vpop.f32.mrb[10].mxu1 }
0x11db   :  { %v991_v51 = vadd.f32 %v987_v50, %v243_v49  ;;  %v2482_v52 = vpop.f32.mrb[11].mxu1 }
0x11dd   :  { %2817 = vtanh.f32 %v991_v51  ;;  %v2212_v60 = vmul.f32 -1.442695, %v991_v51 }
0x11df   :  { %2819 = vpow2.f32 %v2212_v60 }
0x11e2   :  { %v3347_v53 = vpop.f32.mrb[12].mxu1 }
0x11e3   :  { %v1240_v54 = vpop.f32.mrb[13].mxu1 }
0x11e4   :  { %v1241_v15 = vadd.f32 %v3393_v25, %v1240_v54 }
0x11e6   :  { %v3349_v55 = vpop.f32.mrb[14].mxu1 }
0x11e7   :  { %v2818_v56 = vpop.eup %2817  ;;  %v3351_v57 = vpop.f32.mrb[15].mxu1 }
0x11e8   :  { %1001 = vrot.lane.b32.xlu0 %v2818_v56, %s3072_s22  ;;  %v1246_v56 = vadd.f32 %v3347_v53, %v3393_v25 }
0x11e9   :  { %v2820_v61 = vpop.eup %2819 }
0x11ea   :  { %v3354_v58 = vpop.f32.mrb[16].mxu1  ;;  %v995_v62 = vadd.f32 1.0, %v2820_v61 }
0x11eb   :  { %v3356_v59 = vpop.f32.mrb[17].mxu1 }
0x11ec   :  { %2821 = vrcp.f32 %v995_v62 }
0x11f6   :  { %v2822_v63 = vpop.eup %2821 }
0x11f7   :  { %v999_v4 = vmul.f32 %v2822_v63, %v900_v31 }
0x125a   :  { %v1002_v2 = vpop.permute.xlu0 %1001 }
0x125b   :  { %v1004_v3 = vmul.f32 %v2822_v63, %v1002_v2 }
0x125d   :  { %1006 = vrot.lane.b32.xlu1 %v1004_v3, %s3073_s3 }
0x12cf   :  { %v1007_v5 = vpop.permute.xlu1 %1006 }
0x12d0   :  { %v3359_v6 = vadd.f32 %v1007_v5, %v999_v4 }
0x12d2   :  { %2823 = vtanh.f32 %v3359_v6 }
0x12dc   :  { %v2824_v7 = vpop.eup %2823 }
0x12dd   :  { %1012 = vrot.lane.b32.xlu0 %v2824_v7, %s3072_s22 }
0x134f   :  { %v1013_v14 = vpop.permute.xlu0 %1012 }
0x1350   :  { %v1015_v17 = vmul.f32 %v2822_v63, %v1013_v14 }
0x1352   :  { %1017 = vrot.lane.b32.xlu1 %v1015_v17, %s3073_s3 }
0x13c4   :  { %v1018_v18 = vpop.permute.xlu1 %1017 }
0x13c5   :  { %1021 = vst.msk [vmem:[#allocation3 + $0x30] sm:$0xff] %vm264_vm1, %v1018_v18  ;;  %2492 = vmatmul.mubr.msk.f32.vlgmr.msra.gmra.mrb[10].mxu0 %vm264_vm1, %v1018_v18 }
0x13c6   :  { %2703 = vmatpush3.bf16.msra.mxu0 %v3363_v10  ;;  %2522 = vmatprep.mubr.msk.f32.mxu0 %vm3070_vm0, %v3071_v1 }
0x13c7   :  { %2704 = vmatprep.subr.bf16.mxu0 %v3069_v0 }
0x13ca   :  { %2706 = vmatpush3.bf16.msra.mxu0 %v3367_v13 }
0x13cb   :  { %2707 = vmatprep.subr.bf16.mxu0 %v3069_v0 }
0x13cc   :  { %v1137_v20 = vld [vmem:[#allocation3 + $0x30] sm:$0xff] }
0x13cd   :  { %2523 = vmatmul.mubr.f32.vlgmr.msra.gmra.mrb[12].mxu0 %v3071_v1  ;;  %2511 = vmatprep.mubr.msk.f32.mxu1 %vm264_vm1, %v1137_v20 }
0x13ce   :  { %2709 = vmatpush3.bf16.msra.mxu0 %v3363_v10  ;;  %2533 = vmatprep.mubr.msk.f32.mxu0 %vm3070_vm0, %v3071_v1 }
0x13cf   :  { %2710 = vmatprep.subr.bf16.mxu0 %v3069_v0 }
0x13d2   :  { %2712 = vmatpush3.bf16.msra.mxu0 %v3367_v13 }
0x13d3   :  { %2719 = vmatprep.subr.bf16.mxu0 %v3069_v0 }
0x1498   :  { %v1096_v22 = vpop.f32.mrb[10].mxu0 }
0x1499   :  { %v1100_v23 = vadd.f32 %v1096_v22, %v248_v21  ;;  %v2493_v24 = vpop.f32.mrb[11].mxu0 }
0x149b   :  { %v2214_v39 = vmul.f32 -1.442695, %v1100_v23 }
0x14a0   :  { %v1358_v26 = vpop.f32.mrb[12].mxu0 }
0x14a1   :  { %v1362_v27 = vadd.f32 %v1358_v26, %v1241_v15  ;;  %v2524_v28 = vpop.f32.mrb[13].mxu0 }
0x14a3   :  { %2825 = vtanh.f32 %v1362_v27  ;;  %v2224_v19 = vmul.f32 -1.442695, %v1362_v27 }
0x14a5   :  { %2827 = vpow2.f32 %v2224_v19 }
0x14ad   :  { %v2826_v29 = vpop.eup %2825 }
0x14ae   :  { %1372 = vrot.lane.b32.xlu0 %v2826_v29, %s3072_s22 }
0x14af   :  { %v2828_v36 = vpop.eup %2827 }
0x14b0   :  { %v1366_v16 = vadd.f32 1.0, %v2828_v36 }
0x14b2   :  { %2829 = vrcp.f32 %v1366_v16 }
0x14bc   :  { %v2830_v30 = vpop.eup %2829 }
0x14bd   :  { %v1370_v33 = vmul.f32 0.0, %v2830_v30 }
0x1520   :  { %v1373_v31 = vpop.permute.xlu0 %1372 }
0x1521   :  { %v1375_v32 = vmul.f32 %v2830_v30, %v1373_v31 }
0x1523   :  { %1377 = vrot.lane.b32.xlu1 %v1375_v32, %s3073_s3 }
0x1595   :  { %v1378_v34 = vpop.permute.xlu1 %1377 }
0x1596   :  { %v1380_v35 = vadd.f32 %v1378_v34, %v1370_v33 }
0x1598   :  { %2831 = vtanh.f32 %v1380_v35 }
0x1599   :  { %2833 = vtanh.f32 %v1100_v23  ;;  %v1251_v23 = vadd.f32 %v3393_v25, %v3351_v57 }
0x159a   :  { %2835 = vpow2.f32 %v2214_v39 }
0x15a2   :  { %v2832_v37 = vpop.eup %2831 }
0x15a3   :  { %1383 = vrot.lane.b32.xlu0 %v2832_v37, %s3072_s22  ;;  %v2834_v38 = vpop.eup %2833 }
0x15a4   :  { %v2836_v40 = vpop.eup %2835 }
0x15a5   :  { %v1104_v41 = vadd.f32 1.0, %v2836_v40 }
0x15a7   :  { %1110 = vrot.lane.b32.xlu0 %v2834_v38, %s3072_s22  ;;  %2837 = vrcp.f32 %v1104_v41  ;;  %v1256_v38 = vadd.f32 %v3349_v55, %v3393_v25 }
0x15b1   :  { %v2838_v44 = vpop.eup %2837 }
0x15b2   :  { %v1108_v48 = vmul.f32 %v2838_v44, %v3359_v6 }
0x1615   :  { %v1384_v42 = vpop.permute.xlu0 %1383 }
0x1616   :  { %v1386_v43 = vmul.f32 %v2830_v30, %v1384_v42 }
0x1618   :  { %1389 = vrot.lane.b32.xlu1 %v1386_v43, %s3073_s3 }
0x1619   :  { %v1111_v45 = vpop.permute.xlu0 %1110 }
0x161a   :  { %v1113_v46 = vmul.f32 %v2838_v44, %v1111_v45 }
0x161c   :  { %1115 = vrot.lane.b32.xlu0 %v1113_v46, %s3073_s3 }
0x168a   :  { %v1390_v47 = vpop.permute.xlu1 %1389 }
0x168b   :  { %2534 = vmatmul.mubr.msk.f32.vlgmr.msra.gmra.mrb[14].mxu0 %vm264_vm1, %v1390_v47 }
0x168c   :  { %2721 = vmatpush3.bf16.msra.mxu0 %v3363_v10  ;;  %2555 = vmatprep.mubr.msk.f32.mxu0 %vm3070_vm0, %v3071_v1 }
0x168d   :  { %2722 = vmatprep.subr.bf16.mxu0 %v3069_v0 }
0x168e   :  { %v1116_v49 = vpop.permute.xlu0 %1115 }
0x168f   :  { %v1118_v50 = vadd.f32 %v1116_v49, %v1108_v48 }
0x1690   :  { %2724 = vmatpush3.bf16.msra.mxu0 %v3367_v13 }
0x1691   :  { %2839 = vtanh.f32 %v1118_v50  ;;  %2731 = vmatprep.subr.bf16.mxu0 %v3069_v0 }
0x169b   :  { %v2840_v51 = vpop.eup %2839 }
0x169c   :  { %1121 = vrot.lane.b32.xlu0 %v2840_v51, %s3072_s22 }
0x170e   :  { %v1122_v52 = vpop.permute.xlu0 %1121 }
0x170f   :  { %v1124_v54 = vmul.f32 %v2838_v44, %v1122_v52 }
0x1711   :  { %1126 = vrot.lane.b32.xlu0 %v1124_v54, %s3073_s3 }
0x175e   :  { %v1459_v60 = vpop.f32.mrb[14].mxu0 }
0x175f   :  { %v1463_v61 = vadd.f32 %v1459_v60, %v1246_v56  ;;  %v2535_v62 = vpop.f32.mrb[15].mxu0  ;;  %v1261_v60 = vadd.f32 %v3393_v25, %v3356_v59 }
0x1761   :  { %2841 = vtanh.f32 %v1463_v61  ;;  %v2226_v4 = vmul.f32 -1.442695, %v1463_v61 }
0x1763   :  { %2843 = vpow2.f32 %v2226_v4 }
0x176b   :  { %v2842_v63 = vpop.eup %2841 }
0x176c   :  { %1473 = vrot.lane.b32.xlu1 %v2842_v63, %s3072_s22 }
0x176d   :  { %v2844_v5 = vpop.eup %2843 }
0x176e   :  { %v1467_v53 = vadd.f32 1.0, %v2844_v5 }
0x1770   :  { %2845 = vrcp.f32 %v1467_v53 }
0x177a   :  { %v2846_v6 = vpop.eup %2845 }
0x177b   :  { %v1471_v9 = vmul.f32 %v2846_v6, %v1380_v35 }
0x1783   :  { %v1127_v2 = vpop.permute.xlu0 %1126 }
0x1784   :  { %1130 = vst.msk [vmem:[#allocation3 + $0x38] sm:$0xff] %vm264_vm1, %v1127_v2 }
0x178b   :  { %v1138_v3 = vld [vmem:[#allocation3 + $0x38] sm:$0xff] }
0x178c   :  { %2512 = vmatmul.mubr.msk.f32.gmra.mrb[18].mxu1 %vm264_vm1, %v1138_v3 }
0x178d   :  { %2544 = vmatprep.mubr.msk.f32.mxu1 %vm3070_vm0, %v3071_v1 }
0x17de   :  { %v1474_v7 = vpop.permute.xlu1 %1473 }
0x17df   :  { %v1476_v8 = vmul.f32 %v2846_v6, %v1474_v7 }
0x17e1   :  { %1478 = vrot.lane.b32.xlu1 %v1476_v8, %s3073_s3 }
0x1853   :  { %v1479_v11 = vpop.permute.xlu1 %1478 }
0x1854   :  { %v1481_v12 = vadd.f32 %v1479_v11, %v1471_v9 }
0x1856   :  { %2847 = vtanh.f32 %v1481_v12 }
0x185f   :  { %v3420_v14 = vpop.f32.mrb[18].mxu1 }
0x1860   :  { %v2848_v17 = vpop.eup %2847  ;;  %v3422_v18 = vpop.f32.mrb[19].mxu1 }
0x1861   :  { %1484 = vrot.lane.b32.xlu1 %v2848_v17, %s3072_s22 }
0x18d3   :  { %v1485_v20 = vpop.permute.xlu1 %1484 }
0x18d4   :  { %v1487_v21 = vmul.f32 %v2846_v6, %v1485_v20 }
0x18d6   :  { %1490 = vrot.lane.b32.xlu1 %v1487_v21, %s3073_s3  ;;  %v1266_v21 = vadd.f32 %v3354_v58, %v3393_v25 }
0x1948   :  { %v1491_v22 = vpop.permute.xlu1 %1490 }
0x1949   :  { %2545 = vmatmul.mubr.msk.f32.vlgmr.msra.gmra.mrb[20].mxu1 %vm264_vm1, %v1491_v22 }
0x194a   :  { %2727 = vmatpush3.bf16.msra.mxu1 %v3363_v10  ;;  %2566 = vmatprep.mubr.msk.f32.mxu1 %vm3070_vm0, %v3071_v1 }
0x194b   :  { %2728 = vmatprep.subr.bf16.mxu1 %v3069_v0 }
0x194e   :  { %2730 = vmatpush3.bf16.msra.mxu1 %v3367_v13 }
0x194f   :  { %2737 = vmatprep.subr.bf16.mxu1 %v3069_v0 }
0x1a1c   :  { %v1560_v24 = vpop.f32.mrb[20].mxu1 }
0x1a1d   :  { %v1564_v15 = vadd.f32 %v1560_v24, %v1251_v23  ;;  %v2546_v26 = vpop.f32.mrb[21].mxu1 }
0x1a1f   :  { %2849 = vtanh.f32 %v1564_v15  ;;  %v2228_v28 = vmul.f32 -1.442695, %v1564_v15 }
0x1a21   :  { %2851 = vpow2.f32 %v2228_v28 }
0x1a29   :  { %v2850_v27 = vpop.eup %2849 }
0x1a2a   :  { %1574 = vrot.lane.b32.xlu0 %v2850_v27, %s3072_s22 }
0x1a2b   :  { %v2852_v29 = vpop.eup %2851 }
0x1a2c   :  { %v1568_v19 = vadd.f32 1.0, %v2852_v29 }
0x1a2e   :  { %2853 = vrcp.f32 %v1568_v19 }
0x1a38   :  { %v2854_v36 = vpop.eup %2853 }
0x1a39   :  { %v1572_v31 = vmul.f32 %v2854_v36, %v1481_v12 }
0x1a9c   :  { %v1575_v16 = vpop.permute.xlu0 %1574 }
0x1a9d   :  { %v1577_v30 = vmul.f32 %v2854_v36, %v1575_v16 }
0x1a9f   :  { %1579 = vrot.lane.b32.xlu1 %v1577_v30, %s3073_s3 }
0x1b11   :  { %v1580_v32 = vpop.permute.xlu1 %1579 }
0x1b12   :  { %v1582_v57 = vadd.f32 %v1580_v32, %v1572_v31 }
0x1b14   :  { %2855 = vtanh.f32 %v1582_v57 }
0x1b1e   :  { %v2856_v33 = vpop.eup %2855 }
0x1b1f   :  { %1585 = vrot.lane.b32.xlu0 %v2856_v33, %s3072_s22 }
0x1b91   :  { %v1586_v34 = vpop.permute.xlu0 %1585 }
0x1b92   :  { %v1588_v35 = vmul.f32 %v2854_v36, %v1586_v34 }
0x1b94   :  { %1591 = vrot.lane.b32.xlu1 %v1588_v35, %s3073_s3 }
0x1c06   :  { %v1592_v37 = vpop.permute.xlu1 %1591 }
0x1c07   :  { %2556 = vmatmul.mubr.msk.f32.vlgmr.msra.gmra.mrb[16].mxu0 %vm264_vm1, %v1592_v37 }
0x1c08   :  { %2733 = vmatpush3.bf16.msra.mxu0 %v3363_v10  ;;  %2577 = vmatprep.mubr.msk.f32.mxu0 %vm3070_vm0, %v3071_v1 }
0x1c09   :  { %2734 = vmatprep.subr.bf16.mxu0 %v3069_v0 }
0x1c0c   :  { %2736 = vmatpush3.bf16.msra.mxu0 %v3367_v13 }
0x1c0d   :  { %2743 = vmatprep.subr.bf16.mxu0 %v3069_v0 }
0x1cda   :  { %v1661_v39 = vpop.f32.mrb[16].mxu0 }
0x1cdb   :  { %v1665_v40 = vadd.f32 %v1661_v39, %v1256_v38  ;;  %v2557_v41 = vpop.f32.mrb[17].mxu0 }
0x1cdd   :  { %2857 = vtanh.f32 %v1665_v40  ;;  %v2230_v43 = vmul.f32 -1.442695, %v1665_v40 }
0x1cdf   :  { %2859 = vpow2.f32 %v2230_v43 }
0x1ce7   :  { %v2858_v42 = vpop.eup %2857 }
0x1ce8   :  { %1675 = vrot.lane.b32.xlu0 %v2858_v42, %s3072_s22 }
0x1ce9   :  { %v2860_v44 = vpop.eup %2859 }
0x1cea   :  { %v1669_v45 = vadd.f32 1.0, %v2860_v44 }
0x1cec   :  { %2861 = vrcp.f32 %v1669_v45 }
0x1cf6   :  { %v2862_v46 = vpop.eup %2861 }
0x1cf7   :  { %v1673_v49 = vmul.f32 %v2862_v46, %v1582_v57  ;;  %v1271_v57 = vadd.f32 %v3393_v25, %v3422_v18 }
0x1d5a   :  { %v1676_v47 = vpop.permute.xlu0 %1675 }
0x1d5b   :  { %v1678_v48 = vmul.f32 %v2862_v46, %v1676_v47 }
0x1d5d   :  { %1680 = vrot.lane.b32.xlu1 %v1678_v48, %s3073_s3 }
0x1dcf   :  { %v1681_v50 = vpop.permute.xlu1 %1680 }
0x1dd0   :  { %v1683_v55 = vadd.f32 %v1681_v50, %v1673_v49  ;;  %v1276_v49 = vadd.f32 %v3420_v14, %v3393_v25  ;;  %v2094_v14 = vld [vmem:[#allocation13] sm:$0xff] }
0x1dd2   :  { %2863 = vtanh.f32 %v1683_v55 }
0x1ddc   :  { %v2864_v51 = vpop.eup %2863 }
0x1ddd   :  { %1686 = vrot.lane.b32.xlu0 %v2864_v51, %s3072_s22 }
0x1e4f   :  { %v1687_v52 = vpop.permute.xlu0 %1686 }
0x1e50   :  { %v1689_v54 = vmul.f32 %v2862_v46, %v1687_v52 }
0x1e52   :  { %1692 = vrot.lane.b32.xlu1 %v1689_v54, %s3073_s3 }
0x1ec4   :  { %v1693_v56 = vpop.permute.xlu1 %1692 }
0x1ec5   :  { %2567 = vmatmul.mubr.msk.f32.vlgmr.msra.gmra.mrb[22].mxu1 %vm264_vm1, %v1693_v56 }
0x1ec6   :  { %2739 = vmatpush3.bf16.msra.mxu1 %v3363_v10  ;;  %2588 = vmatprep.mubr.msk.f32.mxu1 %vm3070_vm0, %v3071_v1 }
0x1ec7   :  { %2740 = vmatprep.subr.bf16.mxu1 %v3069_v0 }
0x1eca   :  { %2742 = vmatpush3.bf16.msra.mxu1 %v3367_v13 }
0x1ecb   :  { %2749 = vmatprep.subr.bf16.mxu1 %v3069_v0 }
0x1f98   :  { %v1762_v61 = vpop.f32.mrb[22].mxu1 }
0x1f99   :  { %v1766_v62 = vadd.f32 %v1762_v61, %v1261_v60  ;;  %v2568_v63 = vpop.f32.mrb[23].mxu1 }
0x1f9b   :  { %2865 = vtanh.f32 %v1766_v62  ;;  %v2232_v3 = vmul.f32 -1.442695, %v1766_v62 }
0x1f9d   :  { %2867 = vpow2.f32 %v2232_v3 }
0x1fa5   :  { %v2866_v2 = vpop.eup %2865 }
0x1fa6   :  { %1776 = vrot.lane.b32.xlu0 %v2866_v2, %s3072_s22 }
0x1fa7   :  { %v2868_v4 = vpop.eup %2867 }
0x1fa8   :  { %v1770_v5 = vadd.f32 1.0, %v2868_v4  ;;  %v2095_v4 = vld [vmem:[#allocation13 + $0x8] sm:$0xff] }
0x1faa   :  { %2869 = vrcp.f32 %v1770_v5  ;;  %v2096_v5 = vld [vmem:[#allocation13 + $0x10] sm:$0xff] }
0x1fb4   :  { %v2870_v53 = vpop.eup %2869 }
0x1fb5   :  { %v1774_v8 = vmul.f32 %v2870_v53, %v1683_v55 }
0x2018   :  { %v1777_v6 = vpop.permute.xlu0 %1776 }
0x2019   :  { %v1779_v7 = vmul.f32 %v2870_v53, %v1777_v6  ;;  %v2097_v6 = vld [vmem:[#allocation13 + $0x18] sm:$0xff] }
0x201b   :  { %1781 = vrot.lane.b32.xlu1 %v1779_v7, %s3073_s3  ;;  %v2753_v7 = vpack.c.bf16 %v2097_v6, %v2096_v5 }
0x208d   :  { %v1782_v9 = vpop.permute.xlu1 %1781 }
0x208e   :  { %v1784_v59 = vadd.f32 %v1782_v9, %v1774_v8 }
0x2090   :  { %2871 = vtanh.f32 %v1784_v59 }
0x209a   :  { %v2872_v11 = vpop.eup %2871 }
0x209b   :  { %1787 = vrot.lane.b32.xlu0 %v2872_v11, %s3072_s22 }
0x210d   :  { %v1788_v12 = vpop.permute.xlu0 %1787 }
0x210e   :  { %v1790_v17 = vmul.f32 %v2870_v53, %v1788_v12  ;;  %v2750_v53 = vpack.c.bf16 %v2095_v4, %v2094_v14  ;;  %v2239_v12 = vld [vmem:[%s3518_s8] ss:$0 sm:$0xff] }
0x2110   :  { %1793 = vrot.lane.b32.xlu1 %v1790_v17, %s3073_s3 }
0x2182   :  { %v1794_v20 = vpop.permute.xlu1 %1793 }
0x2183   :  { %2578 = vmatmul.mubr.msk.f32.vlgmr.msra.gmra.mrb[18].mxu0 %vm264_vm1, %v1794_v20 }
0x2184   :  { %2745 = vmatpush3.bf16.msra.mxu0 %v3363_v10  ;;  %2599 = vmatprep.mubr.msk.f32.mxu0 %vm3070_vm0, %v3071_v1 }
0x2185   :  { %2746 = vmatprep.subr.bf16.mxu0 %v3069_v0 }
0x2188   :  { %2748 = vmatpush3.bf16.msra.mxu0 %v3367_v13 }
0x2256   :  { %v1863_v22 = vpop.f32.mrb[18].mxu0 }
0x2257   :  { %v1867_v23 = vadd.f32 %v1863_v22, %v1266_v21  ;;  %v2579_v24 = vpop.f32.mrb[19].mxu0 }
0x2259   :  { %2873 = vtanh.f32 %v1867_v23  ;;  %v2234_v26 = vmul.f32 -1.442695, %v1867_v23 }
0x225b   :  { %2875 = vpow2.f32 %v2234_v26 }
0x2263   :  { %v2874_v15 = vpop.eup %2873 }
0x2264   :  { %1877 = vrot.lane.b32.xlu0 %v2874_v15, %s3072_s22 }
0x2265   :  { %v2876_v10 = vpop.eup %2875 }
0x2266   :  { %v1871_v27 = vadd.f32 1.0, %v2876_v10 }
0x2268   :  { %2877 = vrcp.f32 %v1871_v27 }
0x2272   :  { %v2878_v28 = vpop.eup %2877 }
0x2273   :  { %v1875_v13 = vmul.f32 %v2878_v28, %v1784_v59 }
0x22d6   :  { %v1878_v29 = vpop.permute.xlu0 %1877 }
0x22d7   :  { %v1880_v19 = vmul.f32 %v2878_v28, %v1878_v29 }
0x22d9   :  { %1882 = vrot.lane.b32.xlu1 %v1880_v19, %s3073_s3 }
0x234b   :  { %v1883_v36 = vpop.permute.xlu1 %1882 }
0x234c   :  { %v1885_v58 = vadd.f32 %v1883_v36, %v1875_v13 }
0x234e   :  { %2879 = vtanh.f32 %v1885_v58 }
0x2358   :  { %v2880_v16 = vpop.eup %2879 }
0x2359   :  { %1888 = vrot.lane.b32.xlu0 %v2880_v16, %s3072_s22 }
0x23cb   :  { %v1889_v30 = vpop.permute.xlu0 %1888 }
0x23cc   :  { %v1891_v31 = vmul.f32 %v2878_v28, %v1889_v30 }
0x23ce   :  { %1894 = vrot.lane.b32.xlu1 %v1891_v31, %s3073_s3 }
0x2440   :  { %v1895_v32 = vpop.permute.xlu1 %1894 }
0x2441   :  { %2589 = vmatmul.mubr.msk.f32.vlgmr.msra.gmra.mrb[24].mxu1 %vm264_vm1, %v1895_v32 }
0x2442   :  { %2610 = vmatprep.mubr.msk.f32.mxu1 %vm3070_vm0, %v3071_v1  ;;  %2751 = vmatpush3.bf16.msra.mxu1 %v2750_v53 }
0x2443   :  { %2752 = vmatprep.subr.bf16.mxu1 %v3069_v0 }
0x2446   :  { %2754 = vmatpush3.bf16.msra.mxu1 %v2753_v7 }
0x2514   :  { %v1964_v33 = vpop.f32.mrb[24].mxu1 }
0x2515   :  { %v1968_v34 = vadd.f32 %v1964_v33, %v1271_v57  ;;  %v2590_v35 = vpop.f32.mrb[25].mxu1 }
0x2517   :  { %2881 = vtanh.f32 %v1968_v34  ;;  %v2236_v38 = vmul.f32 -1.442695, %v1968_v34 }
0x2519   :  { %2883 = vpow2.f32 %v2236_v38 }
0x2521   :  { %v2882_v37 = vpop.eup %2881 }
0x2522   :  { %1978 = vrot.lane.b32.xlu0 %v2882_v37, %s3072_s22 }
0x2523   :  { %v2884_v39 = vpop.eup %2883 }
0x2524   :  { %v1972_v40 = vadd.f32 1.0, %v2884_v39 }
0x2526   :  { %2885 = vrcp.f32 %v1972_v40 }
0x2530   :  { %v2886_v41 = vpop.eup %2885 }
0x2531   :  { %v1976_v1 = vmul.f32 %v2886_v41, %v1885_v58 }
0x2594   :  { %v1979_v42 = vpop.permute.xlu0 %1978 }
0x2595   :  { %v1981_v43 = vmul.f32 %v2886_v41, %v1979_v42 }
0x2597   :  { %1983 = vrot.lane.b32.xlu1 %v1981_v43, %s3073_s3 }
0x2609   :  { %v1984_v44 = vpop.permute.xlu1 %1983 }
0x260a   :  { %v1986_v18 = vadd.f32 %v1984_v44, %v1976_v1 }
0x260c   :  { %2887 = vtanh.f32 %v1986_v18 }
0x2616   :  { %v2888_v45 = vpop.eup %2887 }
0x2617   :  { %1989 = vrot.lane.b32.xlu0 %v2888_v45, %s3072_s22 }
0x2689   :  { %v1990_v46 = vpop.permute.xlu0 %1989 }
0x268a   :  { %v1992_v47 = vmul.f32 %v2886_v41, %v1990_v46 }
0x268c   :  { %1995 = vrot.lane.b32.xlu1 %v1992_v47, %s3073_s3 }
0x26fe   :  { %v1996_v48 = vpop.permute.xlu1 %1995 }
0x26ff   :  { %2600 = vmatmul.mubr.msk.f32.vlgmr.msra.gmra.mrb[20].mxu0 %vm264_vm1, %v1996_v48 }
0x27d2   :  { %v2065_v50 = vpop.f32.mrb[20].mxu0 }
0x27d3   :  { %v2069_v55 = vadd.f32 %v2065_v50, %v1276_v49  ;;  %v2601_v51 = vpop.f32.mrb[21].mxu0 }
0x27d5   :  { %2889 = vtanh.f32 %v2069_v55  ;;  %v2238_v54 = vmul.f32 -1.442695, %v2069_v55 }
0x27d7   :  { %2891 = vpow2.f32 %v2238_v54 }
0x27df   :  { %v2890_v52 = vpop.eup %2889 }
0x27e0   :  { %2079 = vrot.lane.b32.xlu0 %v2890_v52, %s3072_s22 }
0x27e1   :  { %v2892_v56 = vpop.eup %2891 }
0x27e2   :  { %v2073_v60 = vadd.f32 1.0, %v2892_v56 }
0x27e4   :  { %2893 = vrcp.f32 %v2073_v60 }
0x27ee   :  { %v2894_v61 = vpop.eup %2893 }
0x27ef   :  { %v2077_v2 = vmul.f32 %v2894_v61, %v1986_v18 }
0x2852   :  { %v2080_v62 = vpop.permute.xlu0 %2079 }
0x2853   :  { %v2082_v63 = vmul.f32 %v2894_v61, %v2080_v62 }
0x2855   :  { %2084 = vrot.lane.b32.xlu1 %v2082_v63, %s3073_s3 }
0x28c7   :  { %v2085_v3 = vpop.permute.xlu1 %2084 }
0x28c8   :  { %v2087_v25 = vadd.f32 %v2085_v3, %v2077_v2 }
0x28ca   :  { %2895 = vtanh.f32 %v2087_v25 }
0x28d4   :  { %v2896_v8 = vpop.eup %2895 }
0x28d5   :  { %2090 = vrot.lane.b32.xlu0 %v2896_v8, %s3072_s22 }
0x2947   :  { %v2091_v9 = vpop.permute.xlu0 %2090 }
0x2948   :  { %v2093_v59 = vmul.f32 %v2894_v61, %v2091_v9 }
0x294a   :  { %2106 = vrot.lane.b32.xlu1 %v2093_v59, %s3073_s3 }
0x29bc   :  { %v2107_v11 = vpop.permute.xlu1 %2106 }
0x29bd   :  { %2611 = vmatmul.mubr.msk.f32.vlgmr.msra.gmra.mrb[26].mxu1 %vm264_vm1, %v2107_v11 }
0x2a90   :  { %v2176_v17 = vpop.f32.mrb[26].mxu1 }
0x2a91   :  { %v2177_v20 = vadd.f32 %v2239_v12, %v2176_v17  ;;  %v2612_v0 = vpop.f32.mrb[27].mxu1 }
0x2a93   :  { %2180 = vst [vmem:[#allocation15] sm:$0xff] %v2177_v20 }
0x2a94   :  { %3040 = shalt.err (!%p3037_p10)
}
0x2a95   :  { %s3041_s4 = scalar_lea.hbm %s3519_s9, 128 }
0x2a96   :  { %p3042_p11 = scmp.ne.s32.totalorder %s3519_s9, %s3041_s4  ;;  %p3045_p12 = scmp.lt.u32.totalorder %s3041_s4, %s3519_s9 }
0x2a98   :  { %p3047_p13 = pnand %p3045_p12, %p3042_p11 }
0x2a9a   :  { %3050 = shalt.err (!%p3047_p13)
}
0x2a9b   :  { %2190 = dma.vmem_to_hbm [thread:$0]  %s2188_s23, 128, %s3519_s9, [#allocation6]  }
0x2a9c   :  { %3059 = dma.done.wait [#allocation6], 128  }
0x2a9d   :  { %3060 = vsyncadd [#allocation6], 4294967168 }
0x2a9e   :  { %2194 = vsyncpa [#allocation5], 1 }
0x2a9f   :  { %2195 = vsyncpa [#allocation8], 1 }
0x2aa0   :  { %2196 = vsyncpa [#allocation11], 1 }
0x2aa1   :  { %2197 = vsyncpa [#allocation14], 1 }
0x2aa2   :  { %2198 = vsyncpa [#allocation6], 1 }

</bundles_post_ra>
